<compile_context>
chip_gen: v7x
topology: tpu7x:2x2x1
jax: 0.10.0
libtpu: 0.0.40
codegen_flags: <defaults>
</compile_context>

<pallas_src>
import jax
import jax.numpy as jnp
from jax.experimental import pallas as pl
from jax.experimental.pallas import tpu as pltpu

VOCAB = 256        # small vocab for the test
HID = 128          # hidden_dim of the torch module (also the embedding dim)
NUM_LABELS = 8     # num_labels for the test


# ---------------------------------------------------------------------------
# One GRU step for a single direction (PyTorch gate semantics, fused weights).
#   gx = x @ W_x + b_x        W_x : (I, 3H), columns = [r | z | n]
#   gh = h @ W_h              W_h : (H, 3H), columns = [r | z | n]
#   r  = sigmoid(gx_r + gh_r)            (b_x_r = b_ih_r + b_hh_r)
#   z  = sigmoid(gx_z + gh_z)            (b_x_z = b_ih_z + b_hh_z)
#   n  = tanh(gx_n + r * (gh_n + b_hn))  (b_x_n = b_ih_n, b_hn = b_hh_n)
#   h' = (1 - z) * n + z * h  ==  n + z * (h - n)
# ---------------------------------------------------------------------------
def _gru_dir_step(x, h, w_x, w_h, b_x, b_hn):
    H = h.shape[-1]
    gx = jnp.dot(x, w_x, preferred_element_type=jnp.float32) + b_x   # (Bp, 3H)
    gh = jnp.dot(h, w_h, preferred_element_type=jnp.float32)         # (Bp, 3H)
    r = jax.nn.sigmoid(gx[:, :H] + gh[:, :H])
    z = jax.nn.sigmoid(gx[:, H:2 * H] + gh[:, H:2 * H])
    n = jnp.tanh(gx[:, 2 * H:] + r * (gh[:, 2 * H:] + b_hn))
    return n + z * (h - n)


# ----------------------------- Pallas kernels ------------------------------
def _bigru_layer_kernel(xf_ref, xb_ref, w_x_ref, w_h_ref, b_x_ref, b_hn_ref,
                        out_f_ref, out_b_ref, h_ref):
    """One time step of a fused bidirectional GRU layer (grid axis = time)."""
    t = pl.program_id(0)

    @pl.when(t == 0)
    def _():
        h_ref[...] = jnp.zeros_like(h_ref)

    h_f = _gru_dir_step(xf_ref[0], h_ref[0], w_x_ref[0], w_h_ref[0],
                        b_x_ref[0], b_hn_ref[0])
    h_b = _gru_dir_step(xb_ref[0], h_ref[1], w_x_ref[1], w_h_ref[1],
                        b_x_ref[1], b_hn_ref[1])
    h_ref[0] = h_f
    h_ref[1] = h_b
    out_f_ref[0] = h_f               # fwd output at time t
    out_b_ref[0] = h_b               # bwd output at time T-1-t


def _bigru_head_kernel(xf_ref, xb_ref, w_x_ref, w_h_ref, b_x_ref, b_hn_ref,
                       w_fc_ref, b_fc_ref, logits_ref, h_ref, hf0_ref):
    """Last bidir GRU layer fused with fc(out[:, 0, :])."""
    t = pl.program_id(0)
    last = pl.num_programs(0) - 1

    @pl.when(t == 0)
    def _():
        h_ref[...] = jnp.zeros_like(h_ref)

    h_f = _gru_dir_step(xf_ref[0], h_ref[0], w_x_ref[0], w_h_ref[0],
                        b_x_ref[0], b_hn_ref[0])
    h_b = _gru_dir_step(xb_ref[0], h_ref[1], w_x_ref[1], w_h_ref[1],
                        b_x_ref[1], b_hn_ref[1])
    h_ref[0] = h_f
    h_ref[1] = h_b

    @pl.when(t == 0)
    def _():
        hf0_ref[...] = h_f                            # fwd hidden at time 0
        logits_ref[...] = jnp.zeros_like(logits_ref)  # defined before writeback

    @pl.when(t == last)
    def _():
        # out[:, 0, :] == [fwd hidden at t=0 | bwd hidden after the full sweep]
        # fc is split into fwd/bwd halves to avoid an in-kernel lane concat.
        logits_ref[...] = (
            jnp.dot(hf0_ref[...], w_fc_ref[0], preferred_element_type=jnp.float32)
            + jnp.dot(h_b, w_fc_ref[1], preferred_element_type=jnp.float32)
            + b_fc_ref[...])


# ------------------------------ call wrappers -------------------------------
def _resident(shape):
    """Whole-array block with a constant index_map (stays resident in VMEM)."""
    n = len(shape)
    return pl.BlockSpec(shape, lambda t, _n=n: (0,) * _n)


def bigru_layer(x_seq, p):
    """One fused bidirectional GRU layer. x_seq: (T, Bp, I) -> (T, Bp, 2H)."""
    T, Bp, I = x_seq.shape
    H = HID
    out_f, out_b = pl.pallas_call(
        _bigru_layer_kernel,
        grid=(T,),
        in_specs=[
            pl.BlockSpec((1, Bp, I), lambda t: (t, 0, 0)),                    # fwd: x[t]
            pl.BlockSpec((1, Bp, I), lambda t, _T=T: (_T - 1 - t, 0, 0)),     # bwd: x[T-1-t]
            _resident(p["w_x"].shape), _resident(p["w_h"].shape),
            _resident(p["b_x"].shape), _resident(p["b_hn"].shape),
        ],
        out_specs=[
            pl.BlockSpec((1, Bp, H), lambda t: (t, 0, 0)),
            pl.BlockSpec((1, Bp, H), lambda t, _T=T: (_T - 1 - t, 0, 0)),
        ],
        out_shape=[
            jax.ShapeDtypeStruct((T, Bp, H), jnp.float32),
            jax.ShapeDtypeStruct((T, Bp, H), jnp.float32),
        ],
        scratch_shapes=[pltpu.VMEM((2, Bp, H), jnp.float32)],
        compiler_params=pltpu.CompilerParams(
            dimension_semantics=("arbitrary",)),
    )(x_seq, x_seq, p["w_x"], p["w_h"], p["b_x"], p["b_hn"])
    return jnp.concatenate([out_f, out_b], axis=-1)


def bigru_head(x_seq, p, w_fc, b_fc):
    """Final bidirectional GRU layer fused with the fc head. -> (Bp, Lp)."""
    T, Bp, I = x_seq.shape
    H = HID
    Lp = w_fc.shape[-1]
    return pl.pallas_call(
        _bigru_head_kernel,
        grid=(T,),
        in_specs=[
            pl.BlockSpec((1, Bp, I), lambda t: (t, 0, 0)),
            pl.BlockSpec((1, Bp, I), lambda t, _T=T: (_T - 1 - t, 0, 0)),
            _resident(p["w_x"].shape), _resident(p["w_h"].shape),
            _resident(p["b_x"].shape), _resident(p["b_hn"].shape),
            _resident(w_fc.shape), _resident(b_fc.shape),
        ],
        out_specs=pl.BlockSpec((Bp, Lp), lambda t: (0, 0)),
        out_shape=jax.ShapeDtypeStruct((Bp, Lp), jnp.float32),
        scratch_shapes=[pltpu.VMEM((2, Bp, H), jnp.float32),
                        pltpu.VMEM((Bp, H), jnp.float32)],
        compiler_params=pltpu.CompilerParams(
            dimension_semantics=("arbitrary",)),
    )(x_seq, x_seq, p["w_x"], p["w_h"], p["b_x"], p["b_hn"], w_fc, b_fc)


# ------------------------------ model forward -------------------------------
@jax.jit
def birnn_forward(input_ids, params):
    """Matches BiRNN.forward inference path: fc(bigru3(bigru2(bigru1(emb)))[:, 0, :])."""
    # TODO(synk): the training-only labels/CrossEntropyLoss branch is not implemented.
    B, T = input_ids.shape
    x = params["embedding"][input_ids]                        # (B, T, H) XLA gather
    x = jnp.transpose(x, (1, 0, 2)).astype(jnp.float32)       # time-major (T, B, H)
    Bp = max(8, -(-B // 8) * 8)                               # pad rows to sublane tile
    if Bp != B:
        x = jnp.pad(x, ((0, 0), (0, Bp - B), (0, 0)))

    x = bigru_layer(x, params["gru1"])                        # (T, Bp, 2H)
    x = bigru_layer(x, params["gru2"])                        # (T, Bp, 2H)

    # fc weights: pad the label dim to a full 128-lane tile (lane-dense store)
    # and split rows into the fwd / bwd halves so the kernel avoids a concat.
    L = params["fc_w"].shape[-1]
    Lp = max(128, -(-L // 128) * 128)
    w_fc = jnp.pad(params["fc_w"], ((0, 0), (0, Lp - L))).reshape(2, HID, Lp)
    b_fc = jnp.pad(params["fc_b"], ((0, 0), (0, Lp - L)))

    logits = bigru_head(x, params["gru3"], w_fc, b_fc)        # (Bp, Lp)
    return {"logits": logits[:B, :L]}


# ------------------------------ parameter init ------------------------------
def _uniform(key, shape, bound):
    return jax.random.uniform(key, shape, jnp.float32, -bound, bound)


def init_gru_layer(key, in_dim, hid):
    bound = hid ** -0.5
    k = jax.random.split(key, 4)
    return {
        "w_x": _uniform(k[0], (2, in_dim, 3 * hid), bound),   # [r|z|n] input weights
        "w_h": _uniform(k[1], (2, hid, 3 * hid), bound),      # [r|z|n] hidden weights
        "b_x": _uniform(k[2], (2, 1, 3 * hid), bound),        # folded input-side biases
        "b_hn": _uniform(k[3], (2, 1, hid), bound),           # hidden n-gate bias
    }


def init_params(seed=0):
    key = jax.random.PRNGKey(seed)
    ke, k1, k2, k3, kfw, kfb = jax.random.split(key, 6)
    bound = (2 * HID) ** -0.5
    return {
        "embedding": 0.1 * jax.random.normal(ke, (VOCAB, HID), jnp.float32),
        "gru1": init_gru_layer(k1, HID, HID),
        "gru2": init_gru_layer(k2, 2 * HID, HID),
        "gru3": init_gru_layer(k3, 2 * HID, HID),
        "fc_w": _uniform(kfw, (2 * HID, NUM_LABELS), bound),
        "fc_b": _uniform(kfb, (1, NUM_LABELS), bound),
    }


# -------------------------- pure-JAX reference path -------------------------
def _ref_gru_dir(x_seq, p, d):
    w_x, w_h = p["w_x"][d], p["w_h"][d]
    b_x, b_hn = p["b_x"][d], p["b_hn"][d]
    hp = jax.lax.Precision.HIGHEST

    def step(h, x):
        gx = jnp.dot(x, w_x, precision=hp) + b_x
        gh = jnp.dot(h, w_h, precision=hp)
        r = jax.nn.sigmoid(gx[:, :HID] + gh[:, :HID])
        z = jax.nn.sigmoid(gx[:, HID:2 * HID] + gh[:, HID:2 * HID])
        n = jnp.tanh(gx[:, 2 * HID:] + r * (gh[:, 2 * HID:] + b_hn))
        h_new = (1.0 - z) * n + z * h
        return h_new, h_new

    h0 = jnp.zeros((x_seq.shape[1], HID), jnp.float32)
    _, outs = jax.lax.scan(step, h0, x_seq)
    return outs


def _ref_bigru_layer(x_seq, p):
    out_f = _ref_gru_dir(x_seq, p, 0)
    out_b = _ref_gru_dir(x_seq[::-1], p, 1)[::-1]
    return jnp.concatenate([out_f, out_b], axis=-1)


def ref_forward(input_ids, params):
    x = jnp.transpose(params["embedding"][input_ids], (1, 0, 2))
    x = _ref_bigru_layer(x, params["gru1"])
    x = _ref_bigru_layer(x, params["gru2"])
    x = _ref_bigru_layer(x, params["gru3"])
    hp = jax.lax.Precision.HIGHEST
    return jnp.dot(x[0], params["fc_w"], precision=hp) + params["fc_b"]


if __name__ == "__main__":
    B, T = 2, 8
    params = init_params(seed=0)
    key = jax.random.PRNGKey(0)
    input_ids = jax.random.randint(key, (B, T), 0, VOCAB, dtype=jnp.int32)

    out = birnn_forward(input_ids, params)
    jax.block_until_ready(out)

    logits = out["logits"]
    assert logits.shape == (B, NUM_LABELS)
    assert logits.dtype == jnp.float32
    assert bool(jnp.all(jnp.isfinite(logits)))

    ref = ref_forward(input_ids, params)
    err = float(jnp.max(jnp.abs(logits - ref)))
    assert err < 2e-3, f"max abs diff vs reference: {err}"

    print("KERNEL_OK")
</pallas_src>

<mosaic_0001>
module attributes {stable_mosaic.version = 11 : i64} {
  func.func @_bigru_layer_kernel(%arg0: i32, %arg1: memref<1x8x128xf32, #tpu.memory_space<vmem>>, %arg2: memref<1x8x128xf32, #tpu.memory_space<vmem>>, %arg3: memref<2x128x384xf32, #tpu.memory_space<vmem>>, %arg4: memref<2x128x384xf32, #tpu.memory_space<vmem>>, %arg5: memref<2x1x384xf32, #tpu.memory_space<vmem>>, %arg6: memref<2x1x128xf32, #tpu.memory_space<vmem>>, %arg7: memref<1x8x128xf32, #tpu.memory_space<vmem>>, %arg8: memref<1x8x128xf32, #tpu.memory_space<vmem>>, %arg9: memref<2x8x128xf32, #tpu.memory_space<vmem>>) attributes {dimension_semantics = [#tpu.dimension_semantics<arbitrary>], iteration_bounds = array<i64: 8>, scalar_prefetch = 0 : i64, scratch_operands = 1 : i64, tpu.core_type = #tpu.core_type<tc>, window_params = [{transform_indices = @transform_0, window_bounds = array<i64: 1, 8, 128>}, {transform_indices = @transform_1, window_bounds = array<i64: 1, 8, 128>}, {pipeline_mode = #tpu.pipeline_mode<synchronous>, transform_indices = @transform_2, window_bounds = array<i64: 2, 128, 384>}, {pipeline_mode = #tpu.pipeline_mode<synchronous>, transform_indices = @transform_3, window_bounds = array<i64: 2, 128, 384>}, {pipeline_mode = #tpu.pipeline_mode<synchronous>, transform_indices = @transform_4, window_bounds = array<i64: 2, 1, 384>}, {pipeline_mode = #tpu.pipeline_mode<synchronous>, transform_indices = @transform_5, window_bounds = array<i64: 2, 1, 128>}, {transform_indices = @transform_6, window_bounds = array<i64: 1, 8, 128>}, {transform_indices = @transform_7, window_bounds = array<i64: 1, 8, 128>}]} {
    %c0_i32 = arith.constant 0 : i32
    %0 = arith.cmpi eq, %arg0, %c0_i32 : i32
    %1 = arith.extui %0 : i1 to i32
    %c0_i32_0 = arith.constant 0 : i32
    %2 = arith.cmpi ne, %1, %c0_i32_0 : i32
    scf.if %2 {
      %cst_54 = arith.constant 0.000000e+00 : f32
      %99 = vector.broadcast %cst_54 : f32 to vector<2x8x128xf32>
      %c0_55 = arith.constant 0 : index
      %c0_56 = arith.constant 0 : index
      %c0_57 = arith.constant 0 : index
      %100 = vector.load %arg9[%c0_55, %c0_56, %c0_57] : memref<2x8x128xf32, #tpu.memory_space<vmem>>, vector<2x8x128xf32>
      tpu.vector_store %arg9[%c0_55, %c0_56, %c0_57], %99 {strides = array<i32>} : memref<2x8x128xf32, #tpu.memory_space<vmem>>, vector<2x8x128xf32>,
    } else {
    }
    %c0 = arith.constant 0 : index
    %c0_1 = arith.constant 0 : index
    %c0_2 = arith.constant 0 : index
    %3 = vector.load %arg1[%c0, %c0_1, %c0_2] : memref<1x8x128xf32, #tpu.memory_space<vmem>>, vector<1x8x128xf32>
    %4 = vector.shape_cast %3 : vector<1x8x128xf32> to vector<8x128xf32>
    %c0_3 = arith.constant 0 : index
    %c0_4 = arith.constant 0 : index
    %c0_5 = arith.constant 0 : index
    %5 = vector.load %arg9[%c0_3, %c0_4, %c0_5] : memref<2x8x128xf32, #tpu.memory_space<vmem>>, vector<1x8x128xf32>
    %6 = vector.shape_cast %5 : vector<1x8x128xf32> to vector<8x128xf32>
    %c0_6 = arith.constant 0 : index
    %c0_7 = arith.constant 0 : index
    %c0_8 = arith.constant 0 : index
    %7 = vector.load %arg3[%c0_6, %c0_7, %c0_8] : memref<2x128x384xf32, #tpu.memory_space<vmem>>, vector<1x128x384xf32>
    %8 = vector.shape_cast %7 : vector<1x128x384xf32> to vector<128x384xf32>
    %c0_9 = arith.constant 0 : index
    %c0_10 = arith.constant 0 : index
    %c0_11 = arith.constant 0 : index
    %9 = vector.load %arg4[%c0_9, %c0_10, %c0_11] : memref<2x128x384xf32, #tpu.memory_space<vmem>>, vector<1x128x384xf32>
    %10 = vector.shape_cast %9 : vector<1x128x384xf32> to vector<128x384xf32>
    %c0_12 = arith.constant 0 : index
    %c0_13 = arith.constant 0 : index
    %c0_14 = arith.constant 0 : index
    %11 = vector.load %arg5[%c0_12, %c0_13, %c0_14] : memref<2x1x384xf32, #tpu.memory_space<vmem>>, vector<1x1x384xf32>
    %12 = vector.shape_cast %11 : vector<1x1x384xf32> to vector<1x384xf32>
    %c0_15 = arith.constant 0 : index
    %c0_16 = arith.constant 0 : index
    %c0_17 = arith.constant 0 : index
    %13 = vector.load %arg6[%c0_15, %c0_16, %c0_17] : memref<2x1x128xf32, #tpu.memory_space<vmem>>, vector<1x1x128xf32>
    %14 = vector.shape_cast %13 : vector<1x1x128xf32> to vector<1x128xf32>
    %cst = arith.constant dense<0.000000e+00> : vector<8x384xf32>
    %15 = tpu.matmul %4, %8, %cst {dimension_numbers = #tpu.dot_dimension_numbers<[1], [0], [0], [1], [0, 0, 1, 1], [], []>} : vector<8x128xf32>, vector<128x384xf32>, vector<8x384xf32> -> vector<8x384xf32>
    %16 = vector.broadcast %12 : vector<1x384xf32> to vector<8x384xf32>
    %17 = arith.addf %15, %16 : vector<8x384xf32>
    %cst_18 = arith.constant dense<0.000000e+00> : vector<8x384xf32>
    %18 = tpu.matmul %6, %10, %cst_18 {dimension_numbers = #tpu.dot_dimension_numbers<[1], [0], [0], [1], [0, 0, 1, 1], [], []>} : vector<8x128xf32>, vector<128x384xf32>, vector<8x384xf32> -> vector<8x384xf32>
    %19 = vector.extract_strided_slice %17 {offsets = [0, 0], sizes = [8, 128], strides = [1, 1]} : vector<8x384xf32> to vector<8x128xf32>
    %20 = vector.extract_strided_slice %18 {offsets = [0, 0], sizes = [8, 128], strides = [1, 1]} : vector<8x384xf32> to vector<8x128xf32>
    %21 = arith.addf %19, %20 : vector<8x128xf32>
    %22 = arith.negf %21 : vector<8x128xf32>
    %23 = math.exp %22 : vector<8x128xf32>
    %cst_19 = arith.constant 1.000000e+00 : f32
    %24 = vector.broadcast %cst_19 : f32 to vector<8x128xf32>
    %25 = arith.addf %24, %23 : vector<8x128xf32>
    %26 = arith.divf %24, %25 : vector<8x128xf32>
    %27 = vector.extract_strided_slice %17 {offsets = [0, 128], sizes = [8, 128], strides = [1, 1]} : vector<8x384xf32> to vector<8x128xf32>
    %28 = vector.extract_strided_slice %18 {offsets = [0, 128], sizes = [8, 128], strides = [1, 1]} : vector<8x384xf32> to vector<8x128xf32>
    %29 = arith.addf %27, %28 : vector<8x128xf32>
    %30 = arith.negf %29 : vector<8x128xf32>
    %31 = math.exp %30 : vector<8x128xf32>
    %cst_20 = arith.constant 1.000000e+00 : f32
    %32 = vector.broadcast %cst_20 : f32 to vector<8x128xf32>
    %33 = arith.addf %32, %31 : vector<8x128xf32>
    %34 = arith.divf %32, %33 : vector<8x128xf32>
    %35 = vector.extract_strided_slice %17 {offsets = [0, 256], sizes = [8, 128], strides = [1, 1]} : vector<8x384xf32> to vector<8x128xf32>
    %36 = vector.extract_strided_slice %18 {offsets = [0, 256], sizes = [8, 128], strides = [1, 1]} : vector<8x384xf32> to vector<8x128xf32>
    %37 = vector.broadcast %14 : vector<1x128xf32> to vector<8x128xf32>
    %38 = arith.addf %36, %37 : vector<8x128xf32>
    %39 = arith.mulf %26, %38 : vector<8x128xf32>
    %40 = arith.addf %35, %39 : vector<8x128xf32>
    %41 = math.tanh %40 : vector<8x128xf32>
    %42 = arith.subf %6, %41 : vector<8x128xf32>
    %43 = arith.mulf %34, %42 : vector<8x128xf32>
    %44 = arith.addf %41, %43 : vector<8x128xf32>
    %c0_21 = arith.constant 0 : index
    %c0_22 = arith.constant 0 : index
    %c0_23 = arith.constant 0 : index
    %45 = vector.load %arg2[%c0_21, %c0_22, %c0_23] : memref<1x8x128xf32, #tpu.memory_space<vmem>>, vector<1x8x128xf32>
    %46 = vector.shape_cast %45 : vector<1x8x128xf32> to vector<8x128xf32>
    %c1 = arith.constant 1 : index
    %c0_24 = arith.constant 0 : index
    %c0_25 = arith.constant 0 : index
    %47 = vector.load %arg9[%c1, %c0_24, %c0_25] : memref<2x8x128xf32, #tpu.memory_space<vmem>>, vector<1x8x128xf32>
    %48 = vector.shape_cast %47 : vector<1x8x128xf32> to vector<8x128xf32>
    %c1_26 = arith.constant 1 : index
    %c0_27 = arith.constant 0 : index
    %c0_28 = arith.constant 0 : index
    %49 = vector.load %arg3[%c1_26, %c0_27, %c0_28] : memref<2x128x384xf32, #tpu.memory_space<vmem>>, vector<1x128x384xf32>
    %50 = vector.shape_cast %49 : vector<1x128x384xf32> to vector<128x384xf32>
    %c1_29 = arith.constant 1 : index
    %c0_30 = arith.constant 0 : index
    %c0_31 = arith.constant 0 : index
    %51 = vector.load %arg4[%c1_29, %c0_30, %c0_31] : memref<2x128x384xf32, #tpu.memory_space<vmem>>, vector<1x128x384xf32>
    %52 = vector.shape_cast %51 : vector<1x128x384xf32> to vector<128x384xf32>
    %c1_32 = arith.constant 1 : index
    %c0_33 = arith.constant 0 : index
    %c0_34 = arith.constant 0 : index
    %53 = vector.load %arg5[%c1_32, %c0_33, %c0_34] : memref<2x1x384xf32, #tpu.memory_space<vmem>>, vector<1x1x384xf32>
    %54 = vector.shape_cast %53 : vector<1x1x384xf32> to vector<1x384xf32>
    %c1_35 = arith.constant 1 : index
    %c0_36 = arith.constant 0 : index
    %c0_37 = arith.constant 0 : index
    %55 = vector.load %arg6[%c1_35, %c0_36, %c0_37] : memref<2x1x128xf32, #tpu.memory_space<vmem>>, vector<1x1x128xf32>
    %56 = vector.shape_cast %55 : vector<1x1x128xf32> to vector<1x128xf32>
    %cst_38 = arith.constant dense<0.000000e+00> : vector<8x384xf32>
    %57 = tpu.matmul %46, %50, %cst_38 {dimension_numbers = #tpu.dot_dimension_numbers<[1], [0], [0], [1], [0, 0, 1, 1], [], []>} : vector<8x128xf32>, vector<128x384xf32>, vector<8x384xf32> -> vector<8x384xf32>
    %58 = vector.broadcast %54 : vector<1x384xf32> to vector<8x384xf32>
    %59 = arith.addf %57, %58 : vector<8x384xf32>
    %cst_39 = arith.constant dense<0.000000e+00> : vector<8x384xf32>
    %60 = tpu.matmul %48, %52, %cst_39 {dimension_numbers = #tpu.dot_dimension_numbers<[1], [0], [0], [1], [0, 0, 1, 1], [], []>} : vector<8x128xf32>, vector<128x384xf32>, vector<8x384xf32> -> vector<8x384xf32>
    %61 = vector.extract_strided_slice %59 {offsets = [0, 0], sizes = [8, 128], strides = [1, 1]} : vector<8x384xf32> to vector<8x128xf32>
    %62 = vector.extract_strided_slice %60 {offsets = [0, 0], sizes = [8, 128], strides = [1, 1]} : vector<8x384xf32> to vector<8x128xf32>
    %63 = arith.addf %61, %62 : vector<8x128xf32>
    %64 = arith.negf %63 : vector<8x128xf32>
    %65 = math.exp %64 : vector<8x128xf32>
    %cst_40 = arith.constant 1.000000e+00 : f32
    %66 = vector.broadcast %cst_40 : f32 to vector<8x128xf32>
    %67 = arith.addf %66, %65 : vector<8x128xf32>
    %68 = arith.divf %66, %67 : vector<8x128xf32>
    %69 = vector.extract_strided_slice %59 {offsets = [0, 128], sizes = [8, 128], strides = [1, 1]} : vector<8x384xf32> to vector<8x128xf32>
    %70 = vector.extract_strided_slice %60 {offsets = [0, 128], sizes = [8, 128], strides = [1, 1]} : vector<8x384xf32> to vector<8x128xf32>
    %71 = arith.addf %69, %70 : vector<8x128xf32>
    %72 = arith.negf %71 : vector<8x128xf32>
    %73 = math.exp %72 : vector<8x128xf32>
    %cst_41 = arith.constant 1.000000e+00 : f32
    %74 = vector.broadcast %cst_41 : f32 to vector<8x128xf32>
    %75 = arith.addf %74, %73 : vector<8x128xf32>
    %76 = arith.divf %74, %75 : vector<8x128xf32>
    %77 = vector.extract_strided_slice %59 {offsets = [0, 256], sizes = [8, 128], strides = [1, 1]} : vector<8x384xf32> to vector<8x128xf32>
    %78 = vector.extract_strided_slice %60 {offsets = [0, 256], sizes = [8, 128], strides = [1, 1]} : vector<8x384xf32> to vector<8x128xf32>
    %79 = vector.broadcast %56 : vector<1x128xf32> to vector<8x128xf32>
    %80 = arith.addf %78, %79 : vector<8x128xf32>
    %81 = arith.mulf %68, %80 : vector<8x128xf32>
    %82 = arith.addf %77, %81 : vector<8x128xf32>
    %83 = math.tanh %82 : vector<8x128xf32>
    %84 = arith.subf %48, %83 : vector<8x128xf32>
    %85 = arith.mulf %76, %84 : vector<8x128xf32>
    %86 = arith.addf %83, %85 : vector<8x128xf32>
    %c0_42 = arith.constant 0 : index
    %c0_43 = arith.constant 0 : index
    %c0_44 = arith.constant 0 : index
    %87 = vector.load %arg9[%c0_42, %c0_43, %c0_44] : memref<2x8x128xf32, #tpu.memory_space<vmem>>, vector<1x8x128xf32>
    %88 = vector.shape_cast %87 : vector<1x8x128xf32> to vector<8x128xf32>
    %89 = vector.shape_cast %44 : vector<8x128xf32> to vector<1x8x128xf32>
    tpu.vector_store %arg9[%c0_42, %c0_43, %c0_44], %89 {strides = array<i32>} : memref<2x8x128xf32, #tpu.memory_space<vmem>>, vector<1x8x128xf32>,
    %c1_45 = arith.constant 1 : index
    %c0_46 = arith.constant 0 : index
    %c0_47 = arith.constant 0 : index
    %90 = vector.load %arg9[%c1_45, %c0_46, %c0_47] : memref<2x8x128xf32, #tpu.memory_space<vmem>>, vector<1x8x128xf32>
    %91 = vector.shape_cast %90 : vector<1x8x128xf32> to vector<8x128xf32>
    %92 = vector.shape_cast %86 : vector<8x128xf32> to vector<1x8x128xf32>
    tpu.vector_store %arg9[%c1_45, %c0_46, %c0_47], %92 {strides = array<i32>} : memref<2x8x128xf32, #tpu.memory_space<vmem>>, vector<1x8x128xf32>,
    %c0_48 = arith.constant 0 : index
    %c0_49 = arith.constant 0 : index
    %c0_50 = arith.constant 0 : index
    %93 = vector.load %arg7[%c0_48, %c0_49, %c0_50] : memref<1x8x128xf32, #tpu.memory_space<vmem>>, vector<1x8x128xf32>
    %94 = vector.shape_cast %93 : vector<1x8x128xf32> to vector<8x128xf32>
    %95 = vector.shape_cast %44 : vector<8x128xf32> to vector<1x8x128xf32>
    tpu.vector_store %arg7[%c0_48, %c0_49, %c0_50], %95 {strides = array<i32>} : memref<1x8x128xf32, #tpu.memory_space<vmem>>, vector<1x8x128xf32>,
    %c0_51 = arith.constant 0 : index
    %c0_52 = arith.constant 0 : index
    %c0_53 = arith.constant 0 : index
    %96 = vector.load %arg8[%c0_51, %c0_52, %c0_53] : memref<1x8x128xf32, #tpu.memory_space<vmem>>, vector<1x8x128xf32>
    %97 = vector.shape_cast %96 : vector<1x8x128xf32> to vector<8x128xf32>
    %98 = vector.shape_cast %86 : vector<8x128xf32> to vector<1x8x128xf32>
    tpu.vector_store %arg8[%c0_51, %c0_52, %c0_53], %98 {strides = array<i32>} : memref<1x8x128xf32, #tpu.memory_space<vmem>>, vector<1x8x128xf32>,
    return
  }
  func.func @transform_0(%arg0: i32) -> (i32, i32, i32) {
    %c0_i32 = arith.constant 0 : i32
    %c0_i32_0 = arith.constant 0 : i32
    %c0_i32_1 = arith.constant 0 : i32
    return %arg0, %c0_i32, %c0_i32_0 : i32, i32, i32
  }
  func.func @transform_1(%arg0: i32) -> (i32, i32, i32) {
    %c7_i32 = arith.constant 7 : i32
    %0 = arith.subi %c7_i32, %arg0 : i32
    %c0_i32 = arith.constant 0 : i32
    %c0_i32_0 = arith.constant 0 : i32
    %c0_i32_1 = arith.constant 0 : i32
    return %0, %c0_i32, %c0_i32_0 : i32, i32, i32
  }
  func.func @transform_2(%arg0: i32) -> (i32, i32, i32) {
    %c0_i32 = arith.constant 0 : i32
    %c0_i32_0 = arith.constant 0 : i32
    %c0_i32_1 = arith.constant 0 : i32
    %c0_i32_2 = arith.constant 0 : i32
    return %c0_i32, %c0_i32_0, %c0_i32_1 : i32, i32, i32
  }
  func.func @transform_3(%arg0: i32) -> (i32, i32, i32) {
    %c0_i32 = arith.constant 0 : i32
    %c0_i32_0 = arith.constant 0 : i32
    %c0_i32_1 = arith.constant 0 : i32
    %c0_i32_2 = arith.constant 0 : i32
    return %c0_i32, %c0_i32_0, %c0_i32_1 : i32, i32, i32
  }
  func.func @transform_4(%arg0: i32) -> (i32, i32, i32) {
    %c0_i32 = arith.constant 0 : i32
    %c0_i32_0 = arith.constant 0 : i32
    %c0_i32_1 = arith.constant 0 : i32
    %c0_i32_2 = arith.constant 0 : i32
    return %c0_i32, %c0_i32_0, %c0_i32_1 : i32, i32, i32
  }
  func.func @transform_5(%arg0: i32) -> (i32, i32, i32) {
    %c0_i32 = arith.constant 0 : i32
    %c0_i32_0 = arith.constant 0 : i32
    %c0_i32_1 = arith.constant 0 : i32
    %c0_i32_2 = arith.constant 0 : i32
    return %c0_i32, %c0_i32_0, %c0_i32_1 : i32, i32, i32
  }
  func.func @transform_6(%arg0: i32) -> (i32, i32, i32) {
    %c0_i32 = arith.constant 0 : i32
    %c0_i32_0 = arith.constant 0 : i32
    %c0_i32_1 = arith.constant 0 : i32
    return %arg0, %c0_i32, %c0_i32_0 : i32, i32, i32
  }
  func.func @transform_7(%arg0: i32) -> (i32, i32, i32) {
    %c7_i32 = arith.constant 7 : i32
    %0 = arith.subi %c7_i32, %arg0 : i32
    %c0_i32 = arith.constant 0 : i32
    %c0_i32_0 = arith.constant 0 : i32
    %c0_i32_1 = arith.constant 0 : i32
    return %0, %c0_i32, %c0_i32_0 : i32, i32, i32
  }
}

module attributes {stable_mosaic.version = 11 : i64} {
  func.func @_bigru_layer_kernel(%arg0: i32, %arg1: memref<1x8x256xf32, #tpu.memory_space<vmem>>, %arg2: memref<1x8x256xf32, #tpu.memory_space<vmem>>, %arg3: memref<2x256x384xf32, #tpu.memory_space<vmem>>, %arg4: memref<2x128x384xf32, #tpu.memory_space<vmem>>, %arg5: memref<2x1x384xf32, #tpu.memory_space<vmem>>, %arg6: memref<2x1x128xf32, #tpu.memory_space<vmem>>, %arg7: memref<1x8x128xf32, #tpu.memory_space<vmem>>, %arg8: memref<1x8x128xf32, #tpu.memory_space<vmem>>, %arg9: memref<2x8x128xf32, #tpu.memory_space<vmem>>) attributes {dimension_semantics = [#tpu.dimension_semantics<arbitrary>], iteration_bounds = array<i64: 8>, scalar_prefetch = 0 : i64, scratch_operands = 1 : i64, tpu.core_type = #tpu.core_type<tc>, window_params = [{transform_indices = @transform_0, window_bounds = array<i64: 1, 8, 256>}, {transform_indices = @transform_1, window_bounds = array<i64: 1, 8, 256>}, {pipeline_mode = #tpu.pipeline_mode<synchronous>, transform_indices = @transform_2, window_bounds = array<i64: 2, 256, 384>}, {pipeline_mode = #tpu.pipeline_mode<synchronous>, transform_indices = @transform_3, window_bounds = array<i64: 2, 128, 384>}, {pipeline_mode = #tpu.pipeline_mode<synchronous>, transform_indices = @transform_4, window_bounds = array<i64: 2, 1, 384>}, {pipeline_mode = #tpu.pipeline_mode<synchronous>, transform_indices = @transform_5, window_bounds = array<i64: 2, 1, 128>}, {transform_indices = @transform_6, window_bounds = array<i64: 1, 8, 128>}, {transform_indices = @transform_7, window_bounds = array<i64: 1, 8, 128>}]} {
    %c0_i32 = arith.constant 0 : i32
    %0 = arith.cmpi eq, %arg0, %c0_i32 : i32
    %1 = arith.extui %0 : i1 to i32
    %c0_i32_0 = arith.constant 0 : i32
    %2 = arith.cmpi ne, %1, %c0_i32_0 : i32
    scf.if %2 {
      %cst_54 = arith.constant 0.000000e+00 : f32
      %99 = vector.broadcast %cst_54 : f32 to vector<2x8x128xf32>
      %c0_55 = arith.constant 0 : index
      %c0_56 = arith.constant 0 : index
      %c0_57 = arith.constant 0 : index
      %100 = vector.load %arg9[%c0_55, %c0_56, %c0_57] : memref<2x8x128xf32, #tpu.memory_space<vmem>>, vector<2x8x128xf32>
      tpu.vector_store %arg9[%c0_55, %c0_56, %c0_57], %99 {strides = array<i32>} : memref<2x8x128xf32, #tpu.memory_space<vmem>>, vector<2x8x128xf32>,
    } else {
    }
    %c0 = arith.constant 0 : index
    %c0_1 = arith.constant 0 : index
    %c0_2 = arith.constant 0 : index
    %3 = vector.load %arg1[%c0, %c0_1, %c0_2] : memref<1x8x256xf32, #tpu.memory_space<vmem>>, vector<1x8x256xf32>
    %4 = vector.shape_cast %3 : vector<1x8x256xf32> to vector<8x256xf32>
    %c0_3 = arith.constant 0 : index
    %c0_4 = arith.constant 0 : index
    %c0_5 = arith.constant 0 : index
    %5 = vector.load %arg9[%c0_3, %c0_4, %c0_5] : memref<2x8x128xf32, #tpu.memory_space<vmem>>, vector<1x8x128xf32>
    %6 = vector.shape_cast %5 : vector<1x8x128xf32> to vector<8x128xf32>
    %c0_6 = arith.constant 0 : index
    %c0_7 = arith.constant 0 : index
    %c0_8 = arith.constant 0 : index
    %7 = vector.load %arg3[%c0_6, %c0_7, %c0_8] : memref<2x256x384xf32, #tpu.memory_space<vmem>>, vector<1x256x384xf32>
    %8 = vector.shape_cast %7 : vector<1x256x384xf32> to vector<256x384xf32>
    %c0_9 = arith.constant 0 : index
    %c0_10 = arith.constant 0 : index
    %c0_11 = arith.constant 0 : index
    %9 = vector.load %arg4[%c0_9, %c0_10, %c0_11] : memref<2x128x384xf32, #tpu.memory_space<vmem>>, vector<1x128x384xf32>
    %10 = vector.shape_cast %9 : vector<1x128x384xf32> to vector<128x384xf32>
    %c0_12 = arith.constant 0 : index
    %c0_13 = arith.constant 0 : index
    %c0_14 = arith.constant 0 : index
    %11 = vector.load %arg5[%c0_12, %c0_13, %c0_14] : memref<2x1x384xf32, #tpu.memory_space<vmem>>, vector<1x1x384xf32>
    %12 = vector.shape_cast %11 : vector<1x1x384xf32> to vector<1x384xf32>
    %c0_15 = arith.constant 0 : index
    %c0_16 = arith.constant 0 : index
    %c0_17 = arith.constant 0 : index
    %13 = vector.load %arg6[%c0_15, %c0_16, %c0_17] : memref<2x1x128xf32, #tpu.memory_space<vmem>>, vector<1x1x128xf32>
    %14 = vector.shape_cast %13 : vector<1x1x128xf32> to vector<1x128xf32>
    %cst = arith.constant dense<0.000000e+00> : vector<8x384xf32>
    %15 = tpu.matmul %4, %8, %cst {dimension_numbers = #tpu.dot_dimension_numbers<[1], [0], [0], [1], [0, 0, 1, 1], [], []>} : vector<8x256xf32>, vector<256x384xf32>, vector<8x384xf32> -> vector<8x384xf32>
    %16 = vector.broadcast %12 : vector<1x384xf32> to vector<8x384xf32>
    %17 = arith.addf %15, %16 : vector<8x384xf32>
    %cst_18 = arith.constant dense<0.000000e+00> : vector<8x384xf32>
    %18 = tpu.matmul %6, %10, %cst_18 {dimension_numbers = #tpu.dot_dimension_numbers<[1], [0], [0], [1], [0, 0, 1, 1], [], []>} : vector<8x128xf32>, vector<128x384xf32>, vector<8x384xf32> -> vector<8x384xf32>
    %19 = vector.extract_strided_slice %17 {offsets = [0, 0], sizes = [8, 128], strides = [1, 1]} : vector<8x384xf32> to vector<8x128xf32>
    %20 = vector.extract_strided_slice %18 {offsets = [0, 0], sizes = [8, 128], strides = [1, 1]} : vector<8x384xf32> to vector<8x128xf32>
    %21 = arith.addf %19, %20 : vector<8x128xf32>
    %22 = arith.negf %21 : vector<8x128xf32>
    %23 = math.exp %22 : vector<8x128xf32>
    %cst_19 = arith.constant 1.000000e+00 : f32
    %24 = vector.broadcast %cst_19 : f32 to vector<8x128xf32>
    %25 = arith.addf %24, %23 : vector<8x128xf32>
    %26 = arith.divf %24, %25 : vector<8x128xf32>
    %27 = vector.extract_strided_slice %17 {offsets = [0, 128], sizes = [8, 128], strides = [1, 1]} : vector<8x384xf32> to vector<8x128xf32>
    %28 = vector.extract_strided_slice %18 {offsets = [0, 128], sizes = [8, 128], strides = [1, 1]} : vector<8x384xf32> to vector<8x128xf32>
    %29 = arith.addf %27, %28 : vector<8x128xf32>
    %30 = arith.negf %29 : vector<8x128xf32>
    %31 = math.exp %30 : vector<8x128xf32>
    %cst_20 = arith.constant 1.000000e+00 : f32
    %32 = vector.broadcast %cst_20 : f32 to vector<8x128xf32>
    %33 = arith.addf %32, %31 : vector<8x128xf32>
    %34 = arith.divf %32, %33 : vector<8x128xf32>
    %35 = vector.extract_strided_slice %17 {offsets = [0, 256], sizes = [8, 128], strides = [1, 1]} : vector<8x384xf32> to vector<8x128xf32>
    %36 = vector.extract_strided_slice %18 {offsets = [0, 256], sizes = [8, 128], strides = [1, 1]} : vector<8x384xf32> to vector<8x128xf32>
    %37 = vector.broadcast %14 : vector<1x128xf32> to vector<8x128xf32>
    %38 = arith.addf %36, %37 : vector<8x128xf32>
    %39 = arith.mulf %26, %38 : vector<8x128xf32>
    %40 = arith.addf %35, %39 : vector<8x128xf32>
    %41 = math.tanh %40 : vector<8x128xf32>
    %42 = arith.subf %6, %41 : vector<8x128xf32>
    %43 = arith.mulf %34, %42 : vector<8x128xf32>
    %44 = arith.addf %41, %43 : vector<8x128xf32>
    %c0_21 = arith.constant 0 : index
    %c0_22 = arith.constant 0 : index
    %c0_23 = arith.constant 0 : index
    %45 = vector.load %arg2[%c0_21, %c0_22, %c0_23] : memref<1x8x256xf32, #tpu.memory_space<vmem>>, vector<1x8x256xf32>
    %46 = vector.shape_cast %45 : vector<1x8x256xf32> to vector<8x256xf32>
    %c1 = arith.constant 1 : index
    %c0_24 = arith.constant 0 : index
    %c0_25 = arith.constant 0 : index
    %47 = vector.load %arg9[%c1, %c0_24, %c0_25] : memref<2x8x128xf32, #tpu.memory_space<vmem>>, vector<1x8x128xf32>
    %48 = vector.shape_cast %47 : vector<1x8x128xf32> to vector<8x128xf32>
    %c1_26 = arith.constant 1 : index
    %c0_27 = arith.constant 0 : index
    %c0_28 = arith.constant 0 : index
    %49 = vector.load %arg3[%c1_26, %c0_27, %c0_28] : memref<2x256x384xf32, #tpu.memory_space<vmem>>, vector<1x256x384xf32>
    %50 = vector.shape_cast %49 : vector<1x256x384xf32> to vector<256x384xf32>
    %c1_29 = arith.constant 1 : index
    %c0_30 = arith.constant 0 : index
    %c0_31 = arith.constant 0 : index
    %51 = vector.load %arg4[%c1_29, %c0_30, %c0_31] : memref<2x128x384xf32, #tpu.memory_space<vmem>>, vector<1x128x384xf32>
    %52 = vector.shape_cast %51 : vector<1x128x384xf32> to vector<128x384xf32>
    %c1_32 = arith.constant 1 : index
    %c0_33 = arith.constant 0 : index
    %c0_34 = arith.constant 0 : index
    %53 = vector.load %arg5[%c1_32, %c0_33, %c0_34] : memref<2x1x384xf32, #tpu.memory_space<vmem>>, vector<1x1x384xf32>
    %54 = vector.shape_cast %53 : vector<1x1x384xf32> to vector<1x384xf32>
    %c1_35 = arith.constant 1 : index
    %c0_36 = arith.constant 0 : index
    %c0_37 = arith.constant 0 : index
    %55 = vector.load %arg6[%c1_35, %c0_36, %c0_37] : memref<2x1x128xf32, #tpu.memory_space<vmem>>, vector<1x1x128xf32>
    %56 = vector.shape_cast %55 : vector<1x1x128xf32> to vector<1x128xf32>
    %cst_38 = arith.constant dense<0.000000e+00> : vector<8x384xf32>
    %57 = tpu.matmul %46, %50, %cst_38 {dimension_numbers = #tpu.dot_dimension_numbers<[1], [0], [0], [1], [0, 0, 1, 1], [], []>} : vector<8x256xf32>, vector<256x384xf32>, vector<8x384xf32> -> vector<8x384xf32>
    %58 = vector.broadcast %54 : vector<1x384xf32> to vector<8x384xf32>
    %59 = arith.addf %57, %58 : vector<8x384xf32>
    %cst_39 = arith.constant dense<0.000000e+00> : vector<8x384xf32>
    %60 = tpu.matmul %48, %52, %cst_39 {dimension_numbers = #tpu.dot_dimension_numbers<[1], [0], [0], [1], [0, 0, 1, 1], [], []>} : vector<8x128xf32>, vector<128x384xf32>, vector<8x384xf32> -> vector<8x384xf32>
    %61 = vector.extract_strided_slice %59 {offsets = [0, 0], sizes = [8, 128], strides = [1, 1]} : vector<8x384xf32> to vector<8x128xf32>
    %62 = vector.extract_strided_slice %60 {offsets = [0, 0], sizes = [8, 128], strides = [1, 1]} : vector<8x384xf32> to vector<8x128xf32>
    %63 = arith.addf %61, %62 : vector<8x128xf32>
    %64 = arith.negf %63 : vector<8x128xf32>
    %65 = math.exp %64 : vector<8x128xf32>
    %cst_40 = arith.constant 1.000000e+00 : f32
    %66 = vector.broadcast %cst_40 : f32 to vector<8x128xf32>
    %67 = arith.addf %66, %65 : vector<8x128xf32>
    %68 = arith.divf %66, %67 : vector<8x128xf32>
    %69 = vector.extract_strided_slice %59 {offsets = [0, 128], sizes = [8, 128], strides = [1, 1]} : vector<8x384xf32> to vector<8x128xf32>
    %70 = vector.extract_strided_slice %60 {offsets = [0, 128], sizes = [8, 128], strides = [1, 1]} : vector<8x384xf32> to vector<8x128xf32>
    %71 = arith.addf %69, %70 : vector<8x128xf32>
    %72 = arith.negf %71 : vector<8x128xf32>
    %73 = math.exp %72 : vector<8x128xf32>
    %cst_41 = arith.constant 1.000000e+00 : f32
    %74 = vector.broadcast %cst_41 : f32 to vector<8x128xf32>
    %75 = arith.addf %74, %73 : vector<8x128xf32>
    %76 = arith.divf %74, %75 : vector<8x128xf32>
    %77 = vector.extract_strided_slice %59 {offsets = [0, 256], sizes = [8, 128], strides = [1, 1]} : vector<8x384xf32> to vector<8x128xf32>
    %78 = vector.extract_strided_slice %60 {offsets = [0, 256], sizes = [8, 128], strides = [1, 1]} : vector<8x384xf32> to vector<8x128xf32>
    %79 = vector.broadcast %56 : vector<1x128xf32> to vector<8x128xf32>
    %80 = arith.addf %78, %79 : vector<8x128xf32>
    %81 = arith.mulf %68, %80 : vector<8x128xf32>
    %82 = arith.addf %77, %81 : vector<8x128xf32>
    %83 = math.tanh %82 : vector<8x128xf32>
    %84 = arith.subf %48, %83 : vector<8x128xf32>
    %85 = arith.mulf %76, %84 : vector<8x128xf32>
    %86 = arith.addf %83, %85 : vector<8x128xf32>
    %c0_42 = arith.constant 0 : index
    %c0_43 = arith.constant 0 : index
    %c0_44 = arith.constant 0 : index
    %87 = vector.load %arg9[%c0_42, %c0_43, %c0_44] : memref<2x8x128xf32, #tpu.memory_space<vmem>>, vector<1x8x128xf32>
    %88 = vector.shape_cast %87 : vector<1x8x128xf32> to vector<8x128xf32>
    %89 = vector.shape_cast %44 : vector<8x128xf32> to vector<1x8x128xf32>
    tpu.vector_store %arg9[%c0_42, %c0_43, %c0_44], %89 {strides = array<i32>} : memref<2x8x128xf32, #tpu.memory_space<vmem>>, vector<1x8x128xf32>,
    %c1_45 = arith.constant 1 : index
    %c0_46 = arith.constant 0 : index
    %c0_47 = arith.constant 0 : index
    %90 = vector.load %arg9[%c1_45, %c0_46, %c0_47] : memref<2x8x128xf32, #tpu.memory_space<vmem>>, vector<1x8x128xf32>
    %91 = vector.shape_cast %90 : vector<1x8x128xf32> to vector<8x128xf32>
    %92 = vector.shape_cast %86 : vector<8x128xf32> to vector<1x8x128xf32>
    tpu.vector_store %arg9[%c1_45, %c0_46, %c0_47], %92 {strides = array<i32>} : memref<2x8x128xf32, #tpu.memory_space<vmem>>, vector<1x8x128xf32>,
    %c0_48 = arith.constant 0 : index
    %c0_49 = arith.constant 0 : index
    %c0_50 = arith.constant 0 : index
    %93 = vector.load %arg7[%c0_48, %c0_49, %c0_50] : memref<1x8x128xf32, #tpu.memory_space<vmem>>, vector<1x8x128xf32>
    %94 = vector.shape_cast %93 : vector<1x8x128xf32> to vector<8x128xf32>
    %95 = vector.shape_cast %44 : vector<8x128xf32> to vector<1x8x128xf32>
    tpu.vector_store %arg7[%c0_48, %c0_49, %c0_50], %95 {strides = array<i32>} : memref<1x8x128xf32, #tpu.memory_space<vmem>>, vector<1x8x128xf32>,
    %c0_51 = arith.constant 0 : index
    %c0_52 = arith.constant 0 : index
    %c0_53 = arith.constant 0 : index
    %96 = vector.load %arg8[%c0_51, %c0_52, %c0_53] : memref<1x8x128xf32, #tpu.memory_space<vmem>>, vector<1x8x128xf32>
    %97 = vector.shape_cast %96 : vector<1x8x128xf32> to vector<8x128xf32>
    %98 = vector.shape_cast %86 : vector<8x128xf32> to vector<1x8x128xf32>
    tpu.vector_store %arg8[%c0_51, %c0_52, %c0_53], %98 {strides = array<i32>} : memref<1x8x128xf32, #tpu.memory_space<vmem>>, vector<1x8x128xf32>,
    return
  }
  func.func @transform_0(%arg0: i32) -> (i32, i32, i32) {
    %c0_i32 = arith.constant 0 : i32
    %c0_i32_0 = arith.constant 0 : i32
    %c0_i32_1 = arith.constant 0 : i32
    return %arg0, %c0_i32, %c0_i32_0 : i32, i32, i32
  }
  func.func @transform_1(%arg0: i32) -> (i32, i32, i32) {
    %c7_i32 = arith.constant 7 : i32
    %0 = arith.subi %c7_i32, %arg0 : i32
    %c0_i32 = arith.constant 0 : i32
    %c0_i32_0 = arith.constant 0 : i32
    %c0_i32_1 = arith.constant 0 : i32
    return %0, %c0_i32, %c0_i32_0 : i32, i32, i32
  }
  func.func @transform_2(%arg0: i32) -> (i32, i32, i32) {
    %c0_i32 = arith.constant 0 : i32
    %c0_i32_0 = arith.constant 0 : i32
    %c0_i32_1 = arith.constant 0 : i32
    %c0_i32_2 = arith.constant 0 : i32
    return %c0_i32, %c0_i32_0, %c0_i32_1 : i32, i32, i32
  }
  func.func @transform_3(%arg0: i32) -> (i32, i32, i32) {
    %c0_i32 = arith.constant 0 : i32
    %c0_i32_0 = arith.constant 0 : i32
    %c0_i32_1 = arith.constant 0 : i32
    %c0_i32_2 = arith.constant 0 : i32
    return %c0_i32, %c0_i32_0, %c0_i32_1 : i32, i32, i32
  }
  func.func @transform_4(%arg0: i32) -> (i32, i32, i32) {
    %c0_i32 = arith.constant 0 : i32
    %c0_i32_0 = arith.constant 0 : i32
    %c0_i32_1 = arith.constant 0 : i32
    %c0_i32_2 = arith.constant 0 : i32
    return %c0_i32, %c0_i32_0, %c0_i32_1 : i32, i32, i32
  }
  func.func @transform_5(%arg0: i32) -> (i32, i32, i32) {
    %c0_i32 = arith.constant 0 : i32
    %c0_i32_0 = arith.constant 0 : i32
    %c0_i32_1 = arith.constant 0 : i32
    %c0_i32_2 = arith.constant 0 : i32
    return %c0_i32, %c0_i32_0, %c0_i32_1 : i32, i32, i32
  }
  func.func @transform_6(%arg0: i32) -> (i32, i32, i32) {
    %c0_i32 = arith.constant 0 : i32
    %c0_i32_0 = arith.constant 0 : i32
    %c0_i32_1 = arith.constant 0 : i32
    return %arg0, %c0_i32, %c0_i32_0 : i32, i32, i32
  }
  func.func @transform_7(%arg0: i32) -> (i32, i32, i32) {
    %c7_i32 = arith.constant 7 : i32
    %0 = arith.subi %c7_i32, %arg0 : i32
    %c0_i32 = arith.constant 0 : i32
    %c0_i32_0 = arith.constant 0 : i32
    %c0_i32_1 = arith.constant 0 : i32
    return %0, %c0_i32, %c0_i32_0 : i32, i32, i32
  }
}

module attributes {stable_mosaic.version = 11 : i64} {
  func.func @_bigru_head_kernel(%arg0: i32, %arg1: memref<1x8x256xf32, #tpu.memory_space<vmem>>, %arg2: memref<1x8x256xf32, #tpu.memory_space<vmem>>, %arg3: memref<2x256x384xf32, #tpu.memory_space<vmem>>, %arg4: memref<2x128x384xf32, #tpu.memory_space<vmem>>, %arg5: memref<2x1x384xf32, #tpu.memory_space<vmem>>, %arg6: memref<2x1x128xf32, #tpu.memory_space<vmem>>, %arg7: memref<2x128x128xf32, #tpu.memory_space<vmem>>, %arg8: memref<1x128xf32, #tpu.memory_space<vmem>>, %arg9: memref<8x128xf32, #tpu.memory_space<vmem>>, %arg10: memref<2x8x128xf32, #tpu.memory_space<vmem>>, %arg11: memref<8x128xf32, #tpu.memory_space<vmem>>) attributes {dimension_semantics = [#tpu.dimension_semantics<arbitrary>], iteration_bounds = array<i64: 8>, scalar_prefetch = 0 : i64, scratch_operands = 2 : i64, tpu.core_type = #tpu.core_type<tc>, window_params = [{transform_indices = @transform_0, window_bounds = array<i64: 1, 8, 256>}, {transform_indices = @transform_1, window_bounds = array<i64: 1, 8, 256>}, {pipeline_mode = #tpu.pipeline_mode<synchronous>, transform_indices = @transform_2, window_bounds = array<i64: 2, 256, 384>}, {pipeline_mode = #tpu.pipeline_mode<synchronous>, transform_indices = @transform_3, window_bounds = array<i64: 2, 128, 384>}, {pipeline_mode = #tpu.pipeline_mode<synchronous>, transform_indices = @transform_4, window_bounds = array<i64: 2, 1, 384>}, {pipeline_mode = #tpu.pipeline_mode<synchronous>, transform_indices = @transform_5, window_bounds = array<i64: 2, 1, 128>}, {pipeline_mode = #tpu.pipeline_mode<synchronous>, transform_indices = @transform_6, window_bounds = array<i64: 2, 128, 128>}, {pipeline_mode = #tpu.pipeline_mode<synchronous>, transform_indices = @transform_7, window_bounds = array<i64: 1, 128>}, {pipeline_mode = #tpu.pipeline_mode<synchronous>, transform_indices = @transform_8, window_bounds = array<i64: 8, 128>}]} {
    %c0_i32 = arith.constant 0 : i32
    %0 = arith.cmpi eq, %arg0, %c0_i32 : i32
    %1 = arith.extui %0 : i1 to i32
    %c0_i32_0 = arith.constant 0 : i32
    %2 = arith.cmpi ne, %1, %c0_i32_0 : i32
    scf.if %2 {
      %cst_51 = arith.constant 0.000000e+00 : f32
      %99 = vector.broadcast %cst_51 : f32 to vector<2x8x128xf32>
      %c0_52 = arith.constant 0 : index
      %c0_53 = arith.constant 0 : index
      %c0_54 = arith.constant 0 : index
      %100 = vector.load %arg10[%c0_52, %c0_53, %c0_54] : memref<2x8x128xf32, #tpu.memory_space<vmem>>, vector<2x8x128xf32>
      tpu.vector_store %arg10[%c0_52, %c0_53, %c0_54], %99 {strides = array<i32>} : memref<2x8x128xf32, #tpu.memory_space<vmem>>, vector<2x8x128xf32>,
    } else {
    }
    %c0 = arith.constant 0 : index
    %c0_1 = arith.constant 0 : index
    %c0_2 = arith.constant 0 : index
    %3 = vector.load %arg1[%c0, %c0_1, %c0_2] : memref<1x8x256xf32, #tpu.memory_space<vmem>>, vector<1x8x256xf32>
    %4 = vector.shape_cast %3 : vector<1x8x256xf32> to vector<8x256xf32>
    %c0_3 = arith.constant 0 : index
    %c0_4 = arith.constant 0 : index
    %c0_5 = arith.constant 0 : index
    %5 = vector.load %arg10[%c0_3, %c0_4, %c0_5] : memref<2x8x128xf32, #tpu.memory_space<vmem>>, vector<1x8x128xf32>
    %6 = vector.shape_cast %5 : vector<1x8x128xf32> to vector<8x128xf32>
    %c0_6 = arith.constant 0 : index
    %c0_7 = arith.constant 0 : index
    %c0_8 = arith.constant 0 : index
    %7 = vector.load %arg3[%c0_6, %c0_7, %c0_8] : memref<2x256x384xf32, #tpu.memory_space<vmem>>, vector<1x256x384xf32>
    %8 = vector.shape_cast %7 : vector<1x256x384xf32> to vector<256x384xf32>
    %c0_9 = arith.constant 0 : index
    %c0_10 = arith.constant 0 : index
    %c0_11 = arith.constant 0 : index
    %9 = vector.load %arg4[%c0_9, %c0_10, %c0_11] : memref<2x128x384xf32, #tpu.memory_space<vmem>>, vector<1x128x384xf32>
    %10 = vector.shape_cast %9 : vector<1x128x384xf32> to vector<128x384xf32>
    %c0_12 = arith.constant 0 : index
    %c0_13 = arith.constant 0 : index
    %c0_14 = arith.constant 0 : index
    %11 = vector.load %arg5[%c0_12, %c0_13, %c0_14] : memref<2x1x384xf32, #tpu.memory_space<vmem>>, vector<1x1x384xf32>
    %12 = vector.shape_cast %11 : vector<1x1x384xf32> to vector<1x384xf32>
    %c0_15 = arith.constant 0 : index
    %c0_16 = arith.constant 0 : index
    %c0_17 = arith.constant 0 : index
    %13 = vector.load %arg6[%c0_15, %c0_16, %c0_17] : memref<2x1x128xf32, #tpu.memory_space<vmem>>, vector<1x1x128xf32>
    %14 = vector.shape_cast %13 : vector<1x1x128xf32> to vector<1x128xf32>
    %cst = arith.constant dense<0.000000e+00> : vector<8x384xf32>
    %15 = tpu.matmul %4, %8, %cst {dimension_numbers = #tpu.dot_dimension_numbers<[1], [0], [0], [1], [0, 0, 1, 1], [], []>} : vector<8x256xf32>, vector<256x384xf32>, vector<8x384xf32> -> vector<8x384xf32>
    %16 = vector.broadcast %12 : vector<1x384xf32> to vector<8x384xf32>
    %17 = arith.addf %15, %16 : vector<8x384xf32>
    %cst_18 = arith.constant dense<0.000000e+00> : vector<8x384xf32>
    %18 = tpu.matmul %6, %10, %cst_18 {dimension_numbers = #tpu.dot_dimension_numbers<[1], [0], [0], [1], [0, 0, 1, 1], [], []>} : vector<8x128xf32>, vector<128x384xf32>, vector<8x384xf32> -> vector<8x384xf32>
    %19 = vector.extract_strided_slice %17 {offsets = [0, 0], sizes = [8, 128], strides = [1, 1]} : vector<8x384xf32> to vector<8x128xf32>
    %20 = vector.extract_strided_slice %18 {offsets = [0, 0], sizes = [8, 128], strides = [1, 1]} : vector<8x384xf32> to vector<8x128xf32>
    %21 = arith.addf %19, %20 : vector<8x128xf32>
    %22 = arith.negf %21 : vector<8x128xf32>
    %23 = math.exp %22 : vector<8x128xf32>
    %cst_19 = arith.constant 1.000000e+00 : f32
    %24 = vector.broadcast %cst_19 : f32 to vector<8x128xf32>
    %25 = arith.addf %24, %23 : vector<8x128xf32>
    %26 = arith.divf %24, %25 : vector<8x128xf32>
    %27 = vector.extract_strided_slice %17 {offsets = [0, 128], sizes = [8, 128], strides = [1, 1]} : vector<8x384xf32> to vector<8x128xf32>
    %28 = vector.extract_strided_slice %18 {offsets = [0, 128], sizes = [8, 128], strides = [1, 1]} : vector<8x384xf32> to vector<8x128xf32>
    %29 = arith.addf %27, %28 : vector<8x128xf32>
    %30 = arith.negf %29 : vector<8x128xf32>
    %31 = math.exp %30 : vector<8x128xf32>
    %cst_20 = arith.constant 1.000000e+00 : f32
    %32 = vector.broadcast %cst_20 : f32 to vector<8x128xf32>
    %33 = arith.addf %32, %31 : vector<8x128xf32>
    %34 = arith.divf %32, %33 : vector<8x128xf32>
    %35 = vector.extract_strided_slice %17 {offsets = [0, 256], sizes = [8, 128], strides = [1, 1]} : vector<8x384xf32> to vector<8x128xf32>
    %36 = vector.extract_strided_slice %18 {offsets = [0, 256], sizes = [8, 128], strides = [1, 1]} : vector<8x384xf32> to vector<8x128xf32>
    %37 = vector.broadcast %14 : vector<1x128xf32> to vector<8x128xf32>
    %38 = arith.addf %36, %37 : vector<8x128xf32>
    %39 = arith.mulf %26, %38 : vector<8x128xf32>
    %40 = arith.addf %35, %39 : vector<8x128xf32>
    %41 = math.tanh %40 : vector<8x128xf32>
    %42 = arith.subf %6, %41 : vector<8x128xf32>
    %43 = arith.mulf %34, %42 : vector<8x128xf32>
    %44 = arith.addf %41, %43 : vector<8x128xf32>
    %c0_21 = arith.constant 0 : index
    %c0_22 = arith.constant 0 : index
    %c0_23 = arith.constant 0 : index
    %45 = vector.load %arg2[%c0_21, %c0_22, %c0_23] : memref<1x8x256xf32, #tpu.memory_space<vmem>>, vector<1x8x256xf32>
    %46 = vector.shape_cast %45 : vector<1x8x256xf32> to vector<8x256xf32>
    %c1 = arith.constant 1 : index
    %c0_24 = arith.constant 0 : index
    %c0_25 = arith.constant 0 : index
    %47 = vector.load %arg10[%c1, %c0_24, %c0_25] : memref<2x8x128xf32, #tpu.memory_space<vmem>>, vector<1x8x128xf32>
    %48 = vector.shape_cast %47 : vector<1x8x128xf32> to vector<8x128xf32>
    %c1_26 = arith.constant 1 : index
    %c0_27 = arith.constant 0 : index
    %c0_28 = arith.constant 0 : index
    %49 = vector.load %arg3[%c1_26, %c0_27, %c0_28] : memref<2x256x384xf32, #tpu.memory_space<vmem>>, vector<1x256x384xf32>
    %50 = vector.shape_cast %49 : vector<1x256x384xf32> to vector<256x384xf32>
    %c1_29 = arith.constant 1 : index
    %c0_30 = arith.constant 0 : index
    %c0_31 = arith.constant 0 : index
    %51 = vector.load %arg4[%c1_29, %c0_30, %c0_31] : memref<2x128x384xf32, #tpu.memory_space<vmem>>, vector<1x128x384xf32>
    %52 = vector.shape_cast %51 : vector<1x128x384xf32> to vector<128x384xf32>
    %c1_32 = arith.constant 1 : index
    %c0_33 = arith.constant 0 : index
    %c0_34 = arith.constant 0 : index
    %53 = vector.load %arg5[%c1_32, %c0_33, %c0_34] : memref<2x1x384xf32, #tpu.memory_space<vmem>>, vector<1x1x384xf32>
    %54 = vector.shape_cast %53 : vector<1x1x384xf32> to vector<1x384xf32>
    %c1_35 = arith.constant 1 : index
    %c0_36 = arith.constant 0 : index
    %c0_37 = arith.constant 0 : index
    %55 = vector.load %arg6[%c1_35, %c0_36, %c0_37] : memref<2x1x128xf32, #tpu.memory_space<vmem>>, vector<1x1x128xf32>
    %56 = vector.shape_cast %55 : vector<1x1x128xf32> to vector<1x128xf32>
    %cst_38 = arith.constant dense<0.000000e+00> : vector<8x384xf32>
    %57 = tpu.matmul %46, %50, %cst_38 {dimension_numbers = #tpu.dot_dimension_numbers<[1], [0], [0], [1], [0, 0, 1, 1], [], []>} : vector<8x256xf32>, vector<256x384xf32>, vector<8x384xf32> -> vector<8x384xf32>
    %58 = vector.broadcast %54 : vector<1x384xf32> to vector<8x384xf32>
    %59 = arith.addf %57, %58 : vector<8x384xf32>
    %cst_39 = arith.constant dense<0.000000e+00> : vector<8x384xf32>
    %60 = tpu.matmul %48, %52, %cst_39 {dimension_numbers = #tpu.dot_dimension_numbers<[1], [0], [0], [1], [0, 0, 1, 1], [], []>} : vector<8x128xf32>, vector<128x384xf32>, vector<8x384xf32> -> vector<8x384xf32>
    %61 = vector.extract_strided_slice %59 {offsets = [0, 0], sizes = [8, 128], strides = [1, 1]} : vector<8x384xf32> to vector<8x128xf32>
    %62 = vector.extract_strided_slice %60 {offsets = [0, 0], sizes = [8, 128], strides = [1, 1]} : vector<8x384xf32> to vector<8x128xf32>
    %63 = arith.addf %61, %62 : vector<8x128xf32>
    %64 = arith.negf %63 : vector<8x128xf32>
    %65 = math.exp %64 : vector<8x128xf32>
    %cst_40 = arith.constant 1.000000e+00 : f32
    %66 = vector.broadcast %cst_40 : f32 to vector<8x128xf32>
    %67 = arith.addf %66, %65 : vector<8x128xf32>
    %68 = arith.divf %66, %67 : vector<8x128xf32>
    %69 = vector.extract_strided_slice %59 {offsets = [0, 128], sizes = [8, 128], strides = [1, 1]} : vector<8x384xf32> to vector<8x128xf32>
    %70 = vector.extract_strided_slice %60 {offsets = [0, 128], sizes = [8, 128], strides = [1, 1]} : vector<8x384xf32> to vector<8x128xf32>
    %71 = arith.addf %69, %70 : vector<8x128xf32>
    %72 = arith.negf %71 : vector<8x128xf32>
    %73 = math.exp %72 : vector<8x128xf32>
    %cst_41 = arith.constant 1.000000e+00 : f32
    %74 = vector.broadcast %cst_41 : f32 to vector<8x128xf32>
    %75 = arith.addf %74, %73 : vector<8x128xf32>
    %76 = arith.divf %74, %75 : vector<8x128xf32>
    %77 = vector.extract_strided_slice %59 {offsets = [0, 256], sizes = [8, 128], strides = [1, 1]} : vector<8x384xf32> to vector<8x128xf32>
    %78 = vector.extract_strided_slice %60 {offsets = [0, 256], sizes = [8, 128], strides = [1, 1]} : vector<8x384xf32> to vector<8x128xf32>
    %79 = vector.broadcast %56 : vector<1x128xf32> to vector<8x128xf32>
    %80 = arith.addf %78, %79 : vector<8x128xf32>
    %81 = arith.mulf %68, %80 : vector<8x128xf32>
    %82 = arith.addf %77, %81 : vector<8x128xf32>
    %83 = math.tanh %82 : vector<8x128xf32>
    %84 = arith.subf %48, %83 : vector<8x128xf32>
    %85 = arith.mulf %76, %84 : vector<8x128xf32>
    %86 = arith.addf %83, %85 : vector<8x128xf32>
    %c0_42 = arith.constant 0 : index
    %c0_43 = arith.constant 0 : index
    %c0_44 = arith.constant 0 : index
    %87 = vector.load %arg10[%c0_42, %c0_43, %c0_44] : memref<2x8x128xf32, #tpu.memory_space<vmem>>, vector<1x8x128xf32>
    %88 = vector.shape_cast %87 : vector<1x8x128xf32> to vector<8x128xf32>
    %89 = vector.shape_cast %44 : vector<8x128xf32> to vector<1x8x128xf32>
    tpu.vector_store %arg10[%c0_42, %c0_43, %c0_44], %89 {strides = array<i32>} : memref<2x8x128xf32, #tpu.memory_space<vmem>>, vector<1x8x128xf32>,
    %c1_45 = arith.constant 1 : index
    %c0_46 = arith.constant 0 : index
    %c0_47 = arith.constant 0 : index
    %90 = vector.load %arg10[%c1_45, %c0_46, %c0_47] : memref<2x8x128xf32, #tpu.memory_space<vmem>>, vector<1x8x128xf32>
    %91 = vector.shape_cast %90 : vector<1x8x128xf32> to vector<8x128xf32>
    %92 = vector.shape_cast %86 : vector<8x128xf32> to vector<1x8x128xf32>
    tpu.vector_store %arg10[%c1_45, %c0_46, %c0_47], %92 {strides = array<i32>} : memref<2x8x128xf32, #tpu.memory_space<vmem>>, vector<1x8x128xf32>,
    %c0_i32_48 = arith.constant 0 : i32
    %93 = arith.cmpi eq, %arg0, %c0_i32_48 : i32
    %94 = arith.extui %93 : i1 to i32
    %c0_i32_49 = arith.constant 0 : i32
    %95 = arith.cmpi ne, %94, %c0_i32_49 : i32
    scf.if %95 {
      %c0_51 = arith.constant 0 : index
      %c0_52 = arith.constant 0 : index
      %99 = vector.load %arg11[%c0_51, %c0_52] : memref<8x128xf32, #tpu.memory_space<vmem>>, vector<8x128xf32>
      tpu.vector_store %arg11[%c0_51, %c0_52], %44 {strides = array<i32>} : memref<8x128xf32, #tpu.memory_space<vmem>>, vector<8x128xf32>,
      %cst_53 = arith.constant 0.000000e+00 : f32
      %100 = vector.broadcast %cst_53 : f32 to vector<8x128xf32>
      %c0_54 = arith.constant 0 : index
      %c0_55 = arith.constant 0 : index
      %101 = vector.load %arg9[%c0_54, %c0_55] : memref<8x128xf32, #tpu.memory_space<vmem>>, vector<8x128xf32>
      tpu.vector_store %arg9[%c0_54, %c0_55], %100 {strides = array<i32>} : memref<8x128xf32, #tpu.memory_space<vmem>>, vector<8x128xf32>,
    } else {
    }
    %c7_i32 = arith.constant 7 : i32
    %96 = arith.cmpi eq, %arg0, %c7_i32 : i32
    %97 = arith.extui %96 : i1 to i32
    %c0_i32_50 = arith.constant 0 : i32
    %98 = arith.cmpi ne, %97, %c0_i32_50 : i32
    scf.if %98 {
      %c0_51 = arith.constant 0 : index
      %c0_52 = arith.constant 0 : index
      %99 = vector.load %arg11[%c0_51, %c0_52] : memref<8x128xf32, #tpu.memory_space<vmem>>, vector<8x128xf32>
      %c0_53 = arith.constant 0 : index
      %c0_54 = arith.constant 0 : index
      %c0_55 = arith.constant 0 : index
      %100 = vector.load %arg7[%c0_53, %c0_54, %c0_55] : memref<2x128x128xf32, #tpu.memory_space<vmem>>, vector<1x128x128xf32>
      %101 = vector.shape_cast %100 : vector<1x128x128xf32> to vector<128x128xf32>
      %cst_56 = arith.constant dense<0.000000e+00> : vector<8x128xf32>
      %102 = tpu.matmul %99, %101, %cst_56 {dimension_numbers = #tpu.dot_dimension_numbers<[1], [0], [0], [1], [0, 0, 1, 1], [], []>} : vector<8x128xf32>, vector<128x128xf32>, vector<8x128xf32> -> vector<8x128xf32>
      %c1_57 = arith.constant 1 : index
      %c0_58 = arith.constant 0 : index
      %c0_59 = arith.constant 0 : index
      %103 = vector.load %arg7[%c1_57, %c0_58, %c0_59] : memref<2x128x128xf32, #tpu.memory_space<vmem>>, vector<1x128x128xf32>
      %104 = vector.shape_cast %103 : vector<1x128x128xf32> to vector<128x128xf32>
      %cst_60 = arith.constant dense<0.000000e+00> : vector<8x128xf32>
      %105 = tpu.matmul %86, %104, %cst_60 {dimension_numbers = #tpu.dot_dimension_numbers<[1], [0], [0], [1], [0, 0, 1, 1], [], []>} : vector<8x128xf32>, vector<128x128xf32>, vector<8x128xf32> -> vector<8x128xf32>
      %106 = arith.addf %102, %105 : vector<8x128xf32>
      %c0_61 = arith.constant 0 : index
      %c0_62 = arith.constant 0 : index
      %107 = vector.load %arg8[%c0_61, %c0_62] : memref<1x128xf32, #tpu.memory_space<vmem>>, vector<1x128xf32>
      %108 = vector.broadcast %107 : vector<1x128xf32> to vector<8x128xf32>
      %109 = arith.addf %106, %108 : vector<8x128xf32>
      %c0_63 = arith.constant 0 : index
      %c0_64 = arith.constant 0 : index
      %110 = vector.load %arg9[%c0_63, %c0_64] : memref<8x128xf32, #tpu.memory_space<vmem>>, vector<8x128xf32>
      tpu.vector_store %arg9[%c0_63, %c0_64], %109 {strides = array<i32>} : memref<8x128xf32, #tpu.memory_space<vmem>>, vector<8x128xf32>,
    } else {
    }
    return
  }
  func.func @transform_0(%arg0: i32) -> (i32, i32, i32) {
    %c0_i32 = arith.constant 0 : i32
    %c0_i32_0 = arith.constant 0 : i32
    %c0_i32_1 = arith.constant 0 : i32
    return %arg0, %c0_i32, %c0_i32_0 : i32, i32, i32
  }
  func.func @transform_1(%arg0: i32) -> (i32, i32, i32) {
    %c7_i32 = arith.constant 7 : i32
    %0 = arith.subi %c7_i32, %arg0 : i32
    %c0_i32 = arith.constant 0 : i32
    %c0_i32_0 = arith.constant 0 : i32
    %c0_i32_1 = arith.constant 0 : i32
    return %0, %c0_i32, %c0_i32_0 : i32, i32, i32
  }
  func.func @transform_2(%arg0: i32) -> (i32, i32, i32) {
    %c0_i32 = arith.constant 0 : i32
    %c0_i32_0 = arith.constant 0 : i32
    %c0_i32_1 = arith.constant 0 : i32
    %c0_i32_2 = arith.constant 0 : i32
    return %c0_i32, %c0_i32_0, %c0_i32_1 : i32, i32, i32
  }
  func.func @transform_3(%arg0: i32) -> (i32, i32, i32) {
    %c0_i32 = arith.constant 0 : i32
    %c0_i32_0 = arith.constant 0 : i32
    %c0_i32_1 = arith.constant 0 : i32
    %c0_i32_2 = arith.constant 0 : i32
    return %c0_i32, %c0_i32_0, %c0_i32_1 : i32, i32, i32
  }
  func.func @transform_4(%arg0: i32) -> (i32, i32, i32) {
    %c0_i32 = arith.constant 0 : i32
    %c0_i32_0 = arith.constant 0 : i32
    %c0_i32_1 = arith.constant 0 : i32
    %c0_i32_2 = arith.constant 0 : i32
    return %c0_i32, %c0_i32_0, %c0_i32_1 : i32, i32, i32
  }
  func.func @transform_5(%arg0: i32) -> (i32, i32, i32) {
    %c0_i32 = arith.constant 0 : i32
    %c0_i32_0 = arith.constant 0 : i32
    %c0_i32_1 = arith.constant 0 : i32
    %c0_i32_2 = arith.constant 0 : i32
    return %c0_i32, %c0_i32_0, %c0_i32_1 : i32, i32, i32
  }
  func.func @transform_6(%arg0: i32) -> (i32, i32, i32) {
    %c0_i32 = arith.constant 0 : i32
    %c0_i32_0 = arith.constant 0 : i32
    %c0_i32_1 = arith.constant 0 : i32
    %c0_i32_2 = arith.constant 0 : i32
    return %c0_i32, %c0_i32_0, %c0_i32_1 : i32, i32, i32
  }
  func.func @transform_7(%arg0: i32) -> (i32, i32) {
    %c0_i32 = arith.constant 0 : i32
    %c0_i32_0 = arith.constant 0 : i32
    %c0_i32_1 = arith.constant 0 : i32
    return %c0_i32, %c0_i32_0 : i32, i32
  }
  func.func @transform_8(%arg0: i32) -> (i32, i32) {
    %c0_i32 = arith.constant 0 : i32
    %c0_i32_0 = arith.constant 0 : i32
    %c0_i32_1 = arith.constant 0 : i32
    return %c0_i32, %c0_i32_0 : i32, i32
  }
}

</mosaic_0001>

<bundles_post_ra>
// kernel: birnn_forward.3
= control target key start
LH: loop header
LB: loop body
LE: loop exit
PB: predicated region body
PF: predicated region fallthrough
CT: control target
= control target key end

     0   :  { %13 = vsyncpa [#allocation4], 0  ;;  %s2150_s0 = inlined_call_operand.vmem [shape: f32[8,8,128], index: 0, kind: input, shape index: {}, may-alias: {0,1}]   ;;  %s2151_s1 = inlined_call_operand.vmem [shape: f32[8,8,128], index: 1, kind: input, shape index: {}, may-alias: {0,1}]   ;;  %s2152_s2 = inlined_call_operand.hbm [shape: f32[2,128,384], index: 2, kind: input, shape index: {}]   ;;  %s2153_s3 = inlined_call_operand.hbm [shape: f32[2,128,384], index: 3, kind: input, shape index: {}]   ;;  %s2154_s4 = inlined_call_operand.vmem [shape: f32[2,1,384], index: 4, kind: input, shape index: {}]   ;;  %s2155_s5 = inlined_call_operand.vmem [shape: f32[2,1,128], index: 5, kind: input, shape index: {}]   ;;  %s2156_s6 = inlined_call_operand.vmem [shape: f32[8,8,128], index: 6, kind: output, shape index: {0}]   ;;  %s2157_s7 = inlined_call_operand.vmem [shape: f32[8,8,128], index: 7, kind: output, shape index: {1}]  }
   0x1   :  { %14 = vsyncpa [#allocation6], 0  ;;  %s1969_s24 = smov 0  }
   0x2 LB: > { %s1975_s25 = sadd.s32 4294967295, %s1919_s24   ;;  %p1332_p0 = scmp.ge.s32.totalorder %s1919_s24, 1  ;;  %s1919_s24 = sphi %s1969_s24, %s20_s24  }
   0x3   : > { %p217_p1 = scmp.lt.s32.totalorder %s1919_s24, 9  ;;  %s1921_s26 = smov [#allocation3]  }
   0x4   : > { %s229_s27 = sshll.u32 %s1921_s26, 4  ;;  %p2158_p4 = scmp.eq.s32.totalorder %s1975_s25, 0  ;;  %s230_s27 = int_to_ptr.vmem [resolvable:$true] %s229_s27 }
   0x5   : > { %p1980_p3 = pnand %p1332_p0, %p217_p1  ;;  %s1922_s29 = smov [#allocation5]  }
   0x6   : > { %s242_s30 = sshll.u32 %s1922_s29, 4  ;;  %s1849_s11 = scalar_lea.hbm %s2152_s2, 12288  ;;  %s1993_s30 = int_to_ptr.vmem [resolvable:$true] %s242_s30 }
   0x7   : > { %s2160_s28 = scalar_select %p1980_p3, 1, 0 }
   0x8   : > { %p1802_p5 = pneg %p1980_p3  ;;  %p1850_p7 = scmp.ne.s32.totalorder %s2152_s2, %s1849_s11 }
   0x9   : > { %p1856_p11 = scmp.lt.u32.totalorder %s1849_s11, %s2152_s2 }
   0xa   : > { %p1989_p6 = pnand %p2158_p4, %p1802_p5 }
   0xc   : > { %p1851_p8 = pneg %p1989_p6 }
   0xe   : > { %p1852_p9 = pnand %p1851_p8, %p1850_p7 }
  0x10   : > { %p1853_p10 = pneg %p1852_p9 }
  0x12   : > { %p1858_p12 = pnand %p1856_p11, %p1853_p10 }
  0x14   : > { %1861 = shalt.err (!%p1858_p12)
}
  0x15   : > { %s1862_s16 = scalar_lea.vmem %s230_s27, 12288  ;;  %p1870_p5 = scmp.lt.s32.totalorder %s230_s27, %s230_s27 }
  0x16   : > { %p1863_p13 = scmp.ne.s32.totalorder %s230_s27, %s1862_s16  ;;  %p1871_p2 = scmp.lt.s32.totalorder %s1862_s16, %s1862_s16 }
  0x18   : > { %p1865_p0 = pnand %p1863_p13, %p1851_p8  ;;  %p1872_p4 = por %p1871_p2, %p1870_p5 }
  0x1a   : > { %p1866_p1 = pneg %p1865_p0 }
  0x1c   : > { %p1873_p3 = pnand %p1872_p4, %p1866_p1 }
  0x1e   : > { %1876 = shalt.err (!%p1873_p3)
}
  0x1f   : > { %s1923_s17 = smov 384   ;;  %s1924_s18 = smov 24  }
  0x20   : > { %1805 = dma.hbm_to_vmem [thread:$0]  (!%p1989_p6), %s2152_s2, 12288, %s230_s27, [#allocation4], %s1923_s17, %s1923_s17, %s1924_s18  }
  0x21   : > { %s1877_s23 = scalar_lea.hbm %s2153_s3, 12288 }
  0x22   : > { %p1878_p7 = scmp.ne.s32.totalorder %s2153_s3, %s1877_s23  ;;  %p1884_p4 = scmp.lt.u32.totalorder %s1877_s23, %s2153_s3 }
  0x24   : > { %p1880_p2 = pnand %p1878_p7, %p1851_p8 }
  0x26   : > { %p1881_p3 = pneg %p1880_p2 }
  0x28   : > { %p1886_p9 = pnand %p1884_p4, %p1881_p3 }
  0x2a   : > { %1889 = shalt.err (!%p1886_p9)
}
  0x2b   : > { %s1890_s27 = scalar_lea.vmem %s1993_s30, 12288  ;;  %p1898_p13 = scmp.lt.s32.totalorder %s1993_s30, %s1993_s30 }
  0x2c   : > { %p1891_p10 = scmp.ne.s32.totalorder %s1993_s30, %s1890_s27  ;;  %p1899_p0 = scmp.lt.s32.totalorder %s1890_s27, %s1890_s27 }
  0x2e   : > { %p1893_p11 = pnand %p1891_p10, %p1851_p8  ;;  %p1900_p1 = por %p1899_p0, %p1898_p13 }
  0x30   : > { %p1894_p12 = pneg %p1893_p11 }
  0x32   : > { %p1901_p5 = pnand %p1900_p1, %p1894_p12 }
  0x34   : > { %1904 = shalt.err (!%p1901_p5)
}
  0x35   : > { %1808 = dma.hbm_to_vmem [thread:$0]  (!%p1989_p6), %s2153_s3, 12288, %s1993_s30, [#allocation6], %s1923_s17, %s1923_s17, %s1924_s18  }
  0x36   : > { %p2162_p7 = scmp.ne.s32.totalorder %s2160_s28, 0 }
  0x37   : > { %p2163_p2 = scmp.eq.s32.totalorder (!%p2162_p7), %s1975_s25, 0 }
  0x38   : > { %280 = sbr.rel (%p2162_p7) target bundleno = 470 (0x1d6), region = 44 }
  0x3f   : > { %1910 = dma.done.wait (%p2163_p2), [#allocation4], 12288   ;;  %p2164_p8 = pmov %p2163_p2 }
  0x40   : > { %p2165_p3 = pmov %p2163_p2 }
  0x41   : > { %1912 = vsyncadd (%p2164_p8), [#allocation4], 4294955008 }
  0x42   : > { %1914 = dma.done.wait (%p2165_p3), [#allocation6], 12288   ;;  %p2166_p4 = pmov %p2163_p2 }
  0x43   : > { %p324_p9 = scmp.lt.s32.totalorder %s1975_s25, 7  ;;  %s328_s30 = ssub.s32 7, %s1975_s25 }
  0x44   : > { %1916 = vsyncadd (%p2166_p4), [#allocation6], 4294955008  ;;  %p329_p6 = scmp.lt.s32.totalorder %s328_s30, 7  ;;  %p2167_p10 = scmp.ne.s32.totalorder %s1975_s25, 0 }
  0x45   : > { %s325_s28 = scalar_select %p324_p9, %s1975_s25, 7 }
  0x46   : > { %s2169_s30 = smov (!%p329_p6, %s328_s30), 7  ;;  %347 = sbr.rel (%p2167_p10) target bundleno = 77 (0x4d), region = 56 }
  0x47   : > { %s1339_s8 = sshll.u32 %s325_s28, 3  ;;  %s1340_s16 = sshll.u32 %s2169_s30, 3  ;;  %v1925_v0 = vmov (!%p2167_p10), 0.0  }
  0x48   : > { %s2058_s15 = scalar_lea.vmem %s2150_s0, %s1339_s8  ;;  %s2063_s19 = scalar_lea.vmem %s2151_s1, %s1340_s16  ;;  %348 = vst [vmem:[#allocation2] sm:$0xff] (!%p2167_p10), %v1925_v0  ;;  %349 = vst [vmem:[#allocation2 + $0x8] sm:$0xff] (!%p2167_p10), %v1925_v0 }
  0x49   : > { %s2068_s22 = scalar_lea.vmem %s2156_s6, %s1339_s8  ;;  %s2073_s29 = scalar_lea.vmem %s2157_s7, %s1340_s16 }
  0x4d PF: > { %v353_v1 = vld [vmem:[#allocation3 + $0x8] sm:$0xff]  ;;  %v356_v2 = vld [vmem:[#allocation3 + $0x20] sm:$0xff]  ;;  %v355_v5 = vld [vmem:[#allocation3 + $0x18] sm:$0xff]  ;;  %v1926_v8 = vmov 0.0|0.0   ;;  %v1927_v9 = vmov 0.0   ;;  %vm1928_vm0 = vmmov 0  }
  0x4e   : > { %v352_v3 = vld [vmem:[#allocation3] sm:$0xff]  ;;  %v1562_v4 = vpack.c.bf16 %v356_v2, %v353_v1  ;;  %v359_v6 = vld [vmem:[#allocation3 + $0x38] sm:$0xff]  ;;  %v362_v7 = vld [vmem:[#allocation3 + $0x50] sm:$0xff]  ;;  %1594 = vmatprep.subr.bf16.mxu1 %v1926_v8  ;;  %530 = vmatprep.mubr.f32.mxu0 %v1927_v9 }
  0x4f   : > { %v1564_v10 = vpack.c.bf16 %v355_v5, %v352_v3  ;;  %v1566_v11 = vpack.c.bf16 %v362_v7, %v359_v6  ;;  %v358_v12 = vld [vmem:[#allocation3 + $0x30] sm:$0xff]  ;;  %v361_v13 = vld [vmem:[#allocation3 + $0x48] sm:$0xff]  ;;  %1454 = vmatprep.mubr.msk.f32.mxu1 %vm1928_vm0, %v1927_v9  ;;  %v368_v15 = vld [vmem:[#allocation3 + $0x80] sm:$0xff] }
  0x50   : > { %v365_v14 = vld [vmem:[#allocation3 + $0x68] sm:$0xff]  ;;  %1563 = vmatprep.subr.bf16.mxu0 %v1562_v4  ;;  %v1568_v16 = vpack.c.bf16 %v361_v13, %v358_v12  ;;  %v364_v18 = vld [vmem:[#allocation3 + $0x60] sm:$0xff]  ;;  %v367_v19 = vld [vmem:[#allocation3 + $0x78] sm:$0xff] }
  0x51   : > { %1565 = vmatpush1.bf16.msra.mxu0 %v1564_v10  ;;  %v1570_v17 = vpack.c.bf16 %v368_v15, %v365_v14  ;;  %v371_v20 = vld [vmem:[#allocation3 + $0x98] sm:$0xff]  ;;  %v374_v21 = vld [vmem:[#allocation3 + $0xb0] sm:$0xff]  ;;  %v1572_v22 = vpack.c.bf16 %v367_v19, %v364_v18  ;;  %v373_v25 = vld [vmem:[#allocation3 + $0xa8] sm:$0xff] }
  0x52   : > { %1567 = vmatprep.subr.bf16.mxu0 %v1566_v11  ;;  %v370_v23 = vld [vmem:[#allocation3 + $0x90] sm:$0xff]  ;;  %v1574_v24 = vpack.c.bf16 %v374_v21, %v371_v20  ;;  %v357_v27 = vld [vmem:[#allocation3 + $0x28] sm:$0xff]  ;;  %v380_v29 = vld [vmem:[#allocation3 + $0xe0] sm:$0xff] }
  0x53   : > { %v354_v26 = vld [vmem:[#allocation3 + $0x10] sm:$0xff]  ;;  %v377_v28 = vld [vmem:[#allocation3 + $0xc8] sm:$0xff]  ;;  %v360_v31 = vld [vmem:[#allocation3 + $0x40] sm:$0xff]  ;;  %v1576_v33 = vpack.c.bf16 %v373_v25, %v370_v23 }
  0x54   : > { %v1595_v30 = vpack.c.bf16 %v357_v27, %v354_v26  ;;  %v363_v32 = vld [vmem:[#allocation3 + $0x58] sm:$0xff]  ;;  %v1578_v35 = vpack.c.bf16 %v380_v29, %v377_v28  ;;  %v376_v36 = vld [vmem:[#allocation3 + $0xc0] sm:$0xff]  ;;  %v366_v38 = vld [vmem:[#allocation3 + $0x70] sm:$0xff] }
  0x55   : > { %1569 = vmatpush1.bf16.msra.mxu0 %v1568_v16  ;;  %v1598_v34 = vpack.c.bf16 %v363_v32, %v360_v31  ;;  %v379_v37 = vld [vmem:[#allocation3 + $0xd8] sm:$0xff]  ;;  %v386_v40 = vld [vmem:[#allocation3 + $0x110] sm:$0xff]  ;;  %v369_v41 = vld [vmem:[#allocation3 + $0x88] sm:$0xff] }
  0x56   : > { %1571 = vmatprep.subr.bf16.mxu0 %v1570_v17  ;;  %1596 = vmatpush3.bf16.msra.mxu1 %v1595_v30  ;;  %v383_v39 = vld [vmem:[#allocation3 + $0xf8] sm:$0xff]  ;;  %v1580_v42 = vpack.c.bf16 %v379_v37, %v376_v36  ;;  %v382_v43 = vld [vmem:[#allocation3 + $0xf0] sm:$0xff]  ;;  %v1601_v44 = vpack.c.bf16 %v369_v41, %v366_v38  ;;  %v385_v46 = vld [vmem:[#allocation3 + $0x108] sm:$0xff] }
  0x57   : > { %1597 = vmatprep.subr.bf16.mxu1 %v1926_v8  ;;  %v1582_v45 = vpack.c.bf16 %v386_v40, %v383_v39  ;;  %v372_v47 = vld [vmem:[#allocation3 + $0xa0] sm:$0xff]  ;;  %v375_v48 = vld [vmem:[#allocation3 + $0xb8] sm:$0xff]  ;;  %v389_v49 = vld [vmem:[#allocation3 + $0x128] sm:$0xff]  ;;  %v1584_v51 = vpack.c.bf16 %v385_v46, %v382_v43 }
  0x58   : > { %v392_v50 = vld [vmem:[#allocation3 + $0x140] sm:$0xff]  ;;  %v1604_v53 = vpack.c.bf16 %v375_v48, %v372_v47  ;;  %v391_v55 = vld [vmem:[#allocation3 + $0x138] sm:$0xff]  ;;  %v378_v56 = vld [vmem:[#allocation3 + $0xd0] sm:$0xff] }
  0x59   : > { %1573 = vmatpush1.bf16.msra.mxu0 %v1572_v22  ;;  %v388_v52 = vld [vmem:[#allocation3 + $0x120] sm:$0xff]  ;;  %v1586_v54 = vpack.c.bf16 %v392_v50, %v389_v49  ;;  %v381_v57 = vld [vmem:[#allocation3 + $0xe8] sm:$0xff]  ;;  %v395_v58 = vld [vmem:[#allocation3 + $0x158] sm:$0xff] }
  0x5a   : > { %1575 = vmatprep.subr.bf16.mxu0 %v1574_v24  ;;  %1599 = vmatpush3.bf16.msra.mxu1 %v1598_v34  ;;  %v398_v59 = vld [vmem:[#allocation3 + $0x170] sm:$0xff]  ;;  %v1588_v60 = vpack.c.bf16 %v391_v55, %v388_v52  ;;  %v1607_v62 = vpack.c.bf16 %v381_v57, %v378_v56  ;;  %v397_v0 = vld [vmem:[#allocation3 + $0x168] sm:$0xff]  ;;  %v384_v1 = vld [vmem:[#allocation3 + $0x100] sm:$0xff] }
  0x5b   : > { %1600 = vmatprep.subr.bf16.mxu1 %v1926_v8  ;;  %v394_v61 = vld [vmem:[#allocation3 + $0x150] sm:$0xff]  ;;  %v1590_v63 = vpack.c.bf16 %v398_v59, %v395_v58  ;;  %v387_v2 = vld [vmem:[#allocation3 + $0x118] sm:$0xff]  ;;  %v401_v3 = vld [vmem:[#allocation5 + $0x8] sm:$0xff] }
  0x5c   : > { %v404_v4 = vld [vmem:[#allocation5 + $0x20] sm:$0xff]  ;;  %v1592_v5 = vpack.c.bf16 %v397_v0, %v394_v61  ;;  %v1610_v7 = vpack.c.bf16 %v387_v2, %v384_v1  ;;  %v403_v11 = vld [vmem:[#allocation5 + $0x18] sm:$0xff]  ;;  %v390_v12 = vld [vmem:[#allocation3 + $0x130] sm:$0xff] }
  0x5d   : > { %1577 = vmatpush1.bf16.msra.mxu0 %v1576_v33  ;;  %v400_v6 = vld [vmem:[#allocation5] sm:$0xff]  ;;  %v1618_v10 = vpack.c.bf16 %v404_v4, %v401_v3  ;;  %v393_v13 = vld [vmem:[#allocation3 + $0x148] sm:$0xff]  ;;  %v407_v14 = vld [vmem:[#allocation5 + $0x38] sm:$0xff] }
  0x5e   : > { %1579 = vmatprep.subr.bf16.mxu0 %v1578_v35  ;;  %1602 = vmatpush3.bf16.msra.mxu1 %v1601_v44  ;;  %v410_v15 = vld [vmem:[#allocation5 + $0x50] sm:$0xff]  ;;  %v1620_v17 = vpack.c.bf16 %v403_v11, %v400_v6  ;;  %v1613_v19 = vpack.c.bf16 %v393_v13, %v390_v12  ;;  %v409_v21 = vld [vmem:[#allocation5 + $0x48] sm:$0xff]  ;;  %v396_v22 = vld [vmem:[#allocation3 + $0x160] sm:$0xff] }
  0x5f   : > { %1603 = vmatprep.subr.bf16.mxu1 %v1926_v8  ;;  %v350_v16 = vld [vmem:[%s2058_s15] sm:$0xff]  ;;  %v1622_v20 = vpack.c.bf16 %v410_v15, %v407_v14  ;;  %v399_v23 = vld [vmem:[#allocation3 + $0x178] sm:$0xff]  ;;  %v413_v24 = vld [vmem:[#allocation5 + $0x68] sm:$0xff] }
  0x60   : > { %v406_v18 = vld [vmem:[#allocation5 + $0x30] sm:$0xff]  ;;  %v416_v25 = vld [vmem:[#allocation5 + $0x80] sm:$0xff]  ;;  %v1616_v28 = vpack.c.bf16 %v399_v23, %v396_v22  ;;  %v415_v30 = vld [vmem:[#allocation5 + $0x78] sm:$0xff] }
  0x61   : > { %1581 = vmatpush1.bf16.msra.mxu0 %v1580_v42  ;;  %v1624_v26 = vpack.c.bf16 %v409_v21, %v406_v18  ;;  %v412_v27 = vld [vmem:[#allocation5 + $0x60] sm:$0xff]  ;;  %v1626_v29 = vpack.c.bf16 %v416_v25, %v413_v24  ;;  %v402_v31 = vld [vmem:[#allocation5 + $0x10] sm:$0xff]  ;;  %v405_v32 = vld [vmem:[#allocation5 + $0x28] sm:$0xff] }
  0x62   : > { %1583 = vmatprep.subr.bf16.mxu0 %v1582_v45  ;;  %1605 = vmatpush3.bf16.msra.mxu1 %v1604_v53  ;;  %v419_v33 = vld [vmem:[#allocation5 + $0x98] sm:$0xff]  ;;  %v422_v34 = vld [vmem:[#allocation5 + $0xb0] sm:$0xff]  ;;  %v1628_v35 = vpack.c.bf16 %v415_v30, %v412_v27  ;;  %v1651_v37 = vpack.c.bf16 %v405_v32, %v402_v31  ;;  %v421_v39 = vld [vmem:[#allocation5 + $0xa8] sm:$0xff] }
  0x63   : > { %1606 = vmatprep.subr.bf16.mxu1 %v1926_v8  ;;  %v418_v36 = vld [vmem:[#allocation5 + $0x90] sm:$0xff]  ;;  %v1630_v38 = vpack.c.bf16 %v422_v34, %v419_v33  ;;  %v408_v40 = vld [vmem:[#allocation5 + $0x40] sm:$0xff]  ;;  %v411_v41 = vld [vmem:[#allocation5 + $0x58] sm:$0xff] }
  0x64   : > { %v425_v42 = vld [vmem:[#allocation5 + $0xc8] sm:$0xff]  ;;  %v428_v43 = vld [vmem:[#allocation5 + $0xe0] sm:$0xff]  ;;  %v1632_v44 = vpack.c.bf16 %v421_v39, %v418_v36  ;;  %v1654_v46 = vpack.c.bf16 %v411_v41, %v408_v40  ;;  %v427_v48 = vld [vmem:[#allocation5 + $0xd8] sm:$0xff] }
  0x65   : > { %1585 = vmatpush1.bf16.msra.mxu0 %v1584_v51  ;;  %v424_v45 = vld [vmem:[#allocation5 + $0xc0] sm:$0xff]  ;;  %v1634_v47 = vpack.c.bf16 %v428_v43, %v425_v42  ;;  %v414_v49 = vld [vmem:[#allocation5 + $0x70] sm:$0xff]  ;;  %v417_v50 = vld [vmem:[#allocation5 + $0x88] sm:$0xff] }
  0x66   : > { %1587 = vmatprep.subr.bf16.mxu0 %v1586_v54  ;;  %1608 = vmatpush3.bf16.msra.mxu1 %v1607_v62  ;;  %v431_v51 = vld [vmem:[#allocation5 + $0xf8] sm:$0xff]  ;;  %v434_v52 = vld [vmem:[#allocation5 + $0x110] sm:$0xff]  ;;  %v1636_v53 = vpack.c.bf16 %v427_v48, %v424_v45  ;;  %v1657_v55 = vpack.c.bf16 %v417_v50, %v414_v49  ;;  %v433_v57 = vld [vmem:[#allocation5 + $0x108] sm:$0xff] }
  0x67   : > { %1609 = vmatprep.subr.bf16.mxu1 %v1926_v8  ;;  %v430_v54 = vld [vmem:[#allocation5 + $0xf0] sm:$0xff]  ;;  %v1638_v56 = vpack.c.bf16 %v434_v52, %v431_v51  ;;  %v420_v58 = vld [vmem:[#allocation5 + $0xa0] sm:$0xff]  ;;  %v423_v59 = vld [vmem:[#allocation5 + $0xb8] sm:$0xff] }
  0x68   : > { %v440_v61 = vld [vmem:[#allocation5 + $0x140] sm:$0xff]  ;;  %v1640_v62 = vpack.c.bf16 %v433_v57, %v430_v54  ;;  %v1660_v0 = vpack.c.bf16 %v423_v59, %v420_v58  ;;  %v439_v2 = vld [vmem:[#allocation5 + $0x138] sm:$0xff]  ;;  %v426_v3 = vld [vmem:[#allocation5 + $0xd0] sm:$0xff] }
  0x69   : > { %1589 = vmatpush1.bf16.msra.mxu0 %v1588_v60  ;;  %v437_v60 = vld [vmem:[#allocation5 + $0x128] sm:$0xff]  ;;  %v446_v6 = vld [vmem:[#allocation5 + $0x170] sm:$0xff]  ;;  %v432_v14 = vld [vmem:[#allocation5 + $0x100] sm:$0xff] }
  0x6a   : > { %1591 = vmatprep.subr.bf16.mxu0 %v1590_v63  ;;  %1611 = vmatpush3.bf16.msra.mxu1 %v1610_v7  ;;  %v436_v63 = vld [vmem:[#allocation5 + $0x120] sm:$0xff]  ;;  %v1642_v1 = vpack.c.bf16 %v440_v61, %v437_v60  ;;  %v429_v4 = vld [vmem:[#allocation5 + $0xe8] sm:$0xff]  ;;  %v435_v15 = vld [vmem:[#allocation5 + $0x118] sm:$0xff] }
  0x6b   : > { %1612 = vmatprep.subr.bf16.mxu1 %v1926_v8  ;;  %v1644_v7 = vpack.c.bf16 %v439_v2, %v436_v63  ;;  %v1663_v11 = vpack.c.bf16 %v429_v4, %v426_v3  ;;  %v445_v13 = vld [vmem:[#allocation5 + $0x168] sm:$0xff]  ;;  %v782_v22 = vld [vmem:[#allocation3 + $0x198] sm:$0xff]  ;;  %v438_v23 = vld [vmem:[#allocation5 + $0x130] sm:$0xff] }
  0x6c   : > { %v441_v24 = vld [vmem:[#allocation5 + $0x148] sm:$0xff]  ;;  %v786_v25 = vld [vmem:[#allocation3 + $0x1b8] sm:$0xff]  ;;  %v2098_v27 = vld [vmem:[#allocation2] sm:$0xff] }
  0x6d   : > { %1593 = vmatpush1.bf16.msra.mxu0 %v1592_v5  ;;  %v443_v5 = vld [vmem:[#allocation5 + $0x158] sm:$0xff]  ;;  %v1669_v30 = vpack.c.bf16 %v441_v24, %v438_v23  ;;  %v788_v32 = vld [vmem:[#allocation3 + $0x1c8] sm:$0xff]  ;;  %v444_v33 = vld [vmem:[#allocation5 + $0x160] sm:$0xff] }
  0x6e   : > { %1619 = vmatprep.subr.bf16.mxu0 %v1618_v10  ;;  %1614 = vmatpush3.bf16.msra.mxu1 %v1613_v19  ;;  %v442_v10 = vld [vmem:[#allocation5 + $0x150] sm:$0xff]  ;;  %v1646_v12 = vpack.c.bf16 %v446_v6, %v443_v5  ;;  %v779_v19 = vld [vmem:[#allocation3 + $0x180] sm:$0xff]  ;;  %v447_v34 = vld [vmem:[#allocation5 + $0x178] sm:$0xff] }
  0x6f   : > { %1615 = vmatprep.subr.bf16.mxu1 %v1926_v8  ;;  %v1648_v18 = vpack.c.bf16 %v445_v13, %v442_v10  ;;  %v795_v36 = vld [vmem:[#allocation3 + $0x200] sm:$0xff]  ;;  %v1672_v39 = vpack.c.bf16 %v447_v34, %v444_v33  ;;  %v794_v41 = vld [vmem:[#allocation3 + $0x1f8] sm:$0xff]  ;;  %v781_v42 = vld [vmem:[#allocation3 + $0x190] sm:$0xff] }
  0x70   : > { %531 = vmatmul.mubr.f32.vlgmr.msra.gmra.mrb[0].mxu0 %v350_v16  ;;  %v784_v43 = vld [vmem:[#allocation3 + $0x1a8] sm:$0xff]  ;;  %v801_v45 = vld [vmem:[#allocation3 + $0x230] sm:$0xff]  ;;  %v787_v51 = vld [vmem:[#allocation3 + $0x1c0] sm:$0xff] }
  0x71   : > { %1621 = vmatpush1.bf16.msra.mxu0 %v1620_v17  ;;  %671 = vmatprep.mubr.f32.mxu0 %v1927_v9  ;;  %v783_v17 = vld [vmem:[#allocation3 + $0x1a0] sm:$0xff]  ;;  %v1707_v48 = vpack.c.bf16 %v784_v43, %v781_v42  ;;  %v800_v50 = vld [vmem:[#allocation3 + $0x228] sm:$0xff]  ;;  %v790_v52 = vld [vmem:[#allocation3 + $0x1d8] sm:$0xff] }
  0x72   : > { %1623 = vmatprep.subr.bf16.mxu0 %v1622_v20  ;;  %1617 = vmatpush3.bf16.msra.mxu1 %v1616_v28  ;;  %v1666_v20 = vpack.c.bf16 %v435_v15, %v432_v14  ;;  %v1676_v28 = vpack.c.bf16 %v782_v22, %v779_v19  ;;  %v807_v54 = vld [vmem:[#allocation3 + $0x260] sm:$0xff]  ;;  %v1710_v57 = vpack.c.bf16 %v790_v52, %v787_v51  ;;  %v806_v59 = vld [vmem:[#allocation3 + $0x258] sm:$0xff]  ;;  %v793_v60 = vld [vmem:[#allocation3 + $0x1f0] sm:$0xff] }
  0x73   : > { %1650 = vmatprep.subr.bf16.mxu1 %v1926_v8  ;;  %v796_v61 = vld [vmem:[#allocation3 + $0x208] sm:$0xff]  ;;  %v813_v63 = vld [vmem:[#allocation3 + $0x290] sm:$0xff]  ;;  %v799_v5 = vld [vmem:[#allocation3 + $0x220] sm:$0xff] }
  0x74   : > { %v1713_v2 = vpack.c.bf16 %v796_v61, %v793_v60  ;;  %v812_v4 = vld [vmem:[#allocation3 + $0x288] sm:$0xff]  ;;  %v802_v6 = vld [vmem:[#allocation3 + $0x238] sm:$0xff]  ;;  %v819_v10 = vld [vmem:[#allocation3 + $0x2c0] sm:$0xff] }
  0x75   : > { %1625 = vmatpush1.bf16.msra.mxu0 %v1624_v26  ;;  %1455 = vmatmul.mubr.f32.vlgmr.msra.gmra.mrb[0].mxu1 %v350_v16  ;;  %v780_v16 = vld [vmem:[#allocation3 + $0x188] sm:$0xff]  ;;  %v789_v26 = vld [vmem:[#allocation3 + $0x1d0] sm:$0xff]  ;;  %v1716_v13 = vpack.c.bf16 %v802_v6, %v799_v5  ;;  %v818_v15 = vld [vmem:[#allocation3 + $0x2b8] sm:$0xff] }
  0x76   : > { %1627 = vmatprep.subr.bf16.mxu0 %v1626_v29  ;;  %1652 = vmatpush3.bf16.msra.mxu1 %v1651_v37  ;;  %v1674_v21 = vpack.c.bf16 %v783_v17, %v780_v16  ;;  %v785_v29 = vld [vmem:[#allocation3 + $0x1b0] sm:$0xff]  ;;  %v1678_v31 = vpack.c.bf16 %v789_v26, %v786_v25  ;;  %v808_v17 = vld [vmem:[#allocation3 + $0x268] sm:$0xff]  ;;  %v811_v25 = vld [vmem:[#allocation3 + $0x280] sm:$0xff] }
  0x77   : > { %1653 = vmatprep.subr.bf16.mxu1 %v1926_v8  ;;  %1489 = vmatprep.mubr.msk.f32.mxu1 %vm1928_vm0, %v1927_v9  ;;  %v1680_v37 = vpack.c.bf16 %v788_v32, %v785_v29  ;;  %v805_v16 = vld [vmem:[#allocation3 + $0x250] sm:$0xff]  ;;  %v824_v24 = vld [vmem:[#allocation3 + $0x2e8] sm:$0xff]  ;;  %v814_v26 = vld [vmem:[#allocation3 + $0x298] sm:$0xff] }
  0x78   : > { %v825_v19 = vld [vmem:[#allocation3 + $0x2f0] sm:$0xff]  ;;  %v1719_v22 = vpack.c.bf16 %v808_v17, %v805_v16  ;;  %v832_v29 = vld [vmem:[#allocation5 + $0x1a0] sm:$0xff]  ;;  %v1722_v32 = vpack.c.bf16 %v814_v26, %v811_v25  ;;  %v831_v34 = vld [vmem:[#allocation5 + $0x198] sm:$0xff] }
  0x79   : > { %1629 = vmatpush1.bf16.msra.mxu0 %v1628_v35  ;;  %v792_v35 = vld [vmem:[#allocation3 + $0x1e8] sm:$0xff]  ;;  %v867_v26 = vld [vmem:[#allocation5 + $0x2b8] sm:$0xff] }
  0x7a   : > { %1631 = vmatprep.subr.bf16.mxu0 %v1630_v38  ;;  %1655 = vmatpush3.bf16.msra.mxu1 %v1654_v46  ;;  %v791_v38 = vld [vmem:[#allocation3 + $0x1e0] sm:$0xff]  ;;  %v1682_v40 = vpack.c.bf16 %v795_v36, %v792_v35  ;;  %v817_v35 = vld [vmem:[#allocation3 + $0x2b0] sm:$0xff]  ;;  %v820_v36 = vld [vmem:[#allocation3 + $0x2c8] sm:$0xff] }
  0x7b   : > { %1656 = vmatprep.subr.bf16.mxu1 %v1926_v8  ;;  %v1684_v46 = vpack.c.bf16 %v794_v41, %v791_v38  ;;  %v838_v38 = vld [vmem:[#allocation5 + $0x1d0] sm:$0xff]  ;;  %v1725_v42 = vpack.c.bf16 %v820_v36, %v817_v35  ;;  %v873_v36 = vld [vmem:[#allocation5 + $0x2e8] sm:$0xff] }
  0x7c   : > { %v834_v41 = vld [vmem:[#allocation5 + $0x1b0] sm:$0xff] }
  0x7d   : > { %1633 = vmatpush1.bf16.msra.mxu0 %v1632_v44  ;;  %v798_v44 = vld [vmem:[#allocation3 + $0x218] sm:$0xff] }
  0x7e   : > { %1635 = vmatprep.subr.bf16.mxu0 %v1634_v47  ;;  %1658 = vmatpush3.bf16.msra.mxu1 %v1657_v55  ;;  %v797_v47 = vld [vmem:[#allocation3 + $0x210] sm:$0xff]  ;;  %v1686_v49 = vpack.c.bf16 %v801_v45, %v798_v44  ;;  %v837_v44 = vld [vmem:[#allocation5 + $0x1c8] sm:$0xff]  ;;  %v823_v45 = vld [vmem:[#allocation3 + $0x2e0] sm:$0xff] }
  0x7f   : > { %1659 = vmatprep.subr.bf16.mxu1 %v1926_v8  ;;  %v1688_v55 = vpack.c.bf16 %v800_v50, %v797_v47  ;;  %v841_v47 = vld [vmem:[#allocation5 + $0x1e8] sm:$0xff]  ;;  %v840_v50 = vld [vmem:[#allocation5 + $0x1e0] sm:$0xff] }
  0x81   : > { %1637 = vmatpush1.bf16.msra.mxu0 %v1636_v53  ;;  %v804_v53 = vld [vmem:[#allocation3 + $0x248] sm:$0xff] }
  0x82   : > { %1639 = vmatprep.subr.bf16.mxu0 %v1638_v56  ;;  %1661 = vmatpush3.bf16.msra.mxu1 %v1660_v0  ;;  %v803_v56 = vld [vmem:[#allocation3 + $0x240] sm:$0xff]  ;;  %v1690_v58 = vpack.c.bf16 %v807_v54, %v804_v53  ;;  %v843_v53 = vld [vmem:[#allocation5 + $0x1f8] sm:$0xff]  ;;  %v830_v54 = vld [vmem:[#allocation5 + $0x190] sm:$0xff] }
  0x83   : > { %1662 = vmatprep.subr.bf16.mxu1 %v1926_v8  ;;  %v1692_v0 = vpack.c.bf16 %v806_v59, %v803_v56  ;;  %v847_v56 = vld [vmem:[#allocation5 + $0x218] sm:$0xff]  ;;  %v846_v59 = vld [vmem:[#allocation5 + $0x210] sm:$0xff] }
  0x85   : > { %1641 = vmatpush1.bf16.msra.mxu0 %v1640_v62  ;;  %v810_v62 = vld [vmem:[#allocation3 + $0x278] sm:$0xff] }
  0x86   : > { %1643 = vmatprep.subr.bf16.mxu0 %v1642_v1  ;;  %1664 = vmatpush3.bf16.msra.mxu1 %v1663_v11  ;;  %v809_v1 = vld [vmem:[#allocation3 + $0x270] sm:$0xff]  ;;  %v1694_v3 = vpack.c.bf16 %v813_v63, %v810_v62  ;;  %v849_v62 = vld [vmem:[#allocation5 + $0x228] sm:$0xff]  ;;  %v836_v63 = vld [vmem:[#allocation5 + $0x1c0] sm:$0xff] }
  0x87   : > { %1665 = vmatprep.subr.bf16.mxu1 %v1926_v8  ;;  %v1696_v11 = vpack.c.bf16 %v812_v4, %v809_v1  ;;  %v853_v1 = vld [vmem:[#allocation5 + $0x248] sm:$0xff]  ;;  %v852_v4 = vld [vmem:[#allocation5 + $0x240] sm:$0xff] }
  0x89   : > { %1645 = vmatpush1.bf16.msra.mxu0 %v1644_v7  ;;  %v816_v7 = vld [vmem:[#allocation3 + $0x2a8] sm:$0xff] }
  0x8a   : > { %1647 = vmatprep.subr.bf16.mxu0 %v1646_v12  ;;  %1667 = vmatpush3.bf16.msra.mxu1 %v1666_v20  ;;  %v815_v12 = vld [vmem:[#allocation3 + $0x2a0] sm:$0xff]  ;;  %v1698_v14 = vpack.c.bf16 %v819_v10, %v816_v7  ;;  %v855_v7 = vld [vmem:[#allocation5 + $0x258] sm:$0xff]  ;;  %v842_v10 = vld [vmem:[#allocation5 + $0x1f0] sm:$0xff] }
  0x8b   : > { %1668 = vmatprep.subr.bf16.mxu1 %v1926_v8  ;;  %v1700_v20 = vpack.c.bf16 %v818_v15, %v815_v12  ;;  %v859_v12 = vld [vmem:[#allocation5 + $0x278] sm:$0xff]  ;;  %v858_v15 = vld [vmem:[#allocation5 + $0x270] sm:$0xff] }
  0x8d   : > { %1649 = vmatpush1.bf16.msra.mxu0 %v1648_v18  ;;  %v822_v18 = vld [vmem:[#allocation3 + $0x2d8] sm:$0xff] }
  0x8e   : > { %1675 = vmatprep.subr.bf16.mxu0 %v1674_v21  ;;  %1670 = vmatpush3.bf16.msra.mxu1 %v1669_v30  ;;  %v821_v21 = vld [vmem:[#allocation3 + $0x2d0] sm:$0xff]  ;;  %v1702_v23 = vpack.c.bf16 %v825_v19, %v822_v18  ;;  %v861_v18 = vld [vmem:[#allocation5 + $0x288] sm:$0xff]  ;;  %v848_v19 = vld [vmem:[#allocation5 + $0x220] sm:$0xff] }
  0x8f   : > { %1671 = vmatprep.subr.bf16.mxu1 %v1926_v8  ;;  %v1704_v30 = vpack.c.bf16 %v824_v24, %v821_v21  ;;  %v865_v21 = vld [vmem:[#allocation5 + $0x2a8] sm:$0xff]  ;;  %v864_v24 = vld [vmem:[#allocation5 + $0x2a0] sm:$0xff] }
  0x90   : > { %672 = vmatmul.mubr.f32.vlgmr.msra.gmra.mrb[0].mxu0 %v2098_v27 }
  0x91   : > { %1677 = vmatpush1.bf16.msra.mxu0 %v1676_v28  ;;  %960 = vmatprep.mubr.f32.mxu0 %v1927_v9  ;;  %v829_v28 = vld [vmem:[#allocation5 + $0x188] sm:$0xff] }
  0x92   : > { %1679 = vmatprep.subr.bf16.mxu0 %v1678_v31  ;;  %1673 = vmatpush3.bf16.msra.mxu1 %v1672_v39  ;;  %v828_v31 = vld [vmem:[#allocation5 + $0x180] sm:$0xff]  ;;  %v1730_v33 = vpack.c.bf16 %v832_v29, %v829_v28  ;;  %v775_v39 = vld [vmem:[%s2063_s19] sm:$0xff]  ;;  %v857_v29 = vld [vmem:[#allocation5 + $0x268] sm:$0xff] }
  0x93   : > { %1706 = vmatprep.subr.bf16.mxu1 %v1926_v8  ;;  %v854_v28 = vld [vmem:[#allocation5 + $0x250] sm:$0xff] }
  0x95   : > { %1681 = vmatpush1.bf16.msra.mxu0 %v1680_v37  ;;  %1490 = vmatmul.mubr.f32.vlgmr.msra.gmra.mrb[2].mxu1 %v2098_v27  ;;  %v835_v37 = vld [vmem:[#allocation5 + $0x1b8] sm:$0xff] }
  0x96   : > { %1683 = vmatprep.subr.bf16.mxu0 %v1682_v40  ;;  %1708 = vmatpush3.bf16.msra.mxu1 %v1707_v48  ;;  %v1732_v40 = vpack.c.bf16 %v831_v34, %v828_v31  ;;  %v1734_v43 = vpack.c.bf16 %v838_v38, %v835_v37  ;;  %v844_v48 = vld [vmem:[#allocation5 + $0x200] sm:$0xff]  ;;  %v874_v31 = vld [vmem:[#allocation5 + $0x2f0] sm:$0xff]  ;;  %v1775_v34 = vpack.c.bf16 %v857_v29, %v854_v28  ;;  %v863_v38 = vld [vmem:[#allocation5 + $0x298] sm:$0xff] }
  0x97   : > { %1709 = vmatprep.subr.bf16.mxu1 %v1926_v8  ;;  %1524 = vmatprep.mubr.msk.f32.mxu1 %vm1928_vm0, %v1927_v9  ;;  %v1738_v52 = vpack.c.bf16 %v844_v48, %v841_v47  ;;  %v860_v37 = vld [vmem:[#allocation5 + $0x280] sm:$0xff] }
  0x99   : > { %1685 = vmatpush1.bf16.msra.mxu0 %v1684_v46  ;;  %v826_v46 = vld [vmem:[#allocation3 + $0x2f8] sm:$0xff] }
  0x9a   : > { %1687 = vmatprep.subr.bf16.mxu0 %v1686_v49  ;;  %1711 = vmatpush3.bf16.msra.mxu1 %v1710_v57  ;;  %v1736_v49 = vpack.c.bf16 %v837_v44, %v834_v41  ;;  %v1728_v51 = vpack.c.bf16 %v826_v46, %v823_v45  ;;  %v850_v57 = vld [vmem:[#allocation5 + $0x230] sm:$0xff]  ;;  %v872_v45 = vld [vmem:[#allocation5 + $0x2e0] sm:$0xff]  ;;  %v875_v46 = vld [vmem:[#allocation5 + $0x2f8] sm:$0xff] }
  0x9b   : > { %1712 = vmatprep.subr.bf16.mxu1 %v1926_v8  ;;  %v1742_v61 = vpack.c.bf16 %v850_v57, %v847_v56  ;;  %v866_v41 = vld [vmem:[#allocation5 + $0x2b0] sm:$0xff]  ;;  %v1784_v47 = vpack.c.bf16 %v875_v46, %v872_v45 }
  0x9d   : > { %1689 = vmatpush1.bf16.msra.mxu0 %v1688_v55  ;;  %v833_v55 = vld [vmem:[#allocation5 + $0x1a8] sm:$0xff] }
  0x9e   : > { %1691 = vmatprep.subr.bf16.mxu0 %v1690_v58  ;;  %1714 = vmatpush3.bf16.msra.mxu1 %v1713_v2  ;;  %v1740_v58 = vpack.c.bf16 %v843_v53, %v840_v50  ;;  %v1763_v60 = vpack.c.bf16 %v833_v55, %v830_v54  ;;  %v856_v2 = vld [vmem:[#allocation5 + $0x260] sm:$0xff]  ;;  %v451_v50 = vlaneseq  ;;  %v448_v53 = vld [vmem:[%s2154_s4] sm:$0x7] }
  0x9f   : > { %1715 = vmatprep.subr.bf16.mxu1 %v1926_v8  ;;  %v1746_v6 = vpack.c.bf16 %v856_v2, %v853_v1 }
  0xa1   : > { %1693 = vmatpush1.bf16.msra.mxu0 %v1692_v0  ;;  %v839_v0 = vld [vmem:[#allocation5 + $0x1d8] sm:$0xff] }
  0xa2   : > { %1695 = vmatprep.subr.bf16.mxu0 %v1694_v3  ;;  %1717 = vmatpush3.bf16.msra.mxu1 %v1716_v13  ;;  %v1744_v3 = vpack.c.bf16 %v849_v62, %v846_v59  ;;  %v1766_v5 = vpack.c.bf16 %v839_v0, %v836_v63  ;;  %v862_v13 = vld [vmem:[#allocation5 + $0x290] sm:$0xff] }
  0xa3   : > { %1718 = vmatprep.subr.bf16.mxu1 %v1926_v8  ;;  %v1750_v17 = vpack.c.bf16 %v862_v13, %v859_v12 }
  0xa5   : > { %1697 = vmatpush1.bf16.msra.mxu0 %v1696_v11  ;;  %v845_v11 = vld [vmem:[#allocation5 + $0x208] sm:$0xff] }
  0xa6   : > { %1699 = vmatprep.subr.bf16.mxu0 %v1698_v14  ;;  %1720 = vmatpush3.bf16.msra.mxu1 %v1719_v22  ;;  %v1748_v14 = vpack.c.bf16 %v855_v7, %v852_v4  ;;  %v1769_v16 = vpack.c.bf16 %v845_v11, %v842_v10  ;;  %v868_v22 = vld [vmem:[#allocation5 + $0x2c0] sm:$0xff] }
  0xa7   : > { %1721 = vmatprep.subr.bf16.mxu1 %v1926_v8 }
  0xa9   : > { %1701 = vmatpush1.bf16.msra.mxu0 %v1700_v20  ;;  %v851_v20 = vld [vmem:[#allocation5 + $0x238] sm:$0xff] }
  0xaa   : > { %1703 = vmatprep.subr.bf16.mxu0 %v1702_v23  ;;  %1723 = vmatpush3.bf16.msra.mxu1 %v1722_v32  ;;  %v1752_v23 = vpack.c.bf16 %v861_v18, %v858_v15  ;;  %v1772_v25 = vpack.c.bf16 %v851_v20, %v848_v19  ;;  %v1756_v32 = vpack.c.bf16 %v867_v26, %v864_v24 }
  0xab   : > { %1724 = vmatprep.subr.bf16.mxu1 %v1926_v8 }
  0xad   : > { %1705 = vmatpush1.bf16.msra.mxu0 %v1704_v30  ;;  %v871_v30 = vld [vmem:[#allocation5 + $0x2d8] sm:$0xff] }
  0xae   : > { %1731 = vmatprep.subr.bf16.mxu0 %v1730_v33  ;;  %1726 = vmatpush3.bf16.msra.mxu1 %v1725_v42  ;;  %v870_v33 = vld [vmem:[#allocation5 + $0x2d0] sm:$0xff]  ;;  %v1758_v35 = vpack.c.bf16 %v874_v31, %v871_v30  ;;  %v869_v42 = vld [vmem:[#allocation5 + $0x2c8] sm:$0xff] }
  0xaf   : > { %1727 = vmatprep.subr.bf16.mxu1 %v1926_v8  ;;  %v1781_v44 = vpack.c.bf16 %v869_v42, %v866_v41 }
  0xb0   : > { %961 = vmatmul.mubr.f32.vlgmr.msra.gmra.mrb[2].mxu0 %v775_v39 }
  0xb1   : > { %1733 = vmatpush1.bf16.msra.mxu0 %v1732_v40  ;;  %1101 = vmatprep.mubr.f32.mxu0 %v1927_v9  ;;  %v1778_v40 = vpack.c.bf16 %v863_v38, %v860_v37 }
  0xb2   : > { %1735 = vmatprep.subr.bf16.mxu0 %v1734_v43  ;;  %1729 = vmatpush3.bf16.msra.mxu1 %v1728_v51  ;;  %v2125_v43 = vld [vmem:[#allocation2 + $0x8] sm:$0xff]  ;;  %v452_v51 = vshrl.u32 %v451_v50, 7 }
  0xb3   : > { %1762 = vmatprep.subr.bf16.mxu1 %v1926_v8 }
  0xb4   : > { %v457_v57 = vsub.s32 1, %v452_v51  ;;  %v461_v2 = vsub.s32 2, %v452_v51 }
  0xb5   : > { %1737 = vmatpush1.bf16.msra.mxu0 %v1736_v49  ;;  %1525 = vmatmul.mubr.f32.vlgmr.msra.gmra.mrb[4].mxu1 %v775_v39  ;;  %v1760_v39 = vpack.c.bf16 %v873_v36, %v870_v33 }
  0xb6   : > { %1739 = vmatprep.subr.bf16.mxu0 %v1738_v52  ;;  %1764 = vmatpush3.bf16.msra.mxu1 %v1763_v60  ;;  %v453_v52 = vsub.s32 0, %v452_v51  ;;  %v462_v4 = vrot.slane %v448_v53, %v461_v2 }
  0xb7   : > { %1765 = vmatprep.subr.bf16.mxu1 %v1926_v8  ;;  %1559 = vmatprep.mubr.msk.f32.mxu1 %vm1928_vm0, %v1927_v9  ;;  %v1754_v9 = vpack.c.bf16 %v868_v22, %v865_v21 }
  0xb8   : > { %v454_v54 = vrot.slane %v448_v53, %v453_v52 }
  0xb9   : > { %1741 = vmatpush1.bf16.msra.mxu0 %v1740_v58 }
  0xba   : > { %1743 = vmatprep.subr.bf16.mxu0 %v1742_v61  ;;  %1767 = vmatpush3.bf16.msra.mxu1 %v1766_v5 }
  0xbb   : > { %1768 = vmatprep.subr.bf16.mxu1 %v1926_v8 }
  0xbd   : > { %1745 = vmatpush1.bf16.msra.mxu0 %v1744_v3  ;;  %v1346_v3 = vld [vmem:[%s2155_s5] ss:$0 sm:$0xff] }
  0xbe   : > { %1747 = vmatprep.subr.bf16.mxu0 %v1746_v6  ;;  %1770 = vmatpush3.bf16.msra.mxu1 %v1769_v16 }
  0xbf   : > { %1771 = vmatprep.subr.bf16.mxu1 %v1926_v8 }
  0xc1   : > { %1749 = vmatpush1.bf16.msra.mxu0 %v1748_v14  ;;  %v1347_v14 = vld [vmem:[%s2154_s4 + $0x3] sm:$0x7] }
  0xc2   : > { %1751 = vmatprep.subr.bf16.mxu0 %v1750_v17  ;;  %1773 = vmatpush3.bf16.msra.mxu1 %v1772_v25  ;;  %v892_v15 = vrot.slane %v1347_v14, %v461_v2  ;;  %v884_v24 = vrot.slane %v1347_v14, %v453_v52  ;;  %v888_v25 = vrot.slane %v1347_v14, %v457_v57 }
  0xc3   : > { %1774 = vmatprep.subr.bf16.mxu1 %v1926_v8 }
  0xc5   : > { %1753 = vmatpush1.bf16.msra.mxu0 %v1752_v23 }
  0xc6   : > { %1755 = vmatprep.subr.bf16.mxu0 %v1754_v9  ;;  %1776 = vmatpush3.bf16.msra.mxu1 %v1775_v34 }
  0xc7   : > { %1777 = vmatprep.subr.bf16.mxu1 %v1926_v8 }
  0xc9   : > { %1757 = vmatpush1.bf16.msra.mxu0 %v1756_v32 }
  0xca   : > { %1759 = vmatprep.subr.bf16.mxu0 %v1758_v35  ;;  %1779 = vmatpush3.bf16.msra.mxu1 %v1778_v40 }
  0xcb   : > { %1780 = vmatprep.subr.bf16.mxu1 %v1926_v8 }
  0xcd   : > { %1761 = vmatpush1.bf16.msra.mxu0 %v1760_v39 }
  0xce   : > { %1782 = vmatpush3.bf16.msra.mxu1 %v1781_v44 }
  0xcf   : > { %1783 = vmatprep.subr.bf16.mxu1 %v1926_v8  ;;  %v458_v8 = vrot.slane %v448_v53, %v457_v57 }
  0xd0   : > { %1102 = vmatmul.mubr.f32.vlgmr.msra.gmra.mrb[2].mxu0 %v2125_v43 }
  0xd2   : > { %1785 = vmatpush3.bf16.msra.mxu1 %v1784_v47 }
  0xd5   : > { %1560 = vmatmul.mubr.f32.vlgmr.msra.gmra.mrb[6].mxu1 %v2125_v43 }
 0x148   : > { %v603_v48 = vpop.f32.mrb[0].mxu1 }
 0x149   : > { %v1456_v49 = vpop.f32.mrb[1].mxu1  ;;  %v604_v10 = vadd.f32 %v603_v48, %v462_v4 }
 0x163   : > { %v673_v55 = vpop.f32.mrb[0].mxu0 }
 0x164   : > { %v1786_v56 = vadd.f32 %v673_v55, %v454_v54  ;;  %v675_v58 = vpop.f32.mrb[1].mxu0 }
 0x165   : > { %v1787_v61 = vadd.f32 %v675_v58, %v458_v8 }
 0x166   : > { %v1344_v59 = vmul.f32 -1.442695, %v1786_v56 }
 0x167   : > { %v1345_v63 = vmul.f32 -1.442695, %v1787_v61 }
 0x168   : > { %1829 = vpow2.f32 %v1344_v59  ;;  %v744_v60 = vpop.f32.mrb[2].mxu1 }
 0x169   : > { %v1491_v62 = vpop.f32.mrb[3].mxu1  ;;  %1831 = vpow2.f32 %v1345_v63  ;;  %v768_v5 = vadd.f32 %v1346_v3, %v744_v60 }
 0x172   : > { %v1830_v0 = vpop.eup %1829 }
 0x173   : > { %v752_v1 = vadd.f32 1.0, %v1830_v0  ;;  %v1832_v6 = vpop.eup %1831 }
 0x174   : > { %v759_v12 = vadd.f32 1.0, %v1832_v6 }
 0x175   : > { %1833 = vrcp.f32 %v752_v1 }
 0x17f   : > { %v1834_v7 = vpop.eup %1833 }
 0x180   : > { %v769_v11 = vmul.f32 %v1834_v7, %v768_v5 }
 0x182   : > { %v770_v13 = vadd.f32 %v769_v11, %v604_v10 }
 0x184   : > { %1835 = vtanh.f32 %v770_v13 }
 0x185   : > { %1837 = vrcp.f32 %v759_v12 }
 0x188   : > { %v1033_v16 = vpop.f32.mrb[4].mxu1 }
 0x189   : > { %v1034_v17 = vadd.f32 %v1033_v16, %v892_v15  ;;  %v1526_v18 = vpop.f32.mrb[5].mxu1 }
 0x18e   : > { %v1836_v19 = vpop.eup %1835 }
 0x18f   : > { %v772_v20 = vsub.f32 %v2098_v27, %v1836_v19  ;;  %v1838_v21 = vpop.eup %1837  ;;  %v1351_v27 = vld [vmem:[%s2155_s5 + $0x1] ss:$0 sm:$0xff] }
 0x191   : > { %v773_v22 = vmul.f32 %v1838_v21, %v772_v20 }
 0x193   : > { %v774_v23 = vadd.f32 %v1836_v19, %v773_v22 }
 0x195   : > { %1205 = vst [vmem:[#allocation2] sm:$0xff] %v774_v23  ;;  %1207 = vst [vmem:[%s2068_s22] sm:$0xff] %v774_v23 }
 0x1a3   : > { %v1103_v9 = vpop.f32.mrb[2].mxu0 }
 0x1a4   : > { %v1788_v26 = vadd.f32 %v1103_v9, %v884_v24  ;;  %v1105_v28 = vpop.f32.mrb[3].mxu0 }
 0x1a5   : > { %v1789_v29 = vadd.f32 %v1105_v28, %v888_v25 }
 0x1a6   : > { %v1349_v30 = vmul.f32 -1.442695, %v1788_v26 }
 0x1a7   : > { %v1350_v33 = vmul.f32 -1.442695, %v1789_v29 }
 0x1a8   : > { %1839 = vpow2.f32 %v1349_v30  ;;  %v1174_v31 = vpop.f32.mrb[6].mxu1 }
 0x1a9   : > { %v1561_v32 = vpop.f32.mrb[7].mxu1  ;;  %1841 = vpow2.f32 %v1350_v33  ;;  %v1198_v36 = vadd.f32 %v1351_v27, %v1174_v31 }
 0x1b2   : > { %v1840_v34 = vpop.eup %1839 }
 0x1b3   : > { %v1182_v35 = vadd.f32 1.0, %v1840_v34  ;;  %v1842_v37 = vpop.eup %1841 }
 0x1b4   : > { %v1189_v40 = vadd.f32 1.0, %v1842_v37 }
 0x1b5   : > { %1843 = vrcp.f32 %v1182_v35 }
 0x1bf   : > { %v1844_v38 = vpop.eup %1843 }
 0x1c0   : > { %v1199_v39 = vmul.f32 %v1844_v38, %v1198_v36 }
 0x1c2   : > { %v1200_v41 = vadd.f32 %v1199_v39, %v1034_v17 }
 0x1c4   : > { %1845 = vtanh.f32 %v1200_v41 }
 0x1c5   : > { %1847 = vrcp.f32 %v1189_v40 }
 0x1ce   : > { %v1846_v42 = vpop.eup %1845 }
 0x1cf   : > { %v1202_v44 = vsub.f32 %v2125_v43, %v1846_v42  ;;  %v1848_v45 = vpop.eup %1847 }
 0x1d1   : > { %v1203_v46 = vmul.f32 %v1848_v45, %v1202_v44 }
 0x1d3   : > { %v1204_v47 = vadd.f32 %v1846_v42, %v1203_v46 }
 0x1d5   : > { %1206 = vst [vmem:[#allocation2 + $0x8] sm:$0xff] %v1204_v47  ;;  %1208 = vst [vmem:[%s2073_s29] sm:$0xff] %v1204_v47 }
 0x1d6 PF: > { %s20_s24 = sadd.s32 1, %s1919_s24  }
 0x1d7   : > { %p17_p11 = scmp.ge.s32.totalorder %s20_s24, 10  }
 0x1d9   :  { %19 = sbr.rel (!%p17_p11) target bundleno = 2 (0x2), region = 107 }
 0x1e0   :  { %1245 = vsyncpa [#allocation4], 1 }
 0x1e1   :  { %1247 = vsyncpa [#allocation4 + $0x1], 1 }
 0x1e2   :  { %1248 = vsyncpa [#allocation6], 1 }

// kernel: birnn_forward.4
= control target key start
LH: loop header
LB: loop body
LE: loop exit
PB: predicated region body
PF: predicated region fallthrough
CT: control target
= control target key end

     0   :  { %13 = vsyncpa [#allocation4], 0  ;;  %s2149_s24 = smov 0   ;;  %s2857_s0 = inlined_call_operand.vmem [shape: f32[8,8,256], index: 0, kind: input, shape index: {}, may-alias: {0,1}]   ;;  %s2858_s1 = inlined_call_operand.vmem [shape: f32[8,8,256], index: 1, kind: input, shape index: {}, may-alias: {0,1}]   ;;  %s2859_s2 = inlined_call_operand.vmem [shape: f32[2,256,384], index: 2, kind: input, shape index: {}]   ;;  %s2860_s3 = inlined_call_operand.hbm [shape: f32[2,128,384], index: 3, kind: input, shape index: {}]   ;;  %s2861_s4 = inlined_call_operand.vmem [shape: f32[2,1,384], index: 4, kind: input, shape index: {}]   ;;  %s2862_s5 = inlined_call_operand.vmem [shape: f32[2,1,128], index: 5, kind: input, shape index: {}]   ;;  %s2863_s6 = inlined_call_operand.vmem [shape: f32[8,8,128], index: 6, kind: output, shape index: {0}]   ;;  %s2864_s7 = inlined_call_operand.vmem [shape: f32[8,8,128], index: 7, kind: output, shape index: {1}]  }
   0x1 LB: > { %s2155_s25 = sadd.s32 4294967295, %s2100_s24   ;;  %p1411_p0 = scmp.ge.s32.totalorder %s2100_s24, 1  ;;  %s2100_s24 = sphi %s2149_s24, %s19_s24  }
   0x2   : > { %p216_p1 = scmp.lt.s32.totalorder %s2100_s24, 9  ;;  %s2102_s26 = smov [#allocation3]  }
   0x3   : > { %s231_s27 = sshll.u32 %s2102_s26, 4  ;;  %p2865_p4 = scmp.eq.s32.totalorder %s2155_s25, 0  ;;  %s232_s27 = int_to_ptr.vmem [resolvable:$true] %s231_s27 }
   0x4   : > { %p2160_p3 = pnand %p1411_p0, %p216_p1  ;;  %s2062_s9 = scalar_lea.hbm %s2860_s3, 12288 }
   0x5   : > { %p2063_p7 = scmp.ne.s32.totalorder %s2860_s3, %s2062_s9  ;;  %p2069_p11 = scmp.lt.u32.totalorder %s2062_s9, %s2860_s3 }
   0x6   : > { %s2867_s28 = scalar_select %p2160_p3, 1, 0 }
   0x7   : > { %p2021_p5 = pneg %p2160_p3 }
   0x9   : > { %p2169_p6 = pnand %p2865_p4, %p2021_p5 }
   0xb   : > { %p2064_p8 = pneg %p2169_p6 }
   0xd   : > { %p2065_p9 = pnand %p2064_p8, %p2063_p7 }
   0xf   : > { %p2066_p10 = pneg %p2065_p9 }
  0x11   : > { %p2071_p12 = pnand %p2069_p11, %p2066_p10 }
  0x13   : > { %2074 = shalt.err (!%p2071_p12)
}
  0x14   : > { %s2075_s14 = scalar_lea.vmem %s232_s27, 12288  ;;  %p2083_p5 = scmp.lt.s32.totalorder %s232_s27, %s232_s27 }
  0x15   : > { %p2076_p13 = scmp.ne.s32.totalorder %s232_s27, %s2075_s14  ;;  %p2084_p2 = scmp.lt.s32.totalorder %s2075_s14, %s2075_s14 }
  0x17   : > { %p2078_p0 = pnand %p2076_p13, %p2064_p8  ;;  %p2085_p4 = por %p2084_p2, %p2083_p5 }
  0x19   : > { %p2079_p1 = pneg %p2078_p0 }
  0x1b   : > { %p2086_p3 = pnand %p2085_p4, %p2079_p1 }
  0x1d   : > { %2089 = shalt.err (!%p2086_p3)
}
  0x1e   : > { %s2103_s15 = smov 384   ;;  %s2104_s16 = smov 24  }
  0x1f   : > { %2024 = dma.hbm_to_vmem [thread:$0]  (!%p2169_p6), %s2860_s3, 12288, %s232_s27, [#allocation4], %s2103_s15, %s2103_s15, %s2104_s16  }
  0x20   : > { %p2869_p7 = scmp.ne.s32.totalorder %s2867_s28, 0 }
  0x21   : > { %p2870_p9 = scmp.eq.s32.totalorder (!%p2869_p7), %s2155_s25, 0 }
  0x22   : > { %271 = sbr.rel (%p2869_p7) target bundleno = 478 (0x1de), region = 44 }
  0x29   : > { %2095 = dma.done.wait (%p2870_p9), [#allocation4], 12288   ;;  %p2871_p8 = pmov %p2870_p9 }
  0x2a   : > { %p313_p2 = scmp.lt.s32.totalorder %s2155_s25, 7  ;;  %s318_s19 = ssub.s32 7, %s2155_s25 }
  0x2b   : > { %2097 = vsyncadd (%p2871_p8), [#allocation4], 4294955008  ;;  %p319_p3 = scmp.lt.s32.totalorder %s318_s19, 7  ;;  %p2872_p4 = scmp.ne.s32.totalorder %s2155_s25, 0 }
  0x2c   : > { %s314_s20 = scalar_select %p313_p2, %s2155_s25, 7 }
  0x2d   : > { %s2874_s19 = smov (!%p319_p3, %s318_s19), 7  ;;  %338 = sbr.rel (%p2872_p4) target bundleno = 52 (0x34), region = 52 }
  0x2e   : > { %s1529_s21 = sshll.u32 %s314_s20, 4  ;;  %s1420_s22 = sshll.u32 %s314_s20, 3  ;;  %v2105_v0 = vmov (!%p2872_p4), 0.0  }
  0x2f   : > { %s2201_s27 = scalar_lea.vmem %s2857_s0, %s1529_s21  ;;  %s1530_s28 = sshll.u32 %s2874_s19, 4  ;;  %339 = vst [vmem:[#allocation2] sm:$0xff] (!%p2872_p4), %v2105_v0  ;;  %340 = vst [vmem:[#allocation2 + $0x8] sm:$0xff] (!%p2872_p4), %v2105_v0 }
  0x30   : > { %s2206_s8 = scalar_lea.vmem %s2858_s1, %s1530_s28  ;;  %s2211_s11 = scalar_lea.vmem %s2863_s6, %s1420_s22 }
  0x31   : > { %s1421_s12 = sshll.u32 %s2874_s19, 3 }
  0x32   : > { %s2216_s15 = scalar_lea.vmem %s2864_s7, %s1421_s12 }
  0x34 PF: > { %v345_v1 = vld [vmem:[%s2859_s2 + $0x8] sm:$0xff]  ;;  %v348_v2 = vld [vmem:[%s2859_s2 + $0x20] sm:$0xff]  ;;  %v394_v3 = vld [vmem:[%s2859_s2 + $0x190] sm:$0xff]  ;;  %vm2107_vm0 = vmmov 0  }
  0x35   : > { %v1705_v4 = vpack.c.bf16 %v348_v2, %v345_v1  ;;  %v397_v5 = vld [vmem:[%s2859_s2 + $0x1a8] sm:$0xff]  ;;  %v344_v6 = vld [vmem:[%s2859_s2] sm:$0xff]  ;;  %v347_v7 = vld [vmem:[%s2859_s2 + $0x18] sm:$0xff] }
  0x36   : > { %v1769_v8 = vpack.c.bf16 %v397_v5, %v394_v3  ;;  %v1707_v9 = vpack.c.bf16 %v347_v7, %v344_v6  ;;  %v346_v10 = vld [vmem:[%s2859_s2 + $0x10] sm:$0xff]  ;;  %v349_v11 = vld [vmem:[%s2859_s2 + $0x28] sm:$0xff]  ;;  %v351_v12 = vld [vmem:[%s2859_s2 + $0x38] sm:$0xff] }
  0x37   : > { %1706 = vmatprep.subr.bf16.mxu0 %v1705_v4  ;;  %v1771_v13 = vpack.c.bf16 %v349_v11, %v346_v10  ;;  %v354_v14 = vld [vmem:[%s2859_s2 + $0x50] sm:$0xff]  ;;  %v400_v15 = vld [vmem:[%s2859_s2 + $0x1c0] sm:$0xff]  ;;  %v403_v16 = vld [vmem:[%s2859_s2 + $0x1d8] sm:$0xff] }
  0x38   : > { %1770 = vmatprep.subr.bf16.mxu1 %v1769_v8  ;;  %1708 = vmatpush1.bf16.msra.mxu0 %v1707_v9  ;;  %v1709_v17 = vpack.c.bf16 %v354_v14, %v351_v12  ;;  %v1773_v18 = vpack.c.bf16 %v403_v16, %v400_v15  ;;  %v350_v19 = vld [vmem:[%s2859_s2 + $0x30] sm:$0xff]  ;;  %v353_v20 = vld [vmem:[%s2859_s2 + $0x48] sm:$0xff]  ;;  %v352_v21 = vld [vmem:[%s2859_s2 + $0x40] sm:$0xff] }
  0x39   : > { %1772 = vmatpush3.bf16.msra.mxu1 %v1771_v13  ;;  %v1711_v22 = vpack.c.bf16 %v353_v20, %v350_v19  ;;  %v355_v23 = vld [vmem:[%s2859_s2 + $0x58] sm:$0xff]  ;;  %v357_v24 = vld [vmem:[%s2859_s2 + $0x68] sm:$0xff]  ;;  %v360_v25 = vld [vmem:[%s2859_s2 + $0x80] sm:$0xff] }
  0x3a   : > { %1710 = vmatprep.subr.bf16.mxu0 %v1709_v17  ;;  %1774 = vmatprep.subr.bf16.mxu1 %v1773_v18  ;;  %v1775_v26 = vpack.c.bf16 %v355_v23, %v352_v21  ;;  %v1713_v27 = vpack.c.bf16 %v360_v25, %v357_v24  ;;  %v406_v28 = vld [vmem:[%s2859_s2 + $0x1f0] sm:$0xff]  ;;  %v409_v29 = vld [vmem:[%s2859_s2 + $0x208] sm:$0xff]  ;;  %v356_v30 = vld [vmem:[%s2859_s2 + $0x60] sm:$0xff] }
  0x3b   : > { %v1777_v31 = vpack.c.bf16 %v409_v29, %v406_v28  ;;  %v359_v32 = vld [vmem:[%s2859_s2 + $0x78] sm:$0xff]  ;;  %v358_v33 = vld [vmem:[%s2859_s2 + $0x70] sm:$0xff]  ;;  %v361_v34 = vld [vmem:[%s2859_s2 + $0x88] sm:$0xff] }
  0x3c   : > { %1712 = vmatpush1.bf16.msra.mxu0 %v1711_v22  ;;  %v1715_v35 = vpack.c.bf16 %v359_v32, %v356_v30  ;;  %v363_v36 = vld [vmem:[%s2859_s2 + $0x98] sm:$0xff]  ;;  %v366_v37 = vld [vmem:[%s2859_s2 + $0xb0] sm:$0xff]  ;;  %v412_v38 = vld [vmem:[%s2859_s2 + $0x220] sm:$0xff]  ;;  %v1779_v39 = vpack.c.bf16 %v361_v34, %v358_v33 }
  0x3d   : > { %1776 = vmatpush3.bf16.msra.mxu1 %v1775_v26  ;;  %1714 = vmatprep.subr.bf16.mxu0 %v1713_v27  ;;  %v1717_v40 = vpack.c.bf16 %v366_v37, %v363_v36  ;;  %v415_v41 = vld [vmem:[%s2859_s2 + $0x238] sm:$0xff]  ;;  %v362_v42 = vld [vmem:[%s2859_s2 + $0x90] sm:$0xff]  ;;  %v365_v43 = vld [vmem:[%s2859_s2 + $0xa8] sm:$0xff] }
  0x3e   : > { %1778 = vmatprep.subr.bf16.mxu1 %v1777_v31  ;;  %v1781_v44 = vpack.c.bf16 %v415_v41, %v412_v38  ;;  %v364_v45 = vld [vmem:[%s2859_s2 + $0xa0] sm:$0xff]  ;;  %v367_v46 = vld [vmem:[%s2859_s2 + $0xb8] sm:$0xff]  ;;  %v369_v47 = vld [vmem:[%s2859_s2 + $0xc8] sm:$0xff]  ;;  %v1719_v51 = vpack.c.bf16 %v365_v43, %v362_v42 }
  0x3f   : > { %v372_v48 = vld [vmem:[%s2859_s2 + $0xe0] sm:$0xff]  ;;  %v418_v49 = vld [vmem:[%s2859_s2 + $0x250] sm:$0xff]  ;;  %v421_v50 = vld [vmem:[%s2859_s2 + $0x268] sm:$0xff]  ;;  %v1783_v52 = vpack.c.bf16 %v367_v46, %v364_v45 }
  0x40   : > { %1716 = vmatpush1.bf16.msra.mxu0 %v1715_v35  ;;  %v1721_v53 = vpack.c.bf16 %v372_v48, %v369_v47  ;;  %v368_v54 = vld [vmem:[%s2859_s2 + $0xc0] sm:$0xff]  ;;  %v371_v55 = vld [vmem:[%s2859_s2 + $0xd8] sm:$0xff]  ;;  %v370_v56 = vld [vmem:[%s2859_s2 + $0xd0] sm:$0xff]  ;;  %v1785_v57 = vpack.c.bf16 %v421_v50, %v418_v49  ;;  %v2106_v50 = vmov 0.0|0.0  }
  0x41   : > { %1780 = vmatpush3.bf16.msra.mxu1 %v1779_v39  ;;  %1718 = vmatprep.subr.bf16.mxu0 %v1717_v40  ;;  %v373_v58 = vld [vmem:[%s2859_s2 + $0xe8] sm:$0xff]  ;;  %v375_v59 = vld [vmem:[%s2859_s2 + $0xf8] sm:$0xff]  ;;  %v378_v60 = vld [vmem:[%s2859_s2 + $0x110] sm:$0xff]  ;;  %v1723_v63 = vpack.c.bf16 %v371_v55, %v368_v54 }
  0x42   : > { %1782 = vmatprep.subr.bf16.mxu1 %v1781_v44  ;;  %v424_v61 = vld [vmem:[%s2859_s2 + $0x280] sm:$0xff]  ;;  %v427_v62 = vld [vmem:[%s2859_s2 + $0x298] sm:$0xff]  ;;  %v1787_v0 = vpack.c.bf16 %v373_v58, %v370_v56  ;;  %v1725_v1 = vpack.c.bf16 %v378_v60, %v375_v59  ;;  %v374_v2 = vld [vmem:[%s2859_s2 + $0xf0] sm:$0xff] }
  0x43   : > { %v377_v3 = vld [vmem:[%s2859_s2 + $0x108] sm:$0xff]  ;;  %v376_v4 = vld [vmem:[%s2859_s2 + $0x100] sm:$0xff]  ;;  %v1789_v5 = vpack.c.bf16 %v427_v62, %v424_v61  ;;  %v379_v6 = vld [vmem:[%s2859_s2 + $0x118] sm:$0xff] }
  0x44   : > { %1720 = vmatpush1.bf16.msra.mxu0 %v1719_v51  ;;  %v381_v7 = vld [vmem:[%s2859_s2 + $0x128] sm:$0xff]  ;;  %v384_v8 = vld [vmem:[%s2859_s2 + $0x140] sm:$0xff]  ;;  %v430_v9 = vld [vmem:[%s2859_s2 + $0x2b0] sm:$0xff]  ;;  %v1727_v11 = vpack.c.bf16 %v377_v3, %v374_v2  ;;  %v1791_v13 = vpack.c.bf16 %v379_v6, %v376_v4 }
  0x45   : > { %1784 = vmatpush3.bf16.msra.mxu1 %v1783_v52  ;;  %1722 = vmatprep.subr.bf16.mxu0 %v1721_v53  ;;  %v433_v10 = vld [vmem:[%s2859_s2 + $0x2c8] sm:$0xff]  ;;  %v380_v12 = vld [vmem:[%s2859_s2 + $0x120] sm:$0xff]  ;;  %v1729_v14 = vpack.c.bf16 %v384_v8, %v381_v7  ;;  %v383_v15 = vld [vmem:[%s2859_s2 + $0x138] sm:$0xff] }
  0x46   : > { %1786 = vmatprep.subr.bf16.mxu1 %v1785_v57  ;;  %v382_v16 = vld [vmem:[%s2859_s2 + $0x130] sm:$0xff]  ;;  %v342_v17 = vld [vmem:[%s2201_s27 + $0x8] sm:$0xff]  ;;  %v1793_v18 = vpack.c.bf16 %v433_v10, %v430_v9  ;;  %v387_v20 = vld [vmem:[%s2859_s2 + $0x158] sm:$0xff]  ;;  %v1731_v24 = vpack.c.bf16 %v383_v15, %v380_v12 }
  0x47   : > { %v385_v19 = vld [vmem:[%s2859_s2 + $0x148] sm:$0xff]  ;;  %v390_v21 = vld [vmem:[%s2859_s2 + $0x170] sm:$0xff]  ;;  %641 = vmatprep.mubr.f32.mxu1 %v342_v17  ;;  %v436_v22 = vld [vmem:[%s2859_s2 + $0x2e0] sm:$0xff]  ;;  %570 = vmatprep.mubr.f32.mxu0 %v342_v17 }
  0x48   : > { %1724 = vmatpush1.bf16.msra.mxu0 %v1723_v63  ;;  %v439_v23 = vld [vmem:[%s2859_s2 + $0x2f8] sm:$0xff]  ;;  %v1795_v25 = vpack.c.bf16 %v385_v19, %v382_v16  ;;  %v1733_v26 = vpack.c.bf16 %v390_v21, %v387_v20  ;;  %v386_v27 = vld [vmem:[%s2859_s2 + $0x150] sm:$0xff]  ;;  %v389_v28 = vld [vmem:[%s2859_s2 + $0x168] sm:$0xff]  ;;  %v2108_v63 = vmov 0.0  }
  0x49   : > { %1788 = vmatpush3.bf16.msra.mxu1 %v1787_v0  ;;  %1726 = vmatprep.subr.bf16.mxu0 %v1725_v1  ;;  %v388_v29 = vld [vmem:[%s2859_s2 + $0x160] sm:$0xff]  ;;  %v1797_v30 = vpack.c.bf16 %v439_v23, %v436_v22  ;;  %v391_v31 = vld [vmem:[%s2859_s2 + $0x178] sm:$0xff]  ;;  %v393_v32 = vld [vmem:[%s2859_s2 + $0x188] sm:$0xff]  ;;  %v1735_v34 = vpack.c.bf16 %v389_v28, %v386_v27 }
  0x4a   : > { %1790 = vmatprep.subr.bf16.mxu1 %v1789_v5  ;;  %v396_v33 = vld [vmem:[%s2859_s2 + $0x1a0] sm:$0xff]  ;;  %v1799_v35 = vpack.c.bf16 %v391_v31, %v388_v29  ;;  %v395_v38 = vld [vmem:[%s2859_s2 + $0x198] sm:$0xff]  ;;  %v402_v42 = vld [vmem:[%s2859_s2 + $0x1d0] sm:$0xff] }
  0x4b   : > { %v1737_v36 = vpack.c.bf16 %v396_v33, %v393_v32  ;;  %v392_v37 = vld [vmem:[%s2859_s2 + $0x180] sm:$0xff]  ;;  %v445_v40 = vld [vmem:[#allocation3 + $0x28] sm:$0xff]  ;;  %v398_v47 = vld [vmem:[%s2859_s2 + $0x1b0] sm:$0xff] }
  0x4c   : > { %1728 = vmatpush1.bf16.msra.mxu0 %v1727_v11  ;;  %v442_v39 = vld [vmem:[#allocation3 + $0x10] sm:$0xff]  ;;  %v399_v41 = vld [vmem:[%s2859_s2 + $0x1b8] sm:$0xff]  ;;  %v1739_v44 = vpack.c.bf16 %v395_v38, %v392_v37  ;;  %v401_v48 = vld [vmem:[%s2859_s2 + $0x1c8] sm:$0xff] }
  0x4d   : > { %1792 = vmatpush3.bf16.msra.mxu1 %v1791_v13  ;;  %1730 = vmatprep.subr.bf16.mxu0 %v1729_v14  ;;  %v2432_v43 = vld [vmem:[%s2201_s27] sm:$0xff]  ;;  %v1834_v45 = vpack.c.bf16 %v445_v40, %v442_v39  ;;  %v1741_v46 = vpack.c.bf16 %v402_v42, %v399_v41  ;;  %v448_v49 = vld [vmem:[#allocation3 + $0x40] sm:$0xff]  ;;  %v451_v51 = vld [vmem:[#allocation3 + $0x58] sm:$0xff]  ;;  %v1743_v54 = vpack.c.bf16 %v401_v48, %v398_v47 }
  0x4e   : > { %1794 = vmatprep.subr.bf16.mxu1 %v1793_v18  ;;  %v405_v52 = vld [vmem:[%s2859_s2 + $0x1e8] sm:$0xff]  ;;  %v408_v53 = vld [vmem:[%s2859_s2 + $0x200] sm:$0xff]  ;;  %v1837_v55 = vpack.c.bf16 %v451_v51, %v448_v49  ;;  %v407_v58 = vld [vmem:[%s2859_s2 + $0x1f8] sm:$0xff] }
  0x4f   : > { %v1745_v56 = vpack.c.bf16 %v408_v53, %v405_v52  ;;  %v404_v57 = vld [vmem:[%s2859_s2 + $0x1e0] sm:$0xff]  ;;  %v457_v60 = vld [vmem:[#allocation3 + $0x88] sm:$0xff]  ;;  %v414_v62 = vld [vmem:[%s2859_s2 + $0x230] sm:$0xff] }
  0x50   : > { %1732 = vmatpush1.bf16.msra.mxu0 %v1731_v24  ;;  %v454_v59 = vld [vmem:[#allocation3 + $0x70] sm:$0xff]  ;;  %v411_v61 = vld [vmem:[%s2859_s2 + $0x218] sm:$0xff]  ;;  %v1747_v0 = vpack.c.bf16 %v407_v58, %v404_v57  ;;  %v410_v3 = vld [vmem:[%s2859_s2 + $0x210] sm:$0xff] }
  0x51   : > { %1796 = vmatpush3.bf16.msra.mxu1 %v1795_v25  ;;  %1734 = vmatprep.subr.bf16.mxu0 %v1733_v26  ;;  %v1840_v1 = vpack.c.bf16 %v457_v60, %v454_v59  ;;  %v1749_v2 = vpack.c.bf16 %v414_v62, %v411_v61  ;;  %v413_v4 = vld [vmem:[%s2859_s2 + $0x228] sm:$0xff]  ;;  %v460_v5 = vld [vmem:[#allocation3 + $0xa0] sm:$0xff]  ;;  %v420_v8 = vld [vmem:[%s2859_s2 + $0x260] sm:$0xff] }
  0x52   : > { %1798 = vmatprep.subr.bf16.mxu1 %v1797_v30  ;;  %v463_v6 = vld [vmem:[#allocation3 + $0xb8] sm:$0xff]  ;;  %v1751_v9 = vpack.c.bf16 %v413_v4, %v410_v3  ;;  %v416_v12 = vld [vmem:[%s2859_s2 + $0x240] sm:$0xff]  ;;  %v419_v13 = vld [vmem:[%s2859_s2 + $0x258] sm:$0xff] }
  0x53   : > { %v417_v7 = vld [vmem:[%s2859_s2 + $0x248] sm:$0xff]  ;;  %v1843_v10 = vpack.c.bf16 %v463_v6, %v460_v5  ;;  %v466_v14 = vld [vmem:[#allocation3 + $0xd0] sm:$0xff]  ;;  %v469_v15 = vld [vmem:[#allocation3 + $0xe8] sm:$0xff]  ;;  %v1755_v18 = vpack.c.bf16 %v419_v13, %v416_v12 }
  0x54   : > { %1736 = vmatpush1.bf16.msra.mxu0 %v1735_v34  ;;  %v1753_v11 = vpack.c.bf16 %v420_v8, %v417_v7  ;;  %v423_v16 = vld [vmem:[%s2859_s2 + $0x278] sm:$0xff]  ;;  %v426_v17 = vld [vmem:[%s2859_s2 + $0x290] sm:$0xff]  ;;  %v1846_v19 = vpack.c.bf16 %v469_v15, %v466_v14  ;;  %v425_v22 = vld [vmem:[%s2859_s2 + $0x288] sm:$0xff] }
  0x55   : > { %1800 = vmatpush3.bf16.msra.mxu1 %v1799_v35  ;;  %1738 = vmatprep.subr.bf16.mxu0 %v1737_v36  ;;  %v1757_v20 = vpack.c.bf16 %v426_v17, %v423_v16  ;;  %v422_v21 = vld [vmem:[%s2859_s2 + $0x270] sm:$0xff]  ;;  %v475_v24 = vld [vmem:[#allocation3 + $0x118] sm:$0xff]  ;;  %v432_v26 = vld [vmem:[%s2859_s2 + $0x2c0] sm:$0xff] }
  0x56   : > { %1833 = vmatprep.subr.bf16.mxu1 %v2106_v50  ;;  %v472_v23 = vld [vmem:[#allocation3 + $0x100] sm:$0xff]  ;;  %v429_v25 = vld [vmem:[%s2859_s2 + $0x2a8] sm:$0xff]  ;;  %v1759_v27 = vpack.c.bf16 %v425_v22, %v422_v21  ;;  %v428_v30 = vld [vmem:[%s2859_s2 + $0x2a0] sm:$0xff] }
  0x57   : > { %v1849_v28 = vpack.c.bf16 %v475_v24, %v472_v23  ;;  %v1761_v29 = vpack.c.bf16 %v432_v26, %v429_v25  ;;  %v431_v31 = vld [vmem:[%s2859_s2 + $0x2b8] sm:$0xff]  ;;  %v478_v32 = vld [vmem:[#allocation3 + $0x130] sm:$0xff]  ;;  %v438_v35 = vld [vmem:[%s2859_s2 + $0x2f0] sm:$0xff] }
  0x58   : > { %642 = vmatmul.mubr.f32.vlgmr.msra.gmra.mrb[0].mxu1 %v2432_v43  ;;  %1740 = vmatpush1.bf16.msra.mxu0 %v1739_v44  ;;  %v481_v33 = vld [vmem:[#allocation3 + $0x148] sm:$0xff]  ;;  %v1763_v36 = vpack.c.bf16 %v431_v31, %v428_v30  ;;  %v434_v39 = vld [vmem:[%s2859_s2 + $0x2d0] sm:$0xff]  ;;  %v437_v40 = vld [vmem:[%s2859_s2 + $0x2e8] sm:$0xff] }
  0x59   : > { %1835 = vmatpush3.bf16.msra.mxu1 %v1834_v45  ;;  %1742 = vmatprep.subr.bf16.mxu0 %v1741_v46  ;;  %v435_v34 = vld [vmem:[%s2859_s2 + $0x2d8] sm:$0xff]  ;;  %v1852_v37 = vpack.c.bf16 %v481_v33, %v478_v32  ;;  %v484_v41 = vld [vmem:[#allocation3 + $0x160] sm:$0xff]  ;;  %v487_v42 = vld [vmem:[#allocation3 + $0x178] sm:$0xff]  ;;  %v1767_v48 = vpack.c.bf16 %v437_v40, %v434_v39 }
  0x5a   : > { %1836 = vmatprep.subr.bf16.mxu1 %v2106_v50  ;;  %1667 = vmatprep.mubr.msk.f32.mxu1 %vm2107_vm0, %v2108_v63  ;;  %v1765_v38 = vpack.c.bf16 %v438_v35, %v435_v34  ;;  %v441_v44 = vld [vmem:[#allocation3 + $0x8] sm:$0xff]  ;;  %v444_v45 = vld [vmem:[#allocation3 + $0x20] sm:$0xff]  ;;  %v1427_v46 = vld [vmem:[%s2859_s2 + $0x308] sm:$0xff]  ;;  %v1855_v49 = vpack.c.bf16 %v487_v42, %v484_v41 }
  0x5b   : > { %v1430_v47 = vld [vmem:[%s2859_s2 + $0x320] sm:$0xff]  ;;  %v1801_v51 = vpack.c.bf16 %v444_v45, %v441_v44  ;;  %v440_v52 = vld [vmem:[#allocation3] sm:$0xff]  ;;  %v443_v53 = vld [vmem:[#allocation3 + $0x18] sm:$0xff] }
  0x5c   : > { %1744 = vmatpush1.bf16.msra.mxu0 %v1743_v54  ;;  %v1426_v54 = vld [vmem:[%s2859_s2 + $0x300] sm:$0xff]  ;;  %v447_v57 = vld [vmem:[#allocation3 + $0x38] sm:$0xff]  ;;  %v1433_v59 = vld [vmem:[%s2859_s2 + $0x338] sm:$0xff]  ;;  %v1803_v62 = vpack.c.bf16 %v443_v53, %v440_v52 }
  0x5d   : > { %1838 = vmatpush3.bf16.msra.mxu1 %v1837_v55  ;;  %1746 = vmatprep.subr.bf16.mxu0 %v1745_v56  ;;  %v1857_v55 = vpack.c.bf16 %v1430_v47, %v1427_v46  ;;  %v1429_v56 = vld [vmem:[%s2859_s2 + $0x318] sm:$0xff]  ;;  %v450_v58 = vld [vmem:[#allocation3 + $0x50] sm:$0xff]  ;;  %v1436_v60 = vld [vmem:[%s2859_s2 + $0x350] sm:$0xff] }
  0x5e   : > { %1839 = vmatprep.subr.bf16.mxu1 %v2106_v50  ;;  %v2541_v61 = vld [vmem:[#allocation2] sm:$0xff]  ;;  %v449_v3 = vld [vmem:[#allocation3 + $0x48] sm:$0xff]  ;;  %v1432_v4 = vld [vmem:[%s2859_s2 + $0x330] sm:$0xff]  ;;  %v1861_v5 = vpack.c.bf16 %v1436_v60, %v1433_v59 }
  0x5f   : > { %v1435_v6 = vld [vmem:[%s2859_s2 + $0x348] sm:$0xff]  ;;  %v453_v7 = vld [vmem:[#allocation3 + $0x68] sm:$0xff]  ;;  %v456_v8 = vld [vmem:[#allocation3 + $0x80] sm:$0xff] }
  0x60   : > { %1748 = vmatpush1.bf16.msra.mxu0 %v1747_v0  ;;  %v1859_v0 = vpack.c.bf16 %v1429_v56, %v1426_v54  ;;  %v1863_v12 = vpack.c.bf16 %v1435_v6, %v1432_v4  ;;  %v1809_v13 = vpack.c.bf16 %v456_v8, %v453_v7  ;;  %v452_v14 = vld [vmem:[#allocation3 + $0x60] sm:$0xff]  ;;  %v455_v15 = vld [vmem:[#allocation3 + $0x78] sm:$0xff]  ;;  %v1441_v17 = vld [vmem:[%s2859_s2 + $0x378] sm:$0xff] }
  0x61   : > { %1841 = vmatpush3.bf16.msra.mxu1 %v1840_v1  ;;  %1750 = vmatprep.subr.bf16.mxu0 %v1749_v2  ;;  %v1805_v1 = vpack.c.bf16 %v450_v58, %v447_v57  ;;  %v446_v2 = vld [vmem:[#allocation3 + $0x30] sm:$0xff]  ;;  %v1448_v21 = vld [vmem:[%s2859_s2 + $0x3b0] sm:$0xff]  ;;  %v1811_v22 = vpack.c.bf16 %v455_v15, %v452_v14  ;;  %v461_v26 = vld [vmem:[#allocation3 + $0xa8] sm:$0xff] }
  0x62   : > { %1842 = vmatprep.subr.bf16.mxu1 %v2106_v50  ;;  %v458_v23 = vld [vmem:[#allocation3 + $0x90] sm:$0xff]  ;;  %v1447_v30 = vld [vmem:[%s2859_s2 + $0x3a8] sm:$0xff]  ;;  %v465_v31 = vld [vmem:[#allocation3 + $0xc8] sm:$0xff] }
  0x63   : > { %v468_v32 = vld [vmem:[#allocation3 + $0xe0] sm:$0xff]  ;;  %v1451_v33 = vld [vmem:[%s2859_s2 + $0x3c8] sm:$0xff]  ;;  %v1454_v34 = vld [vmem:[%s2859_s2 + $0x3e0] sm:$0xff]  ;;  %v1815_v35 = vpack.c.bf16 %v461_v26, %v458_v23 }
  0x64   : > { %1752 = vmatpush1.bf16.msra.mxu0 %v1751_v9  ;;  %v1439_v9 = vld [vmem:[%s2859_s2 + $0x368] sm:$0xff]  ;;  %v1450_v40 = vld [vmem:[%s2859_s2 + $0x3c0] sm:$0xff]  ;;  %v1873_v41 = vpack.c.bf16 %v1454_v34, %v1451_v33  ;;  %v1453_v42 = vld [vmem:[%s2859_s2 + $0x3d8] sm:$0xff] }
  0x65   : > { %1844 = vmatpush3.bf16.msra.mxu1 %v1843_v10  ;;  %1754 = vmatprep.subr.bf16.mxu0 %v1753_v11  ;;  %v1442_v10 = vld [vmem:[%s2859_s2 + $0x380] sm:$0xff]  ;;  %v1807_v11 = vpack.c.bf16 %v449_v3, %v446_v2  ;;  %v467_v39 = vld [vmem:[#allocation3 + $0xd8] sm:$0xff]  ;;  %v1457_v46 = vld [vmem:[%s2859_s2 + $0x3f8] sm:$0xff] }
  0x66   : > { %1845 = vmatprep.subr.bf16.mxu1 %v2106_v50  ;;  %v1865_v16 = vpack.c.bf16 %v1442_v10, %v1439_v9  ;;  %v471_v44 = vld [vmem:[#allocation3 + $0xf8] sm:$0xff]  ;;  %v474_v45 = vld [vmem:[#allocation3 + $0x110] sm:$0xff]  ;;  %v1460_v47 = vld [vmem:[%s2859_s2 + $0x410] sm:$0xff] }
  0x67   : > { %v470_v52 = vld [vmem:[#allocation3 + $0xf0] sm:$0xff]  ;;  %v473_v53 = vld [vmem:[#allocation3 + $0x108] sm:$0xff]  ;;  %v1456_v54 = vld [vmem:[%s2859_s2 + $0x3f0] sm:$0xff] }
  0x68   : > { %1756 = vmatpush1.bf16.msra.mxu0 %v1755_v18  ;;  %v459_v18 = vld [vmem:[#allocation3 + $0x98] sm:$0xff]  ;;  %v477_v57 = vld [vmem:[#allocation3 + $0x128] sm:$0xff]  ;;  %v480_v58 = vld [vmem:[#allocation3 + $0x140] sm:$0xff] }
  0x69   : > { %1847 = vmatpush3.bf16.msra.mxu1 %v1846_v19  ;;  %1758 = vmatprep.subr.bf16.mxu0 %v1757_v20  ;;  %v462_v19 = vld [vmem:[#allocation3 + $0xb0] sm:$0xff]  ;;  %v1445_v20 = vld [vmem:[%s2859_s2 + $0x398] sm:$0xff]  ;;  %v1459_v56 = vld [vmem:[%s2859_s2 + $0x408] sm:$0xff] }
  0x6a   : > { %1848 = vmatprep.subr.bf16.mxu1 %v2106_v50  ;;  %v1813_v25 = vpack.c.bf16 %v462_v19, %v459_v18  ;;  %v1463_v59 = vld [vmem:[%s2859_s2 + $0x428] sm:$0xff]  ;;  %v1466_v60 = vld [vmem:[%s2859_s2 + $0x440] sm:$0xff]  ;;  %v476_v2 = vld [vmem:[#allocation3 + $0x120] sm:$0xff] }
  0x6b   : > { %v479_v3 = vld [vmem:[#allocation3 + $0x138] sm:$0xff]  ;;  %v1462_v4 = vld [vmem:[%s2859_s2 + $0x420] sm:$0xff]  ;;  %v1465_v6 = vld [vmem:[%s2859_s2 + $0x438] sm:$0xff] }
  0x6c   : > { %1760 = vmatpush1.bf16.msra.mxu0 %v1759_v27  ;;  %v1444_v27 = vld [vmem:[%s2859_s2 + $0x390] sm:$0xff]  ;;  %v483_v7 = vld [vmem:[#allocation3 + $0x158] sm:$0xff]  ;;  %v486_v8 = vld [vmem:[#allocation3 + $0x170] sm:$0xff] }
  0x6d   : > { %1850 = vmatpush3.bf16.msra.mxu1 %v1849_v28  ;;  %1762 = vmatprep.subr.bf16.mxu0 %v1761_v29  ;;  %v2574_v28 = vld [vmem:[%s2206_s8 + $0x8] sm:$0xff]  ;;  %v1869_v29 = vpack.c.bf16 %v1448_v21, %v1445_v20  ;;  %v1469_v9 = vld [vmem:[%s2859_s2 + $0x458] sm:$0xff]  ;;  %v1472_v10 = vld [vmem:[%s2859_s2 + $0x470] sm:$0xff] }
  0x6e   : > { %1851 = vmatprep.subr.bf16.mxu1 %v2106_v50  ;;  %v482_v14 = vld [vmem:[#allocation3 + $0x150] sm:$0xff]  ;;  %v485_v15 = vld [vmem:[#allocation3 + $0x168] sm:$0xff]  ;;  %v1476_v18 = vld [vmem:[%s2859_s2 + $0x490] sm:$0xff] }
  0x6f   : > { %v1479_v19 = vld [vmem:[%s2859_s2 + $0x4a8] sm:$0xff]  ;;  %v1478_v21 = vld [vmem:[%s2859_s2 + $0x4a0] sm:$0xff]  ;;  %v1428_v26 = vld [vmem:[%s2859_s2 + $0x310] sm:$0xff] }
  0x70   : > { %1764 = vmatpush1.bf16.msra.mxu0 %v1763_v36  ;;  %v1871_v36 = vpack.c.bf16 %v1447_v30, %v1444_v27  ;;  %v1475_v20 = vld [vmem:[%s2859_s2 + $0x488] sm:$0xff]  ;;  %v1477_v30 = vld [vmem:[%s2859_s2 + $0x498] sm:$0xff]  ;;  %v1484_v34 = vld [vmem:[%s2859_s2 + $0x4d0] sm:$0xff] }
  0x71   : > { %1853 = vmatpush3.bf16.msra.mxu1 %v1852_v37  ;;  %1766 = vmatprep.subr.bf16.mxu0 %v1765_v38  ;;  %v1817_v37 = vpack.c.bf16 %v468_v32, %v465_v31  ;;  %v464_v38 = vld [vmem:[#allocation3 + $0xc0] sm:$0xff]  ;;  %v1431_v27 = vld [vmem:[%s2859_s2 + $0x328] sm:$0xff]  ;;  %v1482_v31 = vld [vmem:[%s2859_s2 + $0x4c0] sm:$0xff] }
  0x72   : > { %1854 = vmatprep.subr.bf16.mxu1 %v2106_v50  ;;  %v1485_v32 = vld [vmem:[%s2859_s2 + $0x4d8] sm:$0xff] }
  0x73   : > { %v1481_v33 = vld [vmem:[%s2859_s2 + $0x4b8] sm:$0xff] }
  0x74   : > { %1768 = vmatpush1.bf16.msra.mxu0 %v1767_v48  ;;  %v1819_v48 = vpack.c.bf16 %v467_v39, %v464_v38  ;;  %v1925_v38 = vpack.c.bf16 %v1485_v32, %v1482_v31  ;;  %v1434_v39 = vld [vmem:[%s2859_s2 + $0x340] sm:$0xff]  ;;  %v1515_v31 = vld [vmem:[%s2859_s2 + $0x5c8] sm:$0xff] }
  0x75   : > { %1856 = vmatpush3.bf16.msra.mxu1 %v1855_v49  ;;  %1802 = vmatprep.subr.bf16.mxu0 %v1801_v51  ;;  %v1875_v49 = vpack.c.bf16 %v1453_v42, %v1450_v40  ;;  %v1821_v51 = vpack.c.bf16 %v474_v45, %v471_v44  ;;  %v1437_v40 = vld [vmem:[%s2859_s2 + $0x358] sm:$0xff]  ;;  %v1483_v42 = vld [vmem:[%s2859_s2 + $0x4c8] sm:$0xff]  ;;  %v1488_v44 = vld [vmem:[%s2859_s2 + $0x4f0] sm:$0xff] }
  0x76   : > { %1858 = vmatprep.subr.bf16.mxu1 %v1857_v55  ;;  %v1877_v55 = vpack.c.bf16 %v1460_v47, %v1457_v46  ;;  %v1491_v45 = vld [vmem:[%s2859_s2 + $0x508] sm:$0xff]  ;;  %v1490_v47 = vld [vmem:[%s2859_s2 + $0x500] sm:$0xff] }
  0x77   : > { %571 = vmatmul.mubr.f32.vlgmr.msra.gmra.mrb[0].mxu0 %v2432_v43  ;;  %v1438_v43 = vld [vmem:[%s2859_s2 + $0x360] sm:$0xff]  ;;  %v1487_v46 = vld [vmem:[%s2859_s2 + $0x4e8] sm:$0xff] }
  0x78   : > { %1668 = vmatmul.mubr.f32.vlgmr.msra.gmra.mrb[2].mxu1 %v2541_v61  ;;  %1804 = vmatpush1.bf16.msra.mxu0 %v1803_v62  ;;  %v1867_v24 = vpack.c.bf16 %v1441_v17, %v1438_v43  ;;  %v1823_v62 = vpack.c.bf16 %v473_v53, %v470_v52  ;;  %v1468_v43 = vld [vmem:[%s2859_s2 + $0x450] sm:$0xff]  ;;  %v1471_v17 = vld [vmem:[%s2859_s2 + $0x468] sm:$0xff]  ;;  %v1929_v52 = vpack.c.bf16 %v1491_v45, %v1488_v44  ;;  %v1521_v44 = vld [vmem:[%s2859_s2 + $0x5f8] sm:$0xff] }
  0x79   : > { %1860 = vmatpush1.bf16.msra.mxu1 %v1859_v0  ;;  %1806 = vmatprep.subr.bf16.mxu0 %v1805_v1  ;;  %v1879_v0 = vpack.c.bf16 %v1459_v56, %v1456_v54  ;;  %v1825_v1 = vpack.c.bf16 %v480_v58, %v477_v57  ;;  %v1887_v23 = vpack.c.bf16 %v1471_v17, %v1468_v43  ;;  %v1440_v53 = vld [vmem:[%s2859_s2 + $0x370] sm:$0xff]  ;;  %v1443_v54 = vld [vmem:[%s2859_s2 + $0x388] sm:$0xff]  ;;  %v1494_v56 = vld [vmem:[%s2859_s2 + $0x520] sm:$0xff] }
  0x7a   : > { %1862 = vmatprep.subr.bf16.mxu1 %v1861_v5  ;;  %711 = vmatprep.mubr.f32.mxu0 %v2108_v63  ;;  %v1881_v5 = vpack.c.bf16 %v1466_v60, %v1463_v59  ;;  %v1497_v57 = vld [vmem:[%s2859_s2 + $0x538] sm:$0xff]  ;;  %v1496_v59 = vld [vmem:[%s2859_s2 + $0x530] sm:$0xff]  ;;  %v1931_v60 = vpack.c.bf16 %v1443_v54, %v1440_v53  ;;  %v1506_v17 = vld [vmem:[%s2859_s2 + $0x580] sm:$0xff] }
  0x7b   : > { %1049 = vmatprep.mubr.f32.mxu1 %v2574_v28  ;;  %v1493_v58 = vld [vmem:[%s2859_s2 + $0x518] sm:$0xff]  ;;  %v1511_v32 = vld [vmem:[%s2859_s2 + $0x5a8] sm:$0xff]  ;;  %v1516_v54 = vld [vmem:[%s2859_s2 + $0x5d0] sm:$0xff] }
  0x7c   : > { %1808 = vmatpush1.bf16.msra.mxu0 %v1807_v11  ;;  %v1827_v11 = vpack.c.bf16 %v479_v3, %v476_v2  ;;  %v1446_v2 = vld [vmem:[%s2859_s2 + $0x3a0] sm:$0xff]  ;;  %v1449_v3 = vld [vmem:[%s2859_s2 + $0x3b8] sm:$0xff] }
  0x7d   : > { %1864 = vmatpush1.bf16.msra.mxu1 %v1863_v12  ;;  %1810 = vmatprep.subr.bf16.mxu0 %v1809_v13  ;;  %v1883_v12 = vpack.c.bf16 %v1465_v6, %v1462_v4  ;;  %v1829_v13 = vpack.c.bf16 %v486_v8, %v483_v7  ;;  %v1901_v4 = vpack.c.bf16 %v1496_v59, %v1493_v58  ;;  %v1500_v6 = vld [vmem:[%s2859_s2 + $0x550] sm:$0xff]  ;;  %v1503_v7 = vld [vmem:[%s2859_s2 + $0x568] sm:$0xff]  ;;  %v1517_v45 = vld [vmem:[%s2859_s2 + $0x5d8] sm:$0xff] }
  0x7e   : > { %1866 = vmatprep.subr.bf16.mxu1 %v1865_v16  ;;  %v1885_v16 = vpack.c.bf16 %v1472_v10, %v1469_v9  ;;  %v1499_v8 = vld [vmem:[%s2859_s2 + $0x548] sm:$0xff]  ;;  %v1502_v9 = vld [vmem:[%s2859_s2 + $0x560] sm:$0xff]  ;;  %v1935_v10 = vpack.c.bf16 %v1449_v3, %v1446_v2 }
  0x7f   : > { %v1905_v43 = vpack.c.bf16 %v1502_v9, %v1499_v8  ;;  %v919_v59 = vld [vmem:[#allocation3 + $0x190] sm:$0xff]  ;;  %v924_v2 = vld [vmem:[#allocation3 + $0x1b8] sm:$0xff] }
  0x80   : > { %1812 = vmatpush1.bf16.msra.mxu0 %v1811_v22  ;;  %v1831_v22 = vpack.c.bf16 %v485_v15, %v482_v14  ;;  %v1452_v14 = vld [vmem:[%s2859_s2 + $0x3d0] sm:$0xff]  ;;  %v1455_v15 = vld [vmem:[%s2859_s2 + $0x3e8] sm:$0xff]  ;;  %v927_v3 = vld [vmem:[#allocation3 + $0x1d0] sm:$0xff] }
  0x81   : > { %1868 = vmatpush1.bf16.msra.mxu1 %v1867_v24  ;;  %1814 = vmatprep.subr.bf16.mxu0 %v1813_v25  ;;  %v1474_v24 = vld [vmem:[%s2859_s2 + $0x480] sm:$0xff]  ;;  %v1921_v25 = vpack.c.bf16 %v1479_v19, %v1476_v18  ;;  %v1509_v18 = vld [vmem:[%s2859_s2 + $0x598] sm:$0xff]  ;;  %v928_v8 = vld [vmem:[#allocation3 + $0x1d8] sm:$0xff]  ;;  %v1957_v9 = vpack.c.bf16 %v927_v3, %v924_v2 }
  0x82   : > { %1870 = vmatprep.subr.bf16.mxu1 %v1869_v29  ;;  %v1889_v29 = vpack.c.bf16 %v1478_v21, %v1475_v20  ;;  %v1505_v19 = vld [vmem:[%s2859_s2 + $0x578] sm:$0xff]  ;;  %v1508_v20 = vld [vmem:[%s2859_s2 + $0x590] sm:$0xff]  ;;  %v1939_v21 = vpack.c.bf16 %v1455_v15, %v1452_v14  ;;  %v959_v2 = vld [vmem:[#allocation3 + $0x2d0] sm:$0xff] }
  0x83   : > { %v962_v3 = vld [vmem:[#allocation3 + $0x2e8] sm:$0xff] }
  0x84   : > { %1816 = vmatpush1.bf16.msra.mxu0 %v1815_v35  ;;  %v1923_v35 = vpack.c.bf16 %v1431_v27, %v1428_v26  ;;  %v1461_v26 = vld [vmem:[%s2859_s2 + $0x418] sm:$0xff]  ;;  %v1909_v27 = vpack.c.bf16 %v1508_v20, %v1505_v19  ;;  %v932_v19 = vld [vmem:[#allocation3 + $0x1f8] sm:$0xff] }
  0x85   : > { %1872 = vmatpush1.bf16.msra.mxu1 %v1871_v36  ;;  %1818 = vmatprep.subr.bf16.mxu0 %v1817_v37  ;;  %v1891_v36 = vpack.c.bf16 %v1477_v30, %v1474_v24  ;;  %v1480_v37 = vld [vmem:[%s2859_s2 + $0x4b0] sm:$0xff]  ;;  %v1941_v24 = vpack.c.bf16 %v1509_v18, %v1506_v17  ;;  %v936_v20 = vld [vmem:[#allocation3 + $0x218] sm:$0xff] }
  0x86   : > { %1874 = vmatprep.subr.bf16.mxu1 %v1873_v41  ;;  %v1893_v41 = vpack.c.bf16 %v1484_v34, %v1481_v33  ;;  %v1512_v30 = vld [vmem:[%s2859_s2 + $0x5b0] sm:$0xff]  ;;  %v1514_v33 = vld [vmem:[%s2859_s2 + $0x5c0] sm:$0xff] }
  0x87   : > { %v929_v18 = vld [vmem:[#allocation3 + $0x1e0] sm:$0xff] }
  0x88   : > { %1820 = vmatpush1.bf16.msra.mxu0 %v1819_v48  ;;  %v1927_v48 = vpack.c.bf16 %v1437_v40, %v1434_v39  ;;  %v1467_v39 = vld [vmem:[%s2859_s2 + $0x448] sm:$0xff]  ;;  %v1913_v40 = vpack.c.bf16 %v1514_v33, %v1511_v32 }
  0x89   : > { %1876 = vmatpush1.bf16.msra.mxu1 %v1875_v49  ;;  %1822 = vmatprep.subr.bf16.mxu0 %v1821_v51  ;;  %v1895_v49 = vpack.c.bf16 %v1483_v42, %v1480_v37  ;;  %v1486_v51 = vld [vmem:[%s2859_s2 + $0x4e0] sm:$0xff]  ;;  %v1945_v37 = vpack.c.bf16 %v1515_v31, %v1512_v30  ;;  %v942_v30 = vld [vmem:[#allocation3 + $0x248] sm:$0xff]  ;;  %v945_v31 = vld [vmem:[#allocation3 + $0x260] sm:$0xff] }
  0x8a   : > { %1878 = vmatprep.subr.bf16.mxu1 %v1877_v55  ;;  %v1897_v55 = vpack.c.bf16 %v1490_v47, %v1487_v46  ;;  %v1518_v42 = vld [vmem:[%s2859_s2 + $0x5e0] sm:$0xff]  ;;  %v1520_v46 = vld [vmem:[%s2859_s2 + $0x5f0] sm:$0xff] }
  0x8b   : > { %v1917_v53 = vpack.c.bf16 %v1520_v46, %v1517_v45  ;;  %v947_v46 = vld [vmem:[#allocation3 + $0x270] sm:$0xff] }
  0x8c   : > { %1824 = vmatpush1.bf16.msra.mxu0 %v1823_v62 }
  0x8d   : > { %1880 = vmatpush1.bf16.msra.mxu1 %v1879_v0  ;;  %1826 = vmatprep.subr.bf16.mxu0 %v1825_v1  ;;  %v1492_v0 = vld [vmem:[%s2859_s2 + $0x510] sm:$0xff]  ;;  %v1933_v1 = vpack.c.bf16 %v1497_v57, %v1494_v56 }
  0x8e   : > { %1882 = vmatprep.subr.bf16.mxu1 %v1881_v5  ;;  %v1495_v5 = vld [vmem:[%s2859_s2 + $0x528] sm:$0xff]  ;;  %v921_v56 = vld [vmem:[#allocation3 + $0x1a0] sm:$0xff] }
  0x90   : > { %1828 = vmatpush1.bf16.msra.mxu0 %v1827_v11  ;;  %v1903_v11 = vpack.c.bf16 %v1495_v5, %v1492_v0  ;;  %v917_v0 = vld [vmem:[#allocation3 + $0x180] sm:$0xff]  ;;  %v815_v5 = vld [vmem:[%s2206_s8] sm:$0xff] }
  0x91   : > { %1884 = vmatpush1.bf16.msra.mxu1 %v1883_v12  ;;  %1830 = vmatprep.subr.bf16.mxu0 %v1829_v13  ;;  %v1498_v12 = vld [vmem:[%s2859_s2 + $0x540] sm:$0xff]  ;;  %v1937_v13 = vpack.c.bf16 %v1503_v7, %v1500_v6  ;;  %v925_v7 = vld [vmem:[#allocation3 + $0x1c0] sm:$0xff] }
  0x92   : > { %1886 = vmatprep.subr.bf16.mxu1 %v1885_v16  ;;  %v1501_v16 = vld [vmem:[%s2859_s2 + $0x558] sm:$0xff]  ;;  %v1989_v14 = vpack.c.bf16 %v928_v8, %v925_v7 }
  0x94   : > { %1832 = vmatpush1.bf16.msra.mxu0 %v1831_v22  ;;  %v1907_v22 = vpack.c.bf16 %v1501_v16, %v1498_v12  ;;  %v930_v12 = vld [vmem:[#allocation3 + $0x1e8] sm:$0xff] }
  0x95   : > { %1888 = vmatpush1.bf16.msra.mxu1 %v1887_v23  ;;  %1922 = vmatprep.subr.bf16.mxu0 %v1921_v25  ;;  %v1504_v23 = vld [vmem:[%s2859_s2 + $0x570] sm:$0xff]  ;;  %v1458_v25 = vld [vmem:[%s2859_s2 + $0x400] sm:$0xff]  ;;  %v934_v16 = vld [vmem:[#allocation3 + $0x208] sm:$0xff] }
  0x96   : > { %1890 = vmatprep.subr.bf16.mxu1 %v1889_v29  ;;  %v1507_v29 = vld [vmem:[%s2859_s2 + $0x588] sm:$0xff]  ;;  %v1943_v34 = vpack.c.bf16 %v1461_v26, %v1458_v25 }
  0x97   : > { %712 = vmatmul.mubr.f32.vlgmr.msra.gmra.mrb[0].mxu0 %v2541_v61  ;;  %v940_v25 = vld [vmem:[#allocation3 + $0x238] sm:$0xff] }
  0x98   : > { %1924 = vmatpush3.bf16.msra.mxu0 %v1923_v35  ;;  %1120 = vmatprep.mubr.f32.mxu0 %v2574_v28  ;;  %v1489_v28 = vld [vmem:[%s2859_s2 + $0x4f8] sm:$0xff]  ;;  %v1911_v35 = vpack.c.bf16 %v1507_v29, %v1504_v23  ;;  %v1963_v23 = vpack.c.bf16 %v932_v19, %v929_v18 }
  0x99   : > { %1892 = vmatpush1.bf16.msra.mxu1 %v1891_v36  ;;  %1926 = vmatprep.subr.bf16.mxu0 %v1925_v38  ;;  %v1899_v62 = vpack.c.bf16 %v1489_v28, %v1486_v51  ;;  %v1510_v36 = vld [vmem:[%s2859_s2 + $0x5a0] sm:$0xff]  ;;  %v1464_v38 = vld [vmem:[%s2859_s2 + $0x430] sm:$0xff]  ;;  %v918_v28 = vld [vmem:[#allocation3 + $0x188] sm:$0xff] }
  0x9a   : > { %1894 = vmatprep.subr.bf16.mxu1 %v1893_v41  ;;  %v1513_v41 = vld [vmem:[%s2859_s2 + $0x5b8] sm:$0xff]  ;;  %v1947_v47 = vpack.c.bf16 %v1467_v39, %v1464_v38  ;;  %v1470_v51 = vld [vmem:[%s2859_s2 + $0x460] sm:$0xff]  ;;  %v948_v38 = vld [vmem:[#allocation3 + $0x278] sm:$0xff] }
  0x9b   : > { %v938_v29 = vld [vmem:[#allocation3 + $0x228] sm:$0xff]  ;;  %v951_v39 = vld [vmem:[#allocation3 + $0x290] sm:$0xff] }
  0x9c   : > { %1928 = vmatpush3.bf16.msra.mxu0 %v1927_v48  ;;  %v1915_v48 = vpack.c.bf16 %v1513_v41, %v1510_v36  ;;  %v941_v36 = vld [vmem:[#allocation3 + $0x240] sm:$0xff]  ;;  %v1973_v45 = vpack.c.bf16 %v951_v39, %v948_v38 }
  0x9d   : > { %1896 = vmatpush1.bf16.msra.mxu1 %v1895_v49  ;;  %1930 = vmatprep.subr.bf16.mxu0 %v1929_v52  ;;  %v1949_v49 = vpack.c.bf16 %v1521_v44, %v1518_v42  ;;  %v1473_v52 = vld [vmem:[%s2859_s2 + $0x478] sm:$0xff]  ;;  %v949_v42 = vld [vmem:[#allocation3 + $0x280] sm:$0xff]  ;;  %v952_v44 = vld [vmem:[#allocation3 + $0x298] sm:$0xff] }
  0x9e   : > { %1898 = vmatprep.subr.bf16.mxu1 %v1897_v55  ;;  %v1519_v55 = vld [vmem:[%s2859_s2 + $0x5e8] sm:$0xff]  ;;  %v1951_v57 = vpack.c.bf16 %v1473_v52, %v1470_v51  ;;  %v2001_v51 = vpack.c.bf16 %v952_v44, %v949_v42  ;;  %v1522_v44 = vld [vmem:[%s2861_s4 + $0x3] sm:$0x7] }
  0x9f   : > { %v1919_v58 = vpack.c.bf16 %v1519_v55, %v1516_v54  ;;  %v958_v54 = vld [vmem:[#allocation3 + $0x2c8] sm:$0xff] }
  0xa0   : > { %1932 = vmatpush3.bf16.msra.mxu0 %v1931_v60  ;;  %v922_v60 = vld [vmem:[#allocation3 + $0x1a8] sm:$0xff] }
  0xa1   : > { %1900 = vmatpush1.bf16.msra.mxu1 %v1899_v62  ;;  %1934 = vmatprep.subr.bf16.mxu0 %v1933_v1  ;;  %v1953_v62 = vpack.c.bf16 %v921_v56, %v918_v28  ;;  %v920_v1 = vld [vmem:[#allocation3 + $0x198] sm:$0xff]  ;;  %v953_v28 = vld [vmem:[#allocation3 + $0x2a0] sm:$0xff] }
  0xa2   : > { %1902 = vmatprep.subr.bf16.mxu1 %v1901_v4  ;;  %v1986_v4 = vpack.c.bf16 %v922_v60, %v919_v59  ;;  %v1955_v6 = vpack.c.bf16 %v920_v1, %v917_v0  ;;  %v956_v56 = vld [vmem:[#allocation3 + $0x2b8] sm:$0xff] }
  0xa3   : > { %v1979_v60 = vpack.c.bf16 %v956_v56, %v953_v28  ;;  %v964_v0 = vld [vmem:[#allocation3 + $0x2f8] sm:$0xff]  ;;  %v1526_v56 = vld [vmem:[%s2862_s5 + $0x1] ss:$0 sm:$0xff] }
  0xa4   : > { %1936 = vmatpush3.bf16.msra.mxu0 %v1935_v10  ;;  %v923_v10 = vld [vmem:[#allocation3 + $0x1b0] sm:$0xff] }
  0xa5   : > { %1904 = vmatpush1.bf16.msra.mxu1 %v1903_v11  ;;  %1938 = vmatprep.subr.bf16.mxu0 %v1937_v13  ;;  %v926_v11 = vld [vmem:[#allocation3 + $0x1c8] sm:$0xff]  ;;  %v933_v13 = vld [vmem:[#allocation3 + $0x200] sm:$0xff] }
  0xa6   : > { %1906 = vmatprep.subr.bf16.mxu1 %v1905_v43  ;;  %v1959_v15 = vpack.c.bf16 %v926_v11, %v923_v10  ;;  %v931_v43 = vld [vmem:[#allocation3 + $0x1f0] sm:$0xff]  ;;  %v1961_v17 = vpack.c.bf16 %v933_v13, %v930_v12  ;;  %v491_v12 = vlaneseq }
  0xa8   : > { %1940 = vmatpush3.bf16.msra.mxu0 %v1939_v21  ;;  %v939_v21 = vld [vmem:[#allocation3 + $0x230] sm:$0xff]  ;;  %v492_v13 = vshrl.u32 %v491_v12, 7 }
  0xa9   : > { %1908 = vmatpush1.bf16.msra.mxu1 %v1907_v22  ;;  %1942 = vmatprep.subr.bf16.mxu0 %v1941_v24  ;;  %v1992_v22 = vpack.c.bf16 %v934_v16, %v931_v43  ;;  %v937_v24 = vld [vmem:[#allocation3 + $0x220] sm:$0xff]  ;;  %v1965_v26 = vpack.c.bf16 %v939_v21, %v936_v20 }
  0xaa   : > { %1910 = vmatprep.subr.bf16.mxu1 %v1909_v27  ;;  %v935_v27 = vld [vmem:[#allocation3 + $0x210] sm:$0xff]  ;;  %v1995_v32 = vpack.c.bf16 %v940_v25, %v937_v24  ;;  %v501_v25 = vsub.s32 2, %v492_v13 }
  0xab   : > { %v1967_v33 = vpack.c.bf16 %v938_v29, %v935_v27 }
  0xac   : > { %1944 = vmatpush3.bf16.msra.mxu0 %v1943_v34  ;;  %v946_v34 = vld [vmem:[#allocation3 + $0x268] sm:$0xff] }
  0xad   : > { %1912 = vmatpush1.bf16.msra.mxu1 %v1911_v35  ;;  %1946 = vmatprep.subr.bf16.mxu0 %v1945_v37  ;;  %v1969_v35 = vpack.c.bf16 %v945_v31, %v942_v30  ;;  %v944_v37 = vld [vmem:[#allocation3 + $0x258] sm:$0xff] }
  0xae   : > { %1914 = vmatprep.subr.bf16.mxu1 %v1913_v40  ;;  %v1971_v41 = vpack.c.bf16 %v944_v37, %v941_v36 }
  0xb0   : > { %1948 = vmatpush3.bf16.msra.mxu0 %v1947_v47  ;;  %v950_v47 = vld [vmem:[#allocation3 + $0x288] sm:$0xff] }
  0xb1   : > { %1916 = vmatpush1.bf16.msra.mxu1 %v1915_v48  ;;  %1950 = vmatprep.subr.bf16.mxu0 %v1949_v49  ;;  %v954_v48 = vld [vmem:[#allocation3 + $0x2a8] sm:$0xff]  ;;  %v957_v49 = vld [vmem:[#allocation3 + $0x2c0] sm:$0xff]  ;;  %v1975_v52 = vpack.c.bf16 %v950_v47, %v947_v46 }
  0xb2   : > { %1918 = vmatprep.subr.bf16.mxu1 %v1917_v53  ;;  %v955_v53 = vld [vmem:[#allocation3 + $0x2b0] sm:$0xff]  ;;  %v1977_v55 = vpack.c.bf16 %v957_v49, %v954_v48 }
  0xb3   : > { %v2004_v59 = vpack.c.bf16 %v958_v54, %v955_v53 }
  0xb4   : > { %1952 = vmatpush3.bf16.msra.mxu0 %v1951_v57  ;;  %v960_v57 = vld [vmem:[#allocation3 + $0x2d8] sm:$0xff] }
  0xb5   : > { %1920 = vmatpush1.bf16.msra.mxu1 %v1919_v58  ;;  %1985 = vmatprep.subr.bf16.mxu0 %v2106_v50  ;;  %v963_v58 = vld [vmem:[#allocation3 + $0x2f0] sm:$0xff] }
  0xb6   : > { %1954 = vmatprep.subr.bf16.mxu1 %v1953_v62  ;;  %v961_v62 = vld [vmem:[#allocation3 + $0x2e0] sm:$0xff]  ;;  %v1981_v1 = vpack.c.bf16 %v963_v58, %v960_v57  ;;  %v981_v57 = vrot.slane %v1522_v44, %v501_v25 }
  0xb7   : > { %1121 = vmatmul.mubr.f32.vlgmr.msra.gmra.mrb[2].mxu0 %v815_v5 }
  0xb8   : > { %1050 = vmatmul.mubr.f32.vlgmr.msra.gmra.mrb[4].mxu1 %v815_v5  ;;  %1987 = vmatpush3.bf16.msra.mxu0 %v1986_v4  ;;  %v2007_v4 = vpack.c.bf16 %v964_v0, %v961_v62  ;;  %v1983_v5 = vpack.c.bf16 %v962_v3, %v959_v2 }
  0xb9   : > { %1956 = vmatpush1.bf16.msra.mxu1 %v1955_v6  ;;  %1988 = vmatprep.subr.bf16.mxu0 %v2106_v50  ;;  %v2834_v6 = vld [vmem:[#allocation2 + $0x8] sm:$0xff] }
  0xba   : > { %1958 = vmatprep.subr.bf16.mxu1 %v1957_v9  ;;  %1190 = vmatprep.mubr.f32.mxu1 %v2108_v63 }
  0xbb   : > { %1702 = vmatprep.mubr.msk.f32.mxu0 %vm2107_vm0, %v2108_v63  ;;  %v943_v63 = vld [vmem:[#allocation3 + $0x250] sm:$0xff] }
  0xbc   : > { %1990 = vmatpush3.bf16.msra.mxu0 %v1989_v14  ;;  %v1998_v40 = vpack.c.bf16 %v946_v34, %v943_v63  ;;  %v493_v14 = vsub.s32 0, %v492_v13 }
  0xbd   : > { %1960 = vmatpush1.bf16.msra.mxu1 %v1959_v15  ;;  %1991 = vmatprep.subr.bf16.mxu0 %v2106_v50 }
  0xbe   : > { %1962 = vmatprep.subr.bf16.mxu1 %v1961_v17  ;;  %v497_v17 = vsub.s32 1, %v492_v13 }
  0xc0   : > { %1993 = vmatpush3.bf16.msra.mxu0 %v1992_v22  ;;  %v977_v46 = vrot.slane %v1522_v44, %v497_v17 }
  0xc1   : > { %1964 = vmatpush1.bf16.msra.mxu1 %v1963_v23  ;;  %1994 = vmatprep.subr.bf16.mxu0 %v2106_v50 }
  0xc2   : > { %1966 = vmatprep.subr.bf16.mxu1 %v1965_v26  ;;  %v1425_v26 = vld [vmem:[%s2862_s5] ss:$0 sm:$0xff] }
  0xc4   : > { %1996 = vmatpush3.bf16.msra.mxu0 %v1995_v32 }
  0xc5   : > { %1968 = vmatpush1.bf16.msra.mxu1 %v1967_v33  ;;  %1997 = vmatprep.subr.bf16.mxu0 %v2106_v50 }
  0xc6   : > { %1970 = vmatprep.subr.bf16.mxu1 %v1969_v35 }
  0xc8   : > { %1999 = vmatpush3.bf16.msra.mxu0 %v1998_v40 }
  0xc9   : > { %1972 = vmatpush1.bf16.msra.mxu1 %v1971_v41  ;;  %2000 = vmatprep.subr.bf16.mxu0 %v2106_v50 }
  0xca   : > { %1974 = vmatprep.subr.bf16.mxu1 %v1973_v45  ;;  %v973_v45 = vrot.slane %v1522_v44, %v493_v14 }
  0xcc   : > { %2002 = vmatpush3.bf16.msra.mxu0 %v2001_v51 }
  0xcd   : > { %1976 = vmatpush1.bf16.msra.mxu1 %v1975_v52  ;;  %2003 = vmatprep.subr.bf16.mxu0 %v2106_v50 }
  0xce   : > { %1978 = vmatprep.subr.bf16.mxu1 %v1977_v55 }
  0xd0   : > { %2005 = vmatpush3.bf16.msra.mxu0 %v2004_v59 }
  0xd1   : > { %1980 = vmatpush1.bf16.msra.mxu1 %v1979_v60  ;;  %2006 = vmatprep.subr.bf16.mxu0 %v2106_v50  ;;  %v488_v50 = vld [vmem:[%s2861_s4] sm:$0x7] }
  0xd2   : > { %1982 = vmatprep.subr.bf16.mxu1 %v1981_v1  ;;  %v494_v15 = vrot.slane %v488_v50, %v493_v14  ;;  %v498_v20 = vrot.slane %v488_v50, %v497_v17  ;;  %v502_v27 = vrot.slane %v488_v50, %v501_v25 }
  0xd4   : > { %2008 = vmatpush3.bf16.msra.mxu0 %v2007_v4 }
  0xd5   : > { %1984 = vmatpush1.bf16.msra.mxu1 %v1983_v5 }
  0xd7   : > { %1703 = vmatmul.mubr.f32.vlgmr.msra.gmra.mrb[4].mxu0 %v2834_v6 }
  0xd8   : > { %1191 = vmatmul.mubr.f32.vlgmr.msra.gmra.mrb[4].mxu1 %v2834_v6 }
 0x12b   : > { %v1563_v7 = vpop.f32.mrb[0].mxu1 }
 0x12c   : > { %v1564_v8 = vpop.f32.mrb[1].mxu1 }
 0x12d   : > { %v1565_v9 = vadd.f32 %v1564_v8, %v1563_v7 }
 0x12f   : > { %v644_v32 = vadd.f32 %v1565_v9, %v502_v27 }
 0x14b   : > { %v784_v10 = vpop.f32.mrb[2].mxu1 }
 0x14c   : > { %v1669_v11 = vpop.f32.mrb[3].mxu1  ;;  %v808_v30 = vadd.f32 %v1425_v26, %v784_v10 }
 0x16a   : > { %v713_v43 = vpop.f32.mrb[0].mxu0 }
 0x16b   : > { %v2009_v16 = vadd.f32 %v713_v43, %v494_v15  ;;  %v715_v18 = vpop.f32.mrb[1].mxu0 }
 0x16c   : > { %v2010_v21 = vadd.f32 %v715_v18, %v498_v20 }
 0x16d   : > { %v1423_v19 = vmul.f32 -1.442695, %v2009_v16 }
 0x16e   : > { %v1424_v22 = vmul.f32 -1.442695, %v2010_v21 }
 0x16f   : > { %2042 = vpow2.f32 %v1423_v19 }
 0x170   : > { %2044 = vpow2.f32 %v1424_v22 }
 0x179   : > { %v2043_v23 = vpop.eup %2042 }
 0x17a   : > { %v792_v24 = vadd.f32 1.0, %v2043_v23  ;;  %v2045_v29 = vpop.eup %2044 }
 0x17b   : > { %v799_v34 = vadd.f32 1.0, %v2045_v29 }
 0x17c   : > { %2046 = vrcp.f32 %v792_v24 }
 0x186   : > { %v2047_v31 = vpop.eup %2046 }
 0x187   : > { %v809_v33 = vmul.f32 %v2047_v31, %v808_v30 }
 0x189   : > { %v810_v63 = vadd.f32 %v809_v33, %v644_v32 }
 0x18a   : > { %v1615_v35 = vpop.f32.mrb[2].mxu0 }
 0x18b   : > { %2048 = vtanh.f32 %v810_v63  ;;  %v1616_v36 = vpop.f32.mrb[3].mxu0 }
 0x18c   : > { %v1617_v37 = vadd.f32 %v1616_v36, %v1615_v35  ;;  %2050 = vrcp.f32 %v799_v34 }
 0x18e   : > { %v1123_v62 = vadd.f32 %v1617_v37, %v981_v57 }
 0x195   : > { %v2049_v38 = vpop.eup %2048 }
 0x196   : > { %v812_v39 = vsub.f32 %v2541_v61, %v2049_v38  ;;  %v2051_v40 = vpop.eup %2050 }
 0x198   : > { %v813_v41 = vmul.f32 %v2051_v40, %v812_v39 }
 0x19a   : > { %v814_v42 = vadd.f32 %v2049_v38, %v813_v41 }
 0x19c   : > { %1294 = vst [vmem:[#allocation2] sm:$0xff] %v814_v42  ;;  %1296 = vst [vmem:[%s2211_s11] sm:$0xff] %v814_v42 }
 0x1aa   : > { %v1263_v47 = vpop.f32.mrb[4].mxu0 }
 0x1ab   : > { %v1192_v48 = vpop.f32.mrb[4].mxu1  ;;  %v1704_v49 = vpop.f32.mrb[5].mxu0  ;;  %v1287_v58 = vadd.f32 %v1526_v56, %v1263_v47 }
 0x1ac   : > { %v2011_v51 = vadd.f32 %v1192_v48, %v973_v45  ;;  %v1194_v52 = vpop.f32.mrb[5].mxu1 }
 0x1ad   : > { %v2012_v53 = vadd.f32 %v1194_v52, %v977_v46 }
 0x1ae   : > { %v1524_v54 = vmul.f32 -1.442695, %v2011_v51 }
 0x1af   : > { %v1525_v61 = vmul.f32 -1.442695, %v2012_v53 }
 0x1b0   : > { %2052 = vpow2.f32 %v1524_v54 }
 0x1b1   : > { %2054 = vpow2.f32 %v1525_v61 }
 0x1ba   : > { %v2053_v55 = vpop.eup %2052 }
 0x1bb   : > { %v1271_v28 = vadd.f32 1.0, %v2053_v55  ;;  %v2055_v59 = vpop.eup %2054 }
 0x1bc   : > { %v1278_v1 = vadd.f32 1.0, %v2055_v59 }
 0x1bd   : > { %2056 = vrcp.f32 %v1271_v28 }
 0x1c7   : > { %v2057_v60 = vpop.eup %2056 }
 0x1c8   : > { %v1288_v0 = vmul.f32 %v2057_v60, %v1287_v58 }
 0x1ca   : > { %v1289_v2 = vadd.f32 %v1288_v0, %v1123_v62 }
 0x1cc   : > { %2058 = vtanh.f32 %v1289_v2 }
 0x1cd   : > { %2060 = vrcp.f32 %v1278_v1 }
 0x1d6   : > { %v2059_v3 = vpop.eup %2058 }
 0x1d7   : > { %v1291_v4 = vsub.f32 %v2834_v6, %v2059_v3  ;;  %v2061_v5 = vpop.eup %2060 }
 0x1d9   : > { %v1292_v7 = vmul.f32 %v2061_v5, %v1291_v4 }
 0x1db   : > { %v1293_v8 = vadd.f32 %v2059_v3, %v1292_v7 }
 0x1dd   : > { %1295 = vst [vmem:[#allocation2 + $0x8] sm:$0xff] %v1293_v8  ;;  %1297 = vst [vmem:[%s2216_s15] sm:$0xff] %v1293_v8 }
 0x1de PF: > { %s19_s24 = sadd.s32 1, %s2100_s24  }
 0x1df   : > { %p16_p6 = scmp.ge.s32.totalorder %s19_s24, 10  }
 0x1e1   :  { %18 = sbr.rel (!%p16_p6) target bundleno = 1 (0x1), region = 103 }
 0x1e8   :  { %1334 = vsyncpa [#allocation4], 1 }
 0x1e9   :  { %1336 = vsyncpa [#allocation4 + $0x1], 1 }

// kernel: birnn_forward.5
= control target key start
LH: loop header
LB: loop body
LE: loop exit
PB: predicated region body
PF: predicated region fallthrough
CT: control target
= control target key end

     0   :  { %s2430_s27 = smov 0   ;;  %s3507_s0 = inlined_call_operand.vmem [shape: f32[8,8,256], index: 0, kind: input, shape index: {}, may-alias: {0,1}]   ;;  %s3508_s1 = inlined_call_operand.vmem [shape: f32[8,8,256], index: 1, kind: input, shape index: {}, may-alias: {0,1}]   ;;  %s3509_s2 = inlined_call_operand.vmem [shape: f32[2,256,384], index: 2, kind: input, shape index: {}]   ;;  %s3510_s3 = inlined_call_operand.vmem [shape: f32[2,128,384], index: 3, kind: input, shape index: {}]   ;;  %s3511_s4 = inlined_call_operand.vmem [shape: f32[2,1,384], index: 4, kind: input, shape index: {}]   ;;  %s3512_s5 = inlined_call_operand.vmem [shape: f32[2,1,128], index: 5, kind: input, shape index: {}]   ;;  %s3513_s6 = inlined_call_operand.vmem [shape: f32[2,128,128], index: 6, kind: input, shape index: {}]   ;;  %s3514_s7 = inlined_call_operand.vmem [shape: f32[1,128], index: 7, kind: input, shape index: {}]   ;;  %s3515_s8 = inlined_call_operand.vmem [shape: f32[8,128], index: 8, kind: output, shape index: {}]  }
   0x1 LB: > { %s2436_s28 = sadd.s32 4294967295, %s2375_s27   ;;  %p1514_p0 = scmp.ge.s32.totalorder %s2375_s27, 1  ;;  %s2375_s27 = sphi %s2430_s27, %s18_s27  }
   0x2   : > { %p271_p1 = scmp.lt.s32.totalorder %s2375_s27, 9 }
   0x4   : > { %p272_p2 = pnand %p1514_p0, %p271_p1 }
   0x5   : > { %p306_p3 = scmp.lt.s32.totalorder (!%p272_p2), %s2436_s28, 7  ;;  %s311_s29 = ssub.s32 (!%p272_p2), 7, %s2436_s28 }
   0x6   : > { %275 = sbr.rel (%p272_p2) target bundleno = 700 (0x2bc), region = 52  ;;  %p312_p4 = scmp.lt.s32.totalorder (!%p272_p2), %s311_s29, 7 }
   0x7   : > { %p1519_p5 = scmp.ne.s32.totalorder (!%p272_p2), %s2436_s28, 0 }
   0xd   : > { %s307_s30 = scalar_select %p306_p3, %s2436_s28, 7 }
   0xe   : > { %s3517_s29 = smov (!%p312_p4, %s311_s29), 7  ;;  %321 = sbr.rel (%p1519_p5) target bundleno = 21 (0x15), region = 56 }
   0xf   : > { %s1693_s9 = sshll.u32 %s307_s30, 4  ;;  %s1694_s13 = sshll.u32 %s3517_s29, 4  ;;  %v2377_v0 = vmov (!%p1519_p5), 0.0  }
  0x10   : > { %s2446_s12 = scalar_lea.vmem %s3507_s0, %s1693_s9  ;;  %s2451_s16 = scalar_lea.vmem %s3508_s1, %s1694_s13  ;;  %322 = vst [vmem:[#allocation2] sm:$0xff] (!%p1519_p5), %v2377_v0  ;;  %323 = vst [vmem:[#allocation2 + $0x8] sm:$0xff] (!%p1519_p5), %v2377_v0 }
  0x15 PF: > { %v328_v1 = vld [vmem:[%s3509_s2 + $0x8] sm:$0xff]  ;;  %v331_v2 = vld [vmem:[%s3509_s2 + $0x20] sm:$0xff]  ;;  %v377_v3 = vld [vmem:[%s3509_s2 + $0x190] sm:$0xff]  ;;  %vm2379_vm0 = vmmov 0  }
  0x16   : > { %v1973_v4 = vpack.c.bf16 %v331_v2, %v328_v1  ;;  %v380_v5 = vld [vmem:[%s3509_s2 + $0x1a8] sm:$0xff]  ;;  %v327_v6 = vld [vmem:[%s3509_s2] sm:$0xff]  ;;  %v330_v7 = vld [vmem:[%s3509_s2 + $0x18] sm:$0xff] }
  0x17   : > { %v2037_v8 = vpack.c.bf16 %v380_v5, %v377_v3  ;;  %v1975_v9 = vpack.c.bf16 %v330_v7, %v327_v6  ;;  %v329_v10 = vld [vmem:[%s3509_s2 + $0x10] sm:$0xff]  ;;  %v332_v11 = vld [vmem:[%s3509_s2 + $0x28] sm:$0xff]  ;;  %v334_v12 = vld [vmem:[%s3509_s2 + $0x38] sm:$0xff] }
  0x18   : > { %1974 = vmatprep.subr.bf16.mxu0 %v1973_v4  ;;  %v2039_v13 = vpack.c.bf16 %v332_v11, %v329_v10  ;;  %v337_v14 = vld [vmem:[%s3509_s2 + $0x50] sm:$0xff]  ;;  %v383_v15 = vld [vmem:[%s3509_s2 + $0x1c0] sm:$0xff]  ;;  %v386_v16 = vld [vmem:[%s3509_s2 + $0x1d8] sm:$0xff] }
  0x19   : > { %2038 = vmatprep.subr.bf16.mxu1 %v2037_v8  ;;  %1976 = vmatpush1.bf16.msra.mxu0 %v1975_v9  ;;  %v1977_v17 = vpack.c.bf16 %v337_v14, %v334_v12  ;;  %v2041_v18 = vpack.c.bf16 %v386_v16, %v383_v15  ;;  %v333_v19 = vld [vmem:[%s3509_s2 + $0x30] sm:$0xff]  ;;  %v336_v20 = vld [vmem:[%s3509_s2 + $0x48] sm:$0xff]  ;;  %v335_v21 = vld [vmem:[%s3509_s2 + $0x40] sm:$0xff] }
  0x1a   : > { %2040 = vmatpush3.bf16.msra.mxu1 %v2039_v13  ;;  %v1979_v22 = vpack.c.bf16 %v336_v20, %v333_v19  ;;  %v338_v23 = vld [vmem:[%s3509_s2 + $0x58] sm:$0xff]  ;;  %v340_v24 = vld [vmem:[%s3509_s2 + $0x68] sm:$0xff]  ;;  %v343_v25 = vld [vmem:[%s3509_s2 + $0x80] sm:$0xff] }
  0x1b   : > { %1978 = vmatprep.subr.bf16.mxu0 %v1977_v17  ;;  %2042 = vmatprep.subr.bf16.mxu1 %v2041_v18  ;;  %v2043_v26 = vpack.c.bf16 %v338_v23, %v335_v21  ;;  %v1981_v27 = vpack.c.bf16 %v343_v25, %v340_v24  ;;  %v389_v28 = vld [vmem:[%s3509_s2 + $0x1f0] sm:$0xff]  ;;  %v392_v29 = vld [vmem:[%s3509_s2 + $0x208] sm:$0xff]  ;;  %v339_v30 = vld [vmem:[%s3509_s2 + $0x60] sm:$0xff] }
  0x1c   : > { %v2045_v31 = vpack.c.bf16 %v392_v29, %v389_v28  ;;  %v342_v32 = vld [vmem:[%s3509_s2 + $0x78] sm:$0xff]  ;;  %v341_v33 = vld [vmem:[%s3509_s2 + $0x70] sm:$0xff]  ;;  %v344_v34 = vld [vmem:[%s3509_s2 + $0x88] sm:$0xff] }
  0x1d   : > { %1980 = vmatpush1.bf16.msra.mxu0 %v1979_v22  ;;  %v1983_v35 = vpack.c.bf16 %v342_v32, %v339_v30  ;;  %v346_v36 = vld [vmem:[%s3509_s2 + $0x98] sm:$0xff]  ;;  %v349_v37 = vld [vmem:[%s3509_s2 + $0xb0] sm:$0xff]  ;;  %v395_v38 = vld [vmem:[%s3509_s2 + $0x220] sm:$0xff]  ;;  %v2047_v39 = vpack.c.bf16 %v344_v34, %v341_v33 }
  0x1e   : > { %2044 = vmatpush3.bf16.msra.mxu1 %v2043_v26  ;;  %1982 = vmatprep.subr.bf16.mxu0 %v1981_v27  ;;  %v1985_v40 = vpack.c.bf16 %v349_v37, %v346_v36  ;;  %v398_v41 = vld [vmem:[%s3509_s2 + $0x238] sm:$0xff]  ;;  %v345_v42 = vld [vmem:[%s3509_s2 + $0x90] sm:$0xff]  ;;  %v348_v43 = vld [vmem:[%s3509_s2 + $0xa8] sm:$0xff] }
  0x1f   : > { %2046 = vmatprep.subr.bf16.mxu1 %v2045_v31  ;;  %v2049_v44 = vpack.c.bf16 %v398_v41, %v395_v38  ;;  %v347_v45 = vld [vmem:[%s3509_s2 + $0xa0] sm:$0xff]  ;;  %v350_v46 = vld [vmem:[%s3509_s2 + $0xb8] sm:$0xff]  ;;  %v352_v47 = vld [vmem:[%s3509_s2 + $0xc8] sm:$0xff]  ;;  %v1987_v51 = vpack.c.bf16 %v348_v43, %v345_v42 }
  0x20   : > { %v355_v48 = vld [vmem:[%s3509_s2 + $0xe0] sm:$0xff]  ;;  %v401_v49 = vld [vmem:[%s3509_s2 + $0x250] sm:$0xff]  ;;  %v404_v50 = vld [vmem:[%s3509_s2 + $0x268] sm:$0xff]  ;;  %v2051_v52 = vpack.c.bf16 %v350_v46, %v347_v45 }
  0x21   : > { %1984 = vmatpush1.bf16.msra.mxu0 %v1983_v35  ;;  %v1989_v53 = vpack.c.bf16 %v355_v48, %v352_v47  ;;  %v351_v54 = vld [vmem:[%s3509_s2 + $0xc0] sm:$0xff]  ;;  %v354_v55 = vld [vmem:[%s3509_s2 + $0xd8] sm:$0xff]  ;;  %v353_v56 = vld [vmem:[%s3509_s2 + $0xd0] sm:$0xff]  ;;  %v2053_v57 = vpack.c.bf16 %v404_v50, %v401_v49  ;;  %v2378_v50 = vmov 0.0|0.0  }
  0x22   : > { %2048 = vmatpush3.bf16.msra.mxu1 %v2047_v39  ;;  %1986 = vmatprep.subr.bf16.mxu0 %v1985_v40  ;;  %v356_v58 = vld [vmem:[%s3509_s2 + $0xe8] sm:$0xff]  ;;  %v358_v59 = vld [vmem:[%s3509_s2 + $0xf8] sm:$0xff]  ;;  %v361_v60 = vld [vmem:[%s3509_s2 + $0x110] sm:$0xff]  ;;  %v1991_v63 = vpack.c.bf16 %v354_v55, %v351_v54 }
  0x23   : > { %2050 = vmatprep.subr.bf16.mxu1 %v2049_v44  ;;  %v407_v61 = vld [vmem:[%s3509_s2 + $0x280] sm:$0xff]  ;;  %v410_v62 = vld [vmem:[%s3509_s2 + $0x298] sm:$0xff]  ;;  %v2055_v0 = vpack.c.bf16 %v356_v58, %v353_v56  ;;  %v1993_v1 = vpack.c.bf16 %v361_v60, %v358_v59  ;;  %v357_v2 = vld [vmem:[%s3509_s2 + $0xf0] sm:$0xff] }
  0x24   : > { %v360_v3 = vld [vmem:[%s3509_s2 + $0x108] sm:$0xff]  ;;  %v359_v4 = vld [vmem:[%s3509_s2 + $0x100] sm:$0xff]  ;;  %v2057_v5 = vpack.c.bf16 %v410_v62, %v407_v61  ;;  %v362_v6 = vld [vmem:[%s3509_s2 + $0x118] sm:$0xff] }
  0x25   : > { %1988 = vmatpush1.bf16.msra.mxu0 %v1987_v51  ;;  %v364_v7 = vld [vmem:[%s3509_s2 + $0x128] sm:$0xff]  ;;  %v367_v8 = vld [vmem:[%s3509_s2 + $0x140] sm:$0xff]  ;;  %v413_v9 = vld [vmem:[%s3509_s2 + $0x2b0] sm:$0xff]  ;;  %v1995_v11 = vpack.c.bf16 %v360_v3, %v357_v2  ;;  %v2059_v13 = vpack.c.bf16 %v362_v6, %v359_v4 }
  0x26   : > { %2052 = vmatpush3.bf16.msra.mxu1 %v2051_v52  ;;  %1990 = vmatprep.subr.bf16.mxu0 %v1989_v53  ;;  %v416_v10 = vld [vmem:[%s3509_s2 + $0x2c8] sm:$0xff]  ;;  %v363_v12 = vld [vmem:[%s3509_s2 + $0x120] sm:$0xff]  ;;  %v1997_v14 = vpack.c.bf16 %v367_v8, %v364_v7  ;;  %v366_v15 = vld [vmem:[%s3509_s2 + $0x138] sm:$0xff] }
  0x27   : > { %2054 = vmatprep.subr.bf16.mxu1 %v2053_v57  ;;  %v365_v16 = vld [vmem:[%s3509_s2 + $0x130] sm:$0xff]  ;;  %v325_v17 = vld [vmem:[%s2446_s12 + $0x8] sm:$0xff]  ;;  %v2061_v18 = vpack.c.bf16 %v416_v10, %v413_v9  ;;  %v370_v20 = vld [vmem:[%s3509_s2 + $0x158] sm:$0xff]  ;;  %v1999_v24 = vpack.c.bf16 %v366_v15, %v363_v12 }
  0x28   : > { %v368_v19 = vld [vmem:[%s3509_s2 + $0x148] sm:$0xff]  ;;  %v373_v21 = vld [vmem:[%s3509_s2 + $0x170] sm:$0xff]  ;;  %624 = vmatprep.mubr.f32.mxu1 %v325_v17  ;;  %v419_v22 = vld [vmem:[%s3509_s2 + $0x2e0] sm:$0xff]  ;;  %553 = vmatprep.mubr.f32.mxu0 %v325_v17 }
  0x29   : > { %1992 = vmatpush1.bf16.msra.mxu0 %v1991_v63  ;;  %v422_v23 = vld [vmem:[%s3509_s2 + $0x2f8] sm:$0xff]  ;;  %v2063_v25 = vpack.c.bf16 %v368_v19, %v365_v16  ;;  %v2001_v26 = vpack.c.bf16 %v373_v21, %v370_v20  ;;  %v369_v27 = vld [vmem:[%s3509_s2 + $0x150] sm:$0xff]  ;;  %v372_v28 = vld [vmem:[%s3509_s2 + $0x168] sm:$0xff]  ;;  %v2380_v63 = vmov 0.0  }
  0x2a   : > { %2056 = vmatpush3.bf16.msra.mxu1 %v2055_v0  ;;  %1994 = vmatprep.subr.bf16.mxu0 %v1993_v1  ;;  %v371_v29 = vld [vmem:[%s3509_s2 + $0x160] sm:$0xff]  ;;  %v2065_v30 = vpack.c.bf16 %v422_v23, %v419_v22  ;;  %v374_v31 = vld [vmem:[%s3509_s2 + $0x178] sm:$0xff]  ;;  %v376_v32 = vld [vmem:[%s3509_s2 + $0x188] sm:$0xff]  ;;  %v2003_v34 = vpack.c.bf16 %v372_v28, %v369_v27 }
  0x2b   : > { %2058 = vmatprep.subr.bf16.mxu1 %v2057_v5  ;;  %v379_v33 = vld [vmem:[%s3509_s2 + $0x1a0] sm:$0xff]  ;;  %v2067_v35 = vpack.c.bf16 %v374_v31, %v371_v29  ;;  %v378_v38 = vld [vmem:[%s3509_s2 + $0x198] sm:$0xff]  ;;  %v425_v39 = vld [vmem:[%s3510_s3 + $0x10] sm:$0xff] }
  0x2c   : > { %v2005_v36 = vpack.c.bf16 %v379_v33, %v376_v32  ;;  %v375_v37 = vld [vmem:[%s3509_s2 + $0x180] sm:$0xff]  ;;  %v428_v40 = vld [vmem:[%s3510_s3 + $0x28] sm:$0xff]  ;;  %v382_v41 = vld [vmem:[%s3509_s2 + $0x1b8] sm:$0xff] }
  0x2d   : > { %1996 = vmatpush1.bf16.msra.mxu0 %v1995_v11  ;;  %v385_v42 = vld [vmem:[%s3509_s2 + $0x1d0] sm:$0xff]  ;;  %v2674_v43 = vld [vmem:[%s2446_s12] sm:$0xff]  ;;  %v2007_v44 = vpack.c.bf16 %v378_v38, %v375_v37  ;;  %v2102_v45 = vpack.c.bf16 %v428_v40, %v425_v39  ;;  %v384_v48 = vld [vmem:[%s3509_s2 + $0x1c8] sm:$0xff] }
  0x2e   : > { %2060 = vmatpush3.bf16.msra.mxu1 %v2059_v13  ;;  %1998 = vmatprep.subr.bf16.mxu0 %v1997_v14  ;;  %v2009_v46 = vpack.c.bf16 %v385_v42, %v382_v41  ;;  %v381_v47 = vld [vmem:[%s3509_s2 + $0x1b0] sm:$0xff]  ;;  %v431_v49 = vld [vmem:[%s3510_s3 + $0x40] sm:$0xff]  ;;  %v434_v51 = vld [vmem:[%s3510_s3 + $0x58] sm:$0xff] }
  0x2f   : > { %2062 = vmatprep.subr.bf16.mxu1 %v2061_v18  ;;  %v388_v52 = vld [vmem:[%s3509_s2 + $0x1e8] sm:$0xff]  ;;  %v391_v53 = vld [vmem:[%s3509_s2 + $0x200] sm:$0xff]  ;;  %v2011_v54 = vpack.c.bf16 %v384_v48, %v381_v47  ;;  %v2105_v55 = vpack.c.bf16 %v434_v51, %v431_v49  ;;  %v390_v58 = vld [vmem:[%s3509_s2 + $0x1f8] sm:$0xff] }
  0x30   : > { %v2013_v56 = vpack.c.bf16 %v391_v53, %v388_v52  ;;  %v387_v57 = vld [vmem:[%s3509_s2 + $0x1e0] sm:$0xff]  ;;  %v437_v59 = vld [vmem:[%s3510_s3 + $0x70] sm:$0xff]  ;;  %v440_v60 = vld [vmem:[%s3510_s3 + $0x88] sm:$0xff] }
  0x31   : > { %2000 = vmatpush1.bf16.msra.mxu0 %v1999_v24  ;;  %v394_v61 = vld [vmem:[%s3509_s2 + $0x218] sm:$0xff]  ;;  %v397_v62 = vld [vmem:[%s3509_s2 + $0x230] sm:$0xff]  ;;  %v2015_v0 = vpack.c.bf16 %v390_v58, %v387_v57  ;;  %v2108_v1 = vpack.c.bf16 %v440_v60, %v437_v59  ;;  %v396_v4 = vld [vmem:[%s3509_s2 + $0x228] sm:$0xff] }
  0x32   : > { %2064 = vmatpush3.bf16.msra.mxu1 %v2063_v25  ;;  %2002 = vmatprep.subr.bf16.mxu0 %v2001_v26  ;;  %v2017_v2 = vpack.c.bf16 %v397_v62, %v394_v61  ;;  %v393_v3 = vld [vmem:[%s3509_s2 + $0x210] sm:$0xff]  ;;  %v443_v5 = vld [vmem:[%s3510_s3 + $0xa0] sm:$0xff]  ;;  %v446_v6 = vld [vmem:[%s3510_s3 + $0xb8] sm:$0xff] }
  0x33   : > { %2066 = vmatprep.subr.bf16.mxu1 %v2065_v30  ;;  %v400_v7 = vld [vmem:[%s3509_s2 + $0x248] sm:$0xff]  ;;  %v403_v8 = vld [vmem:[%s3509_s2 + $0x260] sm:$0xff]  ;;  %v2019_v9 = vpack.c.bf16 %v396_v4, %v393_v3  ;;  %v2111_v10 = vpack.c.bf16 %v446_v6, %v443_v5  ;;  %v402_v13 = vld [vmem:[%s3509_s2 + $0x258] sm:$0xff] }
  0x34   : > { %v2021_v11 = vpack.c.bf16 %v403_v8, %v400_v7  ;;  %v399_v12 = vld [vmem:[%s3509_s2 + $0x240] sm:$0xff]  ;;  %v449_v14 = vld [vmem:[%s3510_s3 + $0xd0] sm:$0xff]  ;;  %v452_v15 = vld [vmem:[%s3510_s3 + $0xe8] sm:$0xff] }
  0x35   : > { %2004 = vmatpush1.bf16.msra.mxu0 %v2003_v34  ;;  %v406_v16 = vld [vmem:[%s3509_s2 + $0x278] sm:$0xff]  ;;  %v409_v17 = vld [vmem:[%s3509_s2 + $0x290] sm:$0xff]  ;;  %v2023_v18 = vpack.c.bf16 %v402_v13, %v399_v12  ;;  %v2114_v19 = vpack.c.bf16 %v452_v15, %v449_v14  ;;  %v408_v22 = vld [vmem:[%s3509_s2 + $0x288] sm:$0xff] }
  0x36   : > { %2068 = vmatpush3.bf16.msra.mxu1 %v2067_v35  ;;  %2006 = vmatprep.subr.bf16.mxu0 %v2005_v36  ;;  %v2025_v20 = vpack.c.bf16 %v409_v17, %v406_v16  ;;  %v405_v21 = vld [vmem:[%s3509_s2 + $0x270] sm:$0xff]  ;;  %v455_v23 = vld [vmem:[%s3510_s3 + $0x100] sm:$0xff]  ;;  %v458_v24 = vld [vmem:[%s3510_s3 + $0x118] sm:$0xff] }
  0x37   : > { %2101 = vmatprep.subr.bf16.mxu1 %v2378_v50  ;;  %v412_v25 = vld [vmem:[%s3509_s2 + $0x2a8] sm:$0xff]  ;;  %v415_v26 = vld [vmem:[%s3509_s2 + $0x2c0] sm:$0xff]  ;;  %v2027_v27 = vpack.c.bf16 %v408_v22, %v405_v21  ;;  %v2117_v28 = vpack.c.bf16 %v458_v24, %v455_v23  ;;  %v414_v31 = vld [vmem:[%s3509_s2 + $0x2b8] sm:$0xff] }
  0x38   : > { %v2029_v29 = vpack.c.bf16 %v415_v26, %v412_v25  ;;  %v411_v30 = vld [vmem:[%s3509_s2 + $0x2a0] sm:$0xff]  ;;  %v461_v32 = vld [vmem:[%s3510_s3 + $0x130] sm:$0xff]  ;;  %v464_v33 = vld [vmem:[%s3510_s3 + $0x148] sm:$0xff] }
  0x39   : > { %625 = vmatmul.mubr.f32.vlgmr.msra.gmra.mrb[0].mxu1 %v2674_v43  ;;  %2008 = vmatpush1.bf16.msra.mxu0 %v2007_v44  ;;  %v418_v34 = vld [vmem:[%s3509_s2 + $0x2d8] sm:$0xff]  ;;  %v421_v35 = vld [vmem:[%s3509_s2 + $0x2f0] sm:$0xff]  ;;  %v2031_v36 = vpack.c.bf16 %v414_v31, %v411_v30  ;;  %v2120_v37 = vpack.c.bf16 %v464_v33, %v461_v32  ;;  %v420_v40 = vld [vmem:[%s3509_s2 + $0x2e8] sm:$0xff] }
  0x3a   : > { %2103 = vmatpush3.bf16.msra.mxu1 %v2102_v45  ;;  %2010 = vmatprep.subr.bf16.mxu0 %v2009_v46  ;;  %v2033_v38 = vpack.c.bf16 %v421_v35, %v418_v34  ;;  %v417_v39 = vld [vmem:[%s3509_s2 + $0x2d0] sm:$0xff]  ;;  %v467_v41 = vld [vmem:[%s3510_s3 + $0x160] sm:$0xff]  ;;  %v470_v42 = vld [vmem:[%s3510_s3 + $0x178] sm:$0xff] }
  0x3b   : > { %2104 = vmatprep.subr.bf16.mxu1 %v2378_v50  ;;  %1865 = vmatprep.mubr.msk.f32.mxu1 %vm2379_vm0, %v2380_v63  ;;  %v424_v44 = vld [vmem:[%s3510_s3 + $0x8] sm:$0xff]  ;;  %v427_v45 = vld [vmem:[%s3510_s3 + $0x20] sm:$0xff]  ;;  %v2035_v48 = vpack.c.bf16 %v420_v40, %v417_v39  ;;  %v2123_v49 = vpack.c.bf16 %v470_v42, %v467_v41  ;;  %v426_v53 = vld [vmem:[%s3510_s3 + $0x18] sm:$0xff] }
  0x3c   : > { %v1524_v46 = vld [vmem:[%s3509_s2 + $0x308] sm:$0xff]  ;;  %v1527_v47 = vld [vmem:[%s3509_s2 + $0x320] sm:$0xff]  ;;  %v2069_v51 = vpack.c.bf16 %v427_v45, %v424_v44  ;;  %v430_v57 = vld [vmem:[%s3510_s3 + $0x38] sm:$0xff] }
  0x3d   : > { %2012 = vmatpush1.bf16.msra.mxu0 %v2011_v54  ;;  %v423_v52 = vld [vmem:[%s3510_s3] sm:$0xff]  ;;  %v433_v58 = vld [vmem:[%s3510_s3 + $0x50] sm:$0xff]  ;;  %v1530_v59 = vld [vmem:[%s3509_s2 + $0x338] sm:$0xff] }
  0x3e   : > { %2106 = vmatpush3.bf16.msra.mxu1 %v2105_v55  ;;  %2014 = vmatprep.subr.bf16.mxu0 %v2013_v56  ;;  %v1523_v54 = vld [vmem:[%s3509_s2 + $0x300] sm:$0xff]  ;;  %v2125_v55 = vpack.c.bf16 %v1527_v47, %v1524_v46  ;;  %v1526_v56 = vld [vmem:[%s3509_s2 + $0x318] sm:$0xff]  ;;  %v1533_v60 = vld [vmem:[%s3509_s2 + $0x350] sm:$0xff]  ;;  %v2071_v62 = vpack.c.bf16 %v426_v53, %v423_v52 }
  0x3f   : > { %2107 = vmatprep.subr.bf16.mxu1 %v2378_v50  ;;  %v2843_v61 = vld [vmem:[#allocation2] sm:$0xff]  ;;  %v432_v3 = vld [vmem:[%s3510_s3 + $0x48] sm:$0xff]  ;;  %v1529_v4 = vld [vmem:[%s3509_s2 + $0x330] sm:$0xff]  ;;  %v2129_v5 = vpack.c.bf16 %v1533_v60, %v1530_v59 }
  0x40   : > { %v1532_v6 = vld [vmem:[%s3509_s2 + $0x348] sm:$0xff]  ;;  %v439_v8 = vld [vmem:[%s3510_s3 + $0x80] sm:$0xff]  ;;  %v438_v14 = vld [vmem:[%s3510_s3 + $0x78] sm:$0xff] }
  0x41   : > { %2016 = vmatpush1.bf16.msra.mxu0 %v2015_v0  ;;  %v2127_v0 = vpack.c.bf16 %v1526_v56, %v1523_v54  ;;  %v436_v7 = vld [vmem:[%s3510_s3 + $0x68] sm:$0xff]  ;;  %v2131_v12 = vpack.c.bf16 %v1532_v6, %v1529_v4  ;;  %v1535_v15 = vld [vmem:[%s3509_s2 + $0x360] sm:$0xff]  ;;  %v1538_v17 = vld [vmem:[%s3509_s2 + $0x378] sm:$0xff] }
  0x42   : > { %2109 = vmatpush3.bf16.msra.mxu1 %v2108_v1  ;;  %2018 = vmatprep.subr.bf16.mxu0 %v2017_v2  ;;  %v2073_v1 = vpack.c.bf16 %v433_v58, %v430_v57  ;;  %v429_v2 = vld [vmem:[%s3510_s3 + $0x30] sm:$0xff]  ;;  %v2077_v13 = vpack.c.bf16 %v439_v8, %v436_v7  ;;  %v2135_v24 = vpack.c.bf16 %v1538_v17, %v1535_v15  ;;  %v444_v26 = vld [vmem:[%s3510_s3 + $0xa8] sm:$0xff]  ;;  %v451_v32 = vld [vmem:[%s3510_s3 + $0xe0] sm:$0xff] }
  0x43   : > { %2110 = vmatprep.subr.bf16.mxu1 %v2378_v50  ;;  %v1545_v21 = vld [vmem:[%s3509_s2 + $0x3b0] sm:$0xff]  ;;  %v1544_v30 = vld [vmem:[%s3509_s2 + $0x3a8] sm:$0xff]  ;;  %v1551_v34 = vld [vmem:[%s3509_s2 + $0x3e0] sm:$0xff] }
  0x44   : > { %v441_v23 = vld [vmem:[%s3510_s3 + $0x90] sm:$0xff]  ;;  %v448_v31 = vld [vmem:[%s3510_s3 + $0xc8] sm:$0xff]  ;;  %v450_v39 = vld [vmem:[%s3510_s3 + $0xd8] sm:$0xff] }
  0x45   : > { %2020 = vmatpush1.bf16.msra.mxu0 %v2019_v9  ;;  %v1536_v9 = vld [vmem:[%s3509_s2 + $0x368] sm:$0xff]  ;;  %v2083_v35 = vpack.c.bf16 %v444_v26, %v441_v23  ;;  %v1547_v40 = vld [vmem:[%s3509_s2 + $0x3c0] sm:$0xff]  ;;  %v1550_v42 = vld [vmem:[%s3509_s2 + $0x3d8] sm:$0xff] }
  0x46   : > { %2112 = vmatpush3.bf16.msra.mxu1 %v2111_v10  ;;  %2022 = vmatprep.subr.bf16.mxu0 %v2021_v11  ;;  %v1539_v10 = vld [vmem:[%s3509_s2 + $0x380] sm:$0xff]  ;;  %v2075_v11 = vpack.c.bf16 %v432_v3, %v429_v2  ;;  %v1548_v33 = vld [vmem:[%s3509_s2 + $0x3c8] sm:$0xff]  ;;  %v454_v44 = vld [vmem:[%s3510_s3 + $0xf8] sm:$0xff] }
  0x47   : > { %2113 = vmatprep.subr.bf16.mxu1 %v2378_v50  ;;  %v2133_v16 = vpack.c.bf16 %v1539_v10, %v1536_v9  ;;  %v2141_v41 = vpack.c.bf16 %v1551_v34, %v1548_v33  ;;  %v457_v45 = vld [vmem:[%s3510_s3 + $0x110] sm:$0xff]  ;;  %v1554_v46 = vld [vmem:[%s3509_s2 + $0x3f8] sm:$0xff]  ;;  %v456_v53 = vld [vmem:[%s3510_s3 + $0x108] sm:$0xff] }
  0x48   : > { %v1557_v47 = vld [vmem:[%s3509_s2 + $0x410] sm:$0xff]  ;;  %v1556_v56 = vld [vmem:[%s3509_s2 + $0x408] sm:$0xff]  ;;  %v463_v58 = vld [vmem:[%s3510_s3 + $0x140] sm:$0xff] }
  0x49   : > { %2024 = vmatpush1.bf16.msra.mxu0 %v2023_v18  ;;  %v442_v18 = vld [vmem:[%s3510_s3 + $0x98] sm:$0xff]  ;;  %v453_v52 = vld [vmem:[%s3510_s3 + $0xf0] sm:$0xff]  ;;  %v460_v57 = vld [vmem:[%s3510_s3 + $0x128] sm:$0xff] }
  0x4a   : > { %2115 = vmatpush3.bf16.msra.mxu1 %v2114_v19  ;;  %2026 = vmatprep.subr.bf16.mxu0 %v2025_v20  ;;  %v445_v19 = vld [vmem:[%s3510_s3 + $0xb0] sm:$0xff]  ;;  %v1542_v20 = vld [vmem:[%s3509_s2 + $0x398] sm:$0xff]  ;;  %v1560_v59 = vld [vmem:[%s3509_s2 + $0x428] sm:$0xff] }
  0x4b   : > { %2116 = vmatprep.subr.bf16.mxu1 %v2378_v50  ;;  %v2081_v25 = vpack.c.bf16 %v445_v19, %v442_v18  ;;  %v1553_v54 = vld [vmem:[%s3509_s2 + $0x3f0] sm:$0xff]  ;;  %v1563_v60 = vld [vmem:[%s3509_s2 + $0x440] sm:$0xff]  ;;  %v462_v3 = vld [vmem:[%s3510_s3 + $0x138] sm:$0xff] }
  0x4c   : > { %v459_v2 = vld [vmem:[%s3510_s3 + $0x120] sm:$0xff]  ;;  %v1562_v6 = vld [vmem:[%s3509_s2 + $0x438] sm:$0xff]  ;;  %v469_v8 = vld [vmem:[%s3510_s3 + $0x170] sm:$0xff] }
  0x4d   : > { %2028 = vmatpush1.bf16.msra.mxu0 %v2027_v27  ;;  %v1541_v27 = vld [vmem:[%s3509_s2 + $0x390] sm:$0xff]  ;;  %v1559_v4 = vld [vmem:[%s3509_s2 + $0x420] sm:$0xff]  ;;  %v466_v7 = vld [vmem:[%s3510_s3 + $0x158] sm:$0xff] }
  0x4e   : > { %2118 = vmatpush3.bf16.msra.mxu1 %v2117_v28  ;;  %2030 = vmatprep.subr.bf16.mxu0 %v2029_v29  ;;  %v2906_v28 = vld [vmem:[%s2451_s16 + $0x8] sm:$0xff]  ;;  %v2137_v29 = vpack.c.bf16 %v1545_v21, %v1542_v20  ;;  %v1566_v9 = vld [vmem:[%s3509_s2 + $0x458] sm:$0xff]  ;;  %v1569_v10 = vld [vmem:[%s3509_s2 + $0x470] sm:$0xff] }
  0x4f   : > { %2119 = vmatprep.subr.bf16.mxu1 %v2378_v50  ;;  %v1565_v15 = vld [vmem:[%s3509_s2 + $0x450] sm:$0xff]  ;;  %v1568_v17 = vld [vmem:[%s3509_s2 + $0x468] sm:$0xff]  ;;  %v1575_v21 = vld [vmem:[%s3509_s2 + $0x4a0] sm:$0xff] }
  0x50   : > { %v1573_v18 = vld [vmem:[%s3509_s2 + $0x490] sm:$0xff]  ;;  %v1576_v19 = vld [vmem:[%s3509_s2 + $0x4a8] sm:$0xff]  ;;  %v2155_v23 = vpack.c.bf16 %v1568_v17, %v1565_v15  ;;  %v1578_v33 = vld [vmem:[%s3509_s2 + $0x4b8] sm:$0xff] }
  0x51   : > { %2032 = vmatpush1.bf16.msra.mxu0 %v2031_v36  ;;  %v2139_v36 = vpack.c.bf16 %v1544_v30, %v1541_v27  ;;  %v1572_v20 = vld [vmem:[%s3509_s2 + $0x488] sm:$0xff]  ;;  %v1525_v26 = vld [vmem:[%s3509_s2 + $0x310] sm:$0xff]  ;;  %v1574_v30 = vld [vmem:[%s3509_s2 + $0x498] sm:$0xff] }
  0x52   : > { %2121 = vmatpush3.bf16.msra.mxu1 %v2120_v37  ;;  %2034 = vmatprep.subr.bf16.mxu0 %v2033_v38  ;;  %v2085_v37 = vpack.c.bf16 %v451_v32, %v448_v31  ;;  %v447_v38 = vld [vmem:[%s3510_s3 + $0xc0] sm:$0xff]  ;;  %v1528_v27 = vld [vmem:[%s3509_s2 + $0x328] sm:$0xff]  ;;  %v1582_v32 = vld [vmem:[%s3509_s2 + $0x4d8] sm:$0xff] }
  0x53   : > { %2122 = vmatprep.subr.bf16.mxu1 %v2378_v50  ;;  %v1579_v31 = vld [vmem:[%s3509_s2 + $0x4c0] sm:$0xff]  ;;  %v1581_v34 = vld [vmem:[%s3509_s2 + $0x4d0] sm:$0xff] }
  0x54   : > { %v1603_v17 = vld [vmem:[%s3509_s2 + $0x580] sm:$0xff] }
  0x55   : > { %2036 = vmatpush1.bf16.msra.mxu0 %v2035_v48  ;;  %v2087_v48 = vpack.c.bf16 %v450_v39, %v447_v38  ;;  %v2193_v38 = vpack.c.bf16 %v1582_v32, %v1579_v31  ;;  %v1531_v39 = vld [vmem:[%s3509_s2 + $0x340] sm:$0xff]  ;;  %v1612_v31 = vld [vmem:[%s3509_s2 + $0x5c8] sm:$0xff] }
  0x56   : > { %2124 = vmatpush3.bf16.msra.mxu1 %v2123_v49  ;;  %2070 = vmatprep.subr.bf16.mxu0 %v2069_v51  ;;  %v2143_v49 = vpack.c.bf16 %v1550_v42, %v1547_v40  ;;  %v2089_v51 = vpack.c.bf16 %v457_v45, %v454_v44  ;;  %v1534_v40 = vld [vmem:[%s3509_s2 + $0x358] sm:$0xff]  ;;  %v1580_v42 = vld [vmem:[%s3509_s2 + $0x4c8] sm:$0xff]  ;;  %v1585_v44 = vld [vmem:[%s3509_s2 + $0x4f0] sm:$0xff] }
  0x57   : > { %2126 = vmatprep.subr.bf16.mxu1 %v2125_v55  ;;  %v2145_v55 = vpack.c.bf16 %v1557_v47, %v1554_v46  ;;  %v1588_v45 = vld [vmem:[%s3509_s2 + $0x508] sm:$0xff]  ;;  %v1587_v47 = vld [vmem:[%s3509_s2 + $0x500] sm:$0xff] }
  0x58   : > { %554 = vmatmul.mubr.f32.vlgmr.msra.gmra.mrb[0].mxu0 %v2674_v43  ;;  %v435_v43 = vld [vmem:[%s3510_s3 + $0x60] sm:$0xff]  ;;  %v1584_v46 = vld [vmem:[%s3509_s2 + $0x4e8] sm:$0xff] }
  0x59   : > { %1866 = vmatmul.mubr.f32.vlgmr.msra.gmra.mrb[2].mxu1 %v2843_v61  ;;  %2072 = vmatpush1.bf16.msra.mxu0 %v2071_v62  ;;  %v2079_v22 = vpack.c.bf16 %v438_v14, %v435_v43  ;;  %v2091_v62 = vpack.c.bf16 %v456_v53, %v453_v52  ;;  %v465_v43 = vld [vmem:[%s3510_s3 + $0x150] sm:$0xff]  ;;  %v468_v14 = vld [vmem:[%s3510_s3 + $0x168] sm:$0xff]  ;;  %v2197_v52 = vpack.c.bf16 %v1588_v45, %v1585_v44  ;;  %v1618_v44 = vld [vmem:[%s3509_s2 + $0x5f8] sm:$0xff] }
  0x5a   : > { %2128 = vmatpush1.bf16.msra.mxu1 %v2127_v0  ;;  %2074 = vmatprep.subr.bf16.mxu0 %v2073_v1  ;;  %v2147_v0 = vpack.c.bf16 %v1556_v56, %v1553_v54  ;;  %v2093_v1 = vpack.c.bf16 %v463_v58, %v460_v57  ;;  %v1537_v53 = vld [vmem:[%s3509_s2 + $0x370] sm:$0xff]  ;;  %v1540_v54 = vld [vmem:[%s3509_s2 + $0x388] sm:$0xff]  ;;  %v1591_v56 = vld [vmem:[%s3509_s2 + $0x520] sm:$0xff] }
  0x5b   : > { %2130 = vmatprep.subr.bf16.mxu1 %v2129_v5  ;;  %694 = vmatprep.mubr.f32.mxu0 %v2380_v63  ;;  %v2149_v5 = vpack.c.bf16 %v1563_v60, %v1560_v59  ;;  %v1594_v57 = vld [vmem:[%s3509_s2 + $0x538] sm:$0xff]  ;;  %v1593_v59 = vld [vmem:[%s3509_s2 + $0x530] sm:$0xff]  ;;  %v2199_v60 = vpack.c.bf16 %v1540_v54, %v1537_v53  ;;  %v1608_v32 = vld [vmem:[%s3509_s2 + $0x5a8] sm:$0xff] }
  0x5c   : > { %1032 = vmatprep.mubr.f32.mxu1 %v2906_v28  ;;  %v1590_v58 = vld [vmem:[%s3509_s2 + $0x518] sm:$0xff]  ;;  %v1613_v54 = vld [vmem:[%s3509_s2 + $0x5d0] sm:$0xff] }
  0x5d   : > { %2076 = vmatpush1.bf16.msra.mxu0 %v2075_v11  ;;  %v2095_v11 = vpack.c.bf16 %v462_v3, %v459_v2  ;;  %v1543_v2 = vld [vmem:[%s3509_s2 + $0x3a0] sm:$0xff]  ;;  %v1546_v3 = vld [vmem:[%s3509_s2 + $0x3b8] sm:$0xff] }
  0x5e   : > { %2132 = vmatpush1.bf16.msra.mxu1 %v2131_v12  ;;  %2078 = vmatprep.subr.bf16.mxu0 %v2077_v13  ;;  %v2151_v12 = vpack.c.bf16 %v1562_v6, %v1559_v4  ;;  %v2097_v13 = vpack.c.bf16 %v469_v8, %v466_v7  ;;  %v2169_v4 = vpack.c.bf16 %v1593_v59, %v1590_v58  ;;  %v1597_v6 = vld [vmem:[%s3509_s2 + $0x550] sm:$0xff]  ;;  %v1600_v7 = vld [vmem:[%s3509_s2 + $0x568] sm:$0xff]  ;;  %v1614_v45 = vld [vmem:[%s3509_s2 + $0x5d8] sm:$0xff] }
  0x5f   : > { %2134 = vmatprep.subr.bf16.mxu1 %v2133_v16  ;;  %v2153_v16 = vpack.c.bf16 %v1569_v10, %v1566_v9  ;;  %v1596_v8 = vld [vmem:[%s3509_s2 + $0x548] sm:$0xff]  ;;  %v1599_v9 = vld [vmem:[%s3509_s2 + $0x560] sm:$0xff]  ;;  %v2203_v10 = vpack.c.bf16 %v1546_v3, %v1543_v2  ;;  %v1621_v59 = vld [vmem:[%s3510_s3 + $0x190] sm:$0xff] }
  0x60   : > { %v2173_v15 = vpack.c.bf16 %v1599_v9, %v1596_v8  ;;  %v1626_v2 = vld [vmem:[%s3510_s3 + $0x1b8] sm:$0xff]  ;;  %v1629_v3 = vld [vmem:[%s3510_s3 + $0x1d0] sm:$0xff] }
  0x61   : > { %2080 = vmatpush1.bf16.msra.mxu0 %v2079_v22  ;;  %v2099_v22 = vpack.c.bf16 %v468_v14, %v465_v43  ;;  %v1549_v43 = vld [vmem:[%s3509_s2 + $0x3d0] sm:$0xff]  ;;  %v1552_v14 = vld [vmem:[%s3509_s2 + $0x3e8] sm:$0xff]  ;;  %v1630_v8 = vld [vmem:[%s3510_s3 + $0x1d8] sm:$0xff]  ;;  %v2225_v9 = vpack.c.bf16 %v1629_v3, %v1626_v2 }
  0x62   : > { %2136 = vmatpush1.bf16.msra.mxu1 %v2135_v24  ;;  %2082 = vmatprep.subr.bf16.mxu0 %v2081_v25  ;;  %v1571_v24 = vld [vmem:[%s3509_s2 + $0x480] sm:$0xff]  ;;  %v2189_v25 = vpack.c.bf16 %v1576_v19, %v1573_v18  ;;  %v1606_v18 = vld [vmem:[%s3509_s2 + $0x598] sm:$0xff]  ;;  %v1661_v2 = vld [vmem:[%s3510_s3 + $0x2d0] sm:$0xff] }
  0x63   : > { %2138 = vmatprep.subr.bf16.mxu1 %v2137_v29  ;;  %v2157_v29 = vpack.c.bf16 %v1575_v21, %v1572_v20  ;;  %v1602_v19 = vld [vmem:[%s3509_s2 + $0x578] sm:$0xff]  ;;  %v1605_v20 = vld [vmem:[%s3509_s2 + $0x590] sm:$0xff]  ;;  %v2207_v21 = vpack.c.bf16 %v1552_v14, %v1549_v43  ;;  %v1664_v3 = vld [vmem:[%s3510_s3 + $0x2e8] sm:$0xff] }
  0x65   : > { %2084 = vmatpush1.bf16.msra.mxu0 %v2083_v35  ;;  %v2191_v35 = vpack.c.bf16 %v1528_v27, %v1525_v26  ;;  %v1558_v26 = vld [vmem:[%s3509_s2 + $0x418] sm:$0xff]  ;;  %v2177_v27 = vpack.c.bf16 %v1605_v20, %v1602_v19 }
  0x66   : > { %2140 = vmatpush1.bf16.msra.mxu1 %v2139_v36  ;;  %2086 = vmatprep.subr.bf16.mxu0 %v2085_v37  ;;  %v2159_v36 = vpack.c.bf16 %v1574_v30, %v1571_v24  ;;  %v1577_v37 = vld [vmem:[%s3509_s2 + $0x4b0] sm:$0xff]  ;;  %v2209_v24 = vpack.c.bf16 %v1606_v18, %v1603_v17  ;;  %v1631_v18 = vld [vmem:[%s3510_s3 + $0x1e0] sm:$0xff]  ;;  %v1634_v19 = vld [vmem:[%s3510_s3 + $0x1f8] sm:$0xff] }
  0x67   : > { %2142 = vmatprep.subr.bf16.mxu1 %v2141_v41  ;;  %v2161_v41 = vpack.c.bf16 %v1581_v34, %v1578_v33  ;;  %v1609_v30 = vld [vmem:[%s3509_s2 + $0x5b0] sm:$0xff]  ;;  %v1611_v33 = vld [vmem:[%s3509_s2 + $0x5c0] sm:$0xff]  ;;  %v1638_v20 = vld [vmem:[%s3510_s3 + $0x218] sm:$0xff] }
  0x69   : > { %2088 = vmatpush1.bf16.msra.mxu0 %v2087_v48  ;;  %v2195_v48 = vpack.c.bf16 %v1534_v40, %v1531_v39  ;;  %v1564_v39 = vld [vmem:[%s3509_s2 + $0x448] sm:$0xff]  ;;  %v2181_v40 = vpack.c.bf16 %v1611_v33, %v1608_v32  ;;  %v1645_v33 = vld [vmem:[%s3510_s3 + $0x250] sm:$0xff] }
  0x6a   : > { %2144 = vmatpush1.bf16.msra.mxu1 %v2143_v49  ;;  %2090 = vmatprep.subr.bf16.mxu0 %v2089_v51  ;;  %v2163_v49 = vpack.c.bf16 %v1580_v42, %v1577_v37  ;;  %v1583_v51 = vld [vmem:[%s3509_s2 + $0x4e0] sm:$0xff]  ;;  %v2213_v37 = vpack.c.bf16 %v1612_v31, %v1609_v30 }
  0x6b   : > { %2146 = vmatprep.subr.bf16.mxu1 %v2145_v55  ;;  %v2165_v55 = vpack.c.bf16 %v1587_v47, %v1584_v46  ;;  %v1615_v42 = vld [vmem:[%s3509_s2 + $0x5e0] sm:$0xff]  ;;  %v1617_v46 = vld [vmem:[%s3509_s2 + $0x5f0] sm:$0xff] }
  0x6c   : > { %v2185_v53 = vpack.c.bf16 %v1617_v46, %v1614_v45  ;;  %v1647_v30 = vld [vmem:[%s3510_s3 + $0x260] sm:$0xff]  ;;  %v1649_v46 = vld [vmem:[%s3510_s3 + $0x270] sm:$0xff] }
  0x6d   : > { %2092 = vmatpush1.bf16.msra.mxu0 %v2091_v62 }
  0x6e   : > { %2148 = vmatpush1.bf16.msra.mxu1 %v2147_v0  ;;  %2094 = vmatprep.subr.bf16.mxu0 %v2093_v1  ;;  %v1589_v0 = vld [vmem:[%s3509_s2 + $0x510] sm:$0xff]  ;;  %v2201_v1 = vpack.c.bf16 %v1594_v57, %v1591_v56  ;;  %v1623_v56 = vld [vmem:[%s3510_s3 + $0x1a0] sm:$0xff] }
  0x6f   : > { %2150 = vmatprep.subr.bf16.mxu1 %v2149_v5  ;;  %v1592_v5 = vld [vmem:[%s3509_s2 + $0x528] sm:$0xff] }
  0x71   : > { %2096 = vmatpush1.bf16.msra.mxu0 %v2095_v11  ;;  %v2171_v11 = vpack.c.bf16 %v1592_v5, %v1589_v0  ;;  %v1619_v0 = vld [vmem:[%s3510_s3 + $0x180] sm:$0xff] }
  0x72   : > { %2152 = vmatpush1.bf16.msra.mxu1 %v2151_v12  ;;  %2098 = vmatprep.subr.bf16.mxu0 %v2097_v13  ;;  %v1595_v12 = vld [vmem:[%s3509_s2 + $0x540] sm:$0xff]  ;;  %v2205_v13 = vpack.c.bf16 %v1600_v7, %v1597_v6 }
  0x73   : > { %2154 = vmatprep.subr.bf16.mxu1 %v2153_v16  ;;  %v1598_v16 = vld [vmem:[%s3509_s2 + $0x558] sm:$0xff]  ;;  %v798_v5 = vld [vmem:[%s2451_s16] sm:$0xff] }
  0x74   : > { %v1627_v7 = vld [vmem:[%s3510_s3 + $0x1c0] sm:$0xff] }
  0x75   : > { %2100 = vmatpush1.bf16.msra.mxu0 %v2099_v22  ;;  %v2175_v22 = vpack.c.bf16 %v1598_v16, %v1595_v12  ;;  %v1632_v12 = vld [vmem:[%s3510_s3 + $0x1e8] sm:$0xff]  ;;  %v2257_v43 = vpack.c.bf16 %v1630_v8, %v1627_v7 }
  0x76   : > { %2156 = vmatpush1.bf16.msra.mxu1 %v2155_v23  ;;  %2190 = vmatprep.subr.bf16.mxu0 %v2189_v25  ;;  %v1601_v23 = vld [vmem:[%s3509_s2 + $0x570] sm:$0xff]  ;;  %v1555_v25 = vld [vmem:[%s3509_s2 + $0x400] sm:$0xff]  ;;  %v1636_v16 = vld [vmem:[%s3510_s3 + $0x208] sm:$0xff] }
  0x77   : > { %2158 = vmatprep.subr.bf16.mxu1 %v2157_v29  ;;  %v1604_v29 = vld [vmem:[%s3509_s2 + $0x588] sm:$0xff]  ;;  %v2211_v34 = vpack.c.bf16 %v1558_v26, %v1555_v25  ;;  %v1642_v25 = vld [vmem:[%s3510_s3 + $0x238] sm:$0xff] }
  0x78   : > { %695 = vmatmul.mubr.f32.vlgmr.msra.gmra.mrb[0].mxu0 %v2843_v61 }
  0x79   : > { %2192 = vmatpush3.bf16.msra.mxu0 %v2191_v35  ;;  %1103 = vmatprep.mubr.f32.mxu0 %v2906_v28  ;;  %v1586_v28 = vld [vmem:[%s3509_s2 + $0x4f8] sm:$0xff]  ;;  %v2179_v35 = vpack.c.bf16 %v1604_v29, %v1601_v23  ;;  %v2231_v23 = vpack.c.bf16 %v1634_v19, %v1631_v18  ;;  %v1644_v29 = vld [vmem:[%s3510_s3 + $0x248] sm:$0xff] }
  0x7a   : > { %2160 = vmatpush1.bf16.msra.mxu1 %v2159_v36  ;;  %2194 = vmatprep.subr.bf16.mxu0 %v2193_v38  ;;  %v2167_v62 = vpack.c.bf16 %v1586_v28, %v1583_v51  ;;  %v1607_v36 = vld [vmem:[%s3509_s2 + $0x5a0] sm:$0xff]  ;;  %v1561_v38 = vld [vmem:[%s3509_s2 + $0x430] sm:$0xff]  ;;  %v1620_v28 = vld [vmem:[%s3510_s3 + $0x188] sm:$0xff] }
  0x7b   : > { %2162 = vmatprep.subr.bf16.mxu1 %v2161_v41  ;;  %v1610_v41 = vld [vmem:[%s3509_s2 + $0x5b8] sm:$0xff]  ;;  %v2215_v47 = vpack.c.bf16 %v1564_v39, %v1561_v38  ;;  %v1567_v51 = vld [vmem:[%s3509_s2 + $0x460] sm:$0xff]  ;;  %v1653_v39 = vld [vmem:[%s3510_s3 + $0x290] sm:$0xff] }
  0x7c   : > { %v1650_v38 = vld [vmem:[%s3510_s3 + $0x278] sm:$0xff] }
  0x7d   : > { %2196 = vmatpush3.bf16.msra.mxu0 %v2195_v48  ;;  %v2183_v48 = vpack.c.bf16 %v1610_v41, %v1607_v36  ;;  %v1643_v36 = vld [vmem:[%s3510_s3 + $0x240] sm:$0xff]  ;;  %v2241_v45 = vpack.c.bf16 %v1653_v39, %v1650_v38 }
  0x7e   : > { %2164 = vmatpush1.bf16.msra.mxu1 %v2163_v49  ;;  %2198 = vmatprep.subr.bf16.mxu0 %v2197_v52  ;;  %v2217_v49 = vpack.c.bf16 %v1618_v44, %v1615_v42  ;;  %v1570_v52 = vld [vmem:[%s3509_s2 + $0x478] sm:$0xff]  ;;  %v1651_v42 = vld [vmem:[%s3510_s3 + $0x280] sm:$0xff] }
  0x7f   : > { %2166 = vmatprep.subr.bf16.mxu1 %v2165_v55  ;;  %v1616_v55 = vld [vmem:[%s3509_s2 + $0x5e8] sm:$0xff]  ;;  %v2219_v57 = vpack.c.bf16 %v1570_v52, %v1567_v51  ;;  %v1654_v44 = vld [vmem:[%s3510_s3 + $0x298] sm:$0xff] }
  0x80   : > { %v2187_v58 = vpack.c.bf16 %v1616_v55, %v1613_v54  ;;  %v2269_v51 = vpack.c.bf16 %v1654_v44, %v1651_v42  ;;  %v1660_v54 = vld [vmem:[%s3510_s3 + $0x2c8] sm:$0xff]  ;;  %v1667_v44 = vld [vmem:[%s3511_s4 + $0x3] sm:$0x7] }
  0x81   : > { %2200 = vmatpush3.bf16.msra.mxu0 %v2199_v60  ;;  %v1624_v60 = vld [vmem:[%s3510_s3 + $0x1a8] sm:$0xff] }
  0x82   : > { %2168 = vmatpush1.bf16.msra.mxu1 %v2167_v62  ;;  %2202 = vmatprep.subr.bf16.mxu0 %v2201_v1  ;;  %v2221_v62 = vpack.c.bf16 %v1623_v56, %v1620_v28  ;;  %v1622_v1 = vld [vmem:[%s3510_s3 + $0x198] sm:$0xff]  ;;  %v1655_v28 = vld [vmem:[%s3510_s3 + $0x2a0] sm:$0xff] }
  0x83   : > { %2170 = vmatprep.subr.bf16.mxu1 %v2169_v4  ;;  %v2254_v4 = vpack.c.bf16 %v1624_v60, %v1621_v59  ;;  %v2223_v6 = vpack.c.bf16 %v1622_v1, %v1619_v0  ;;  %v1658_v56 = vld [vmem:[%s3510_s3 + $0x2b8] sm:$0xff] }
  0x84   : > { %v2247_v60 = vpack.c.bf16 %v1658_v56, %v1655_v28  ;;  %v1666_v0 = vld [vmem:[%s3510_s3 + $0x2f8] sm:$0xff]  ;;  %v1671_v56 = vld [vmem:[%s3512_s5 + $0x1] ss:$0 sm:$0xff] }
  0x85   : > { %2204 = vmatpush3.bf16.msra.mxu0 %v2203_v10  ;;  %v1625_v10 = vld [vmem:[%s3510_s3 + $0x1b0] sm:$0xff] }
  0x86   : > { %2172 = vmatpush1.bf16.msra.mxu1 %v2171_v11  ;;  %2206 = vmatprep.subr.bf16.mxu0 %v2205_v13  ;;  %v1628_v11 = vld [vmem:[%s3510_s3 + $0x1c8] sm:$0xff]  ;;  %v1635_v13 = vld [vmem:[%s3510_s3 + $0x200] sm:$0xff] }
  0x87   : > { %2174 = vmatprep.subr.bf16.mxu1 %v2173_v15  ;;  %v2227_v14 = vpack.c.bf16 %v1628_v11, %v1625_v10  ;;  %v1633_v15 = vld [vmem:[%s3510_s3 + $0x1f0] sm:$0xff]  ;;  %v2229_v17 = vpack.c.bf16 %v1635_v13, %v1632_v12  ;;  %v474_v12 = vlaneseq }
  0x89   : > { %2208 = vmatpush3.bf16.msra.mxu0 %v2207_v21  ;;  %v1641_v21 = vld [vmem:[%s3510_s3 + $0x230] sm:$0xff]  ;;  %v475_v13 = vshrl.u32 %v474_v12, 7 }
  0x8a   : > { %2176 = vmatpush1.bf16.msra.mxu1 %v2175_v22  ;;  %2210 = vmatprep.subr.bf16.mxu0 %v2209_v24  ;;  %v2260_v22 = vpack.c.bf16 %v1636_v16, %v1633_v15  ;;  %v1639_v24 = vld [vmem:[%s3510_s3 + $0x220] sm:$0xff]  ;;  %v2233_v26 = vpack.c.bf16 %v1641_v21, %v1638_v20 }
  0x8b   : > { %2178 = vmatprep.subr.bf16.mxu1 %v2177_v27  ;;  %v1640_v27 = vld [vmem:[%s3510_s3 + $0x228] sm:$0xff]  ;;  %v2263_v31 = vpack.c.bf16 %v1642_v25, %v1639_v24  ;;  %v484_v25 = vsub.s32 2, %v475_v13 }
  0x8d   : > { %2212 = vmatpush3.bf16.msra.mxu0 %v2211_v34  ;;  %v1648_v34 = vld [vmem:[%s3510_s3 + $0x268] sm:$0xff] }
  0x8e   : > { %2180 = vmatpush1.bf16.msra.mxu1 %v2179_v35  ;;  %2214 = vmatprep.subr.bf16.mxu0 %v2213_v37  ;;  %v2237_v35 = vpack.c.bf16 %v1647_v30, %v1644_v29  ;;  %v1646_v37 = vld [vmem:[%s3510_s3 + $0x258] sm:$0xff] }
  0x8f   : > { %2182 = vmatprep.subr.bf16.mxu1 %v2181_v40  ;;  %v2266_v40 = vpack.c.bf16 %v1648_v34, %v1645_v33  ;;  %v2239_v41 = vpack.c.bf16 %v1646_v37, %v1643_v36 }
  0x91   : > { %2216 = vmatpush3.bf16.msra.mxu0 %v2215_v47  ;;  %v1652_v47 = vld [vmem:[%s3510_s3 + $0x288] sm:$0xff] }
  0x92   : > { %2184 = vmatpush1.bf16.msra.mxu1 %v2183_v48  ;;  %2218 = vmatprep.subr.bf16.mxu0 %v2217_v49  ;;  %v1656_v48 = vld [vmem:[%s3510_s3 + $0x2a8] sm:$0xff]  ;;  %v1659_v49 = vld [vmem:[%s3510_s3 + $0x2c0] sm:$0xff]  ;;  %v2243_v52 = vpack.c.bf16 %v1652_v47, %v1649_v46 }
  0x93   : > { %2186 = vmatprep.subr.bf16.mxu1 %v2185_v53  ;;  %v1657_v53 = vld [vmem:[%s3510_s3 + $0x2b0] sm:$0xff]  ;;  %v2245_v55 = vpack.c.bf16 %v1659_v49, %v1656_v48 }
  0x94   : > { %v2272_v59 = vpack.c.bf16 %v1660_v54, %v1657_v53 }
  0x95   : > { %2220 = vmatpush3.bf16.msra.mxu0 %v2219_v57  ;;  %v1662_v57 = vld [vmem:[%s3510_s3 + $0x2d8] sm:$0xff] }
  0x96   : > { %2188 = vmatpush1.bf16.msra.mxu1 %v2187_v58  ;;  %2253 = vmatprep.subr.bf16.mxu0 %v2378_v50  ;;  %v1665_v58 = vld [vmem:[%s3510_s3 + $0x2f0] sm:$0xff] }
  0x97   : > { %2222 = vmatprep.subr.bf16.mxu1 %v2221_v62  ;;  %v1663_v62 = vld [vmem:[%s3510_s3 + $0x2e0] sm:$0xff]  ;;  %v2249_v1 = vpack.c.bf16 %v1665_v58, %v1662_v57  ;;  %v964_v57 = vrot.slane %v1667_v44, %v484_v25 }
  0x98   : > { %1104 = vmatmul.mubr.f32.vlgmr.msra.gmra.mrb[2].mxu0 %v798_v5 }
  0x99   : > { %1033 = vmatmul.mubr.f32.vlgmr.msra.gmra.mrb[4].mxu1 %v798_v5  ;;  %2255 = vmatpush3.bf16.msra.mxu0 %v2254_v4  ;;  %v2275_v4 = vpack.c.bf16 %v1666_v0, %v1663_v62  ;;  %v2251_v5 = vpack.c.bf16 %v1664_v3, %v1661_v2 }
  0x9a   : > { %2224 = vmatpush1.bf16.msra.mxu1 %v2223_v6  ;;  %2256 = vmatprep.subr.bf16.mxu0 %v2378_v50  ;;  %v3358_v6 = vld [vmem:[#allocation2 + $0x8] sm:$0xff] }
  0x9b   : > { %2226 = vmatprep.subr.bf16.mxu1 %v2225_v9  ;;  %1173 = vmatprep.mubr.f32.mxu1 %v2380_v63 }
  0x9c   : > { %1900 = vmatprep.mubr.msk.f32.mxu0 %vm2379_vm0, %v2380_v63  ;;  %v1637_v63 = vld [vmem:[%s3510_s3 + $0x210] sm:$0xff] }
  0x9d   : > { %2258 = vmatpush3.bf16.msra.mxu0 %v2257_v43  ;;  %v2235_v32 = vpack.c.bf16 %v1640_v27, %v1637_v63  ;;  %v476_v43 = vsub.s32 0, %v475_v13 }
  0x9e   : > { %2228 = vmatpush1.bf16.msra.mxu1 %v2227_v14  ;;  %2259 = vmatprep.subr.bf16.mxu0 %v2378_v50 }
  0x9f   : > { %2230 = vmatprep.subr.bf16.mxu1 %v2229_v17  ;;  %v480_v17 = vsub.s32 1, %v475_v13 }
  0xa1   : > { %2261 = vmatpush3.bf16.msra.mxu0 %v2260_v22  ;;  %v960_v46 = vrot.slane %v1667_v44, %v480_v17 }
  0xa2   : > { %2232 = vmatpush1.bf16.msra.mxu1 %v2231_v23  ;;  %2262 = vmatprep.subr.bf16.mxu0 %v2378_v50 }
  0xa3   : > { %2234 = vmatprep.subr.bf16.mxu1 %v2233_v26  ;;  %v1522_v26 = vld [vmem:[%s3512_s5] ss:$0 sm:$0xff] }
  0xa5   : > { %2264 = vmatpush3.bf16.msra.mxu0 %v2263_v31 }
  0xa6   : > { %2236 = vmatpush1.bf16.msra.mxu1 %v2235_v32  ;;  %2265 = vmatprep.subr.bf16.mxu0 %v2378_v50 }
  0xa7   : > { %2238 = vmatprep.subr.bf16.mxu1 %v2237_v35 }
  0xa9   : > { %2267 = vmatpush3.bf16.msra.mxu0 %v2266_v40 }
  0xaa   : > { %2240 = vmatpush1.bf16.msra.mxu1 %v2239_v41  ;;  %2268 = vmatprep.subr.bf16.mxu0 %v2378_v50 }
  0xab   : > { %2242 = vmatprep.subr.bf16.mxu1 %v2241_v45  ;;  %v956_v45 = vrot.slane %v1667_v44, %v476_v43 }
  0xad   : > { %2270 = vmatpush3.bf16.msra.mxu0 %v2269_v51 }
  0xae   : > { %2244 = vmatpush1.bf16.msra.mxu1 %v2243_v52  ;;  %2271 = vmatprep.subr.bf16.mxu0 %v2378_v50 }
  0xaf   : > { %2246 = vmatprep.subr.bf16.mxu1 %v2245_v55 }
  0xb1   : > { %2273 = vmatpush3.bf16.msra.mxu0 %v2272_v59 }
  0xb2   : > { %2248 = vmatpush1.bf16.msra.mxu1 %v2247_v60  ;;  %2274 = vmatprep.subr.bf16.mxu0 %v2378_v50  ;;  %v471_v50 = vld [vmem:[%s3511_s4] sm:$0x7] }
  0xb3   : > { %2250 = vmatprep.subr.bf16.mxu1 %v2249_v1  ;;  %v477_v14 = vrot.slane %v471_v50, %v476_v43  ;;  %v481_v20 = vrot.slane %v471_v50, %v480_v17  ;;  %v485_v63 = vrot.slane %v471_v50, %v484_v25 }
  0xb5   : > { %2276 = vmatpush3.bf16.msra.mxu0 %v2275_v4 }
  0xb6   : > { %2252 = vmatpush1.bf16.msra.mxu1 %v2251_v5 }
  0xb8   : > { %1901 = vmatmul.mubr.f32.vlgmr.msra.gmra.mrb[4].mxu0 %v3358_v6 }
  0xb9   : > { %1174 = vmatmul.mubr.f32.vlgmr.msra.gmra.mrb[4].mxu1 %v3358_v6 }
 0x10c   : > { %v1727_v7 = vpop.f32.mrb[0].mxu1 }
 0x10d   : > { %v1728_v8 = vpop.f32.mrb[1].mxu1 }
 0x10e   : > { %v1729_v9 = vadd.f32 %v1728_v8, %v1727_v7 }
 0x110   : > { %v627_v31 = vadd.f32 %v1729_v9, %v485_v63  ;;  %v2381_v9 = vmov (!%p1519_p5), 0.0  }
 0x111   : > { %1283 = vst [vmem:[%s3515_s8] sm:$0xff] (!%p1519_p5), %v2381_v9 }
 0x12c   : > { %v767_v10 = vpop.f32.mrb[2].mxu1 }
 0x12d   : > { %v1867_v11 = vpop.f32.mrb[3].mxu1  ;;  %v791_v29 = vadd.f32 %v1522_v26, %v767_v10 }
 0x14b   : > { %v696_v15 = vpop.f32.mrb[0].mxu0 }
 0x14c   : > { %v2325_v16 = vadd.f32 %v696_v15, %v477_v14  ;;  %v698_v18 = vpop.f32.mrb[1].mxu0 }
 0x14d   : > { %v2326_v21 = vadd.f32 %v698_v18, %v481_v20 }
 0x14e   : > { %v1520_v19 = vmul.f32 -1.442695, %v2325_v16 }
 0x14f   : > { %v1521_v22 = vmul.f32 -1.442695, %v2326_v21 }
 0x150   : > { %2349 = vpow2.f32 %v1520_v19 }
 0x151   : > { %2351 = vpow2.f32 %v1521_v22 }
 0x15a   : > { %v2350_v23 = vpop.eup %2349 }
 0x15b   : > { %v775_v24 = vadd.f32 1.0, %v2350_v23  ;;  %v2352_v27 = vpop.eup %2351 }
 0x15c   : > { %v782_v34 = vadd.f32 1.0, %v2352_v27 }
 0x15d   : > { %2353 = vrcp.f32 %v775_v24 }
 0x167   : > { %v2354_v30 = vpop.eup %2353 }
 0x168   : > { %v792_v32 = vmul.f32 %v2354_v30, %v791_v29 }
 0x16a   : > { %v793_v33 = vadd.f32 %v792_v32, %v627_v31 }
 0x16b   : > { %v1779_v35 = vpop.f32.mrb[2].mxu0 }
 0x16c   : > { %2355 = vtanh.f32 %v793_v33  ;;  %v1780_v36 = vpop.f32.mrb[3].mxu0 }
 0x16d   : > { %v1781_v37 = vadd.f32 %v1780_v36, %v1779_v35  ;;  %2357 = vrcp.f32 %v782_v34 }
 0x16f   : > { %v1106_v62 = vadd.f32 %v1781_v37, %v964_v57 }
 0x176   : > { %v2356_v38 = vpop.eup %2355 }
 0x177   : > { %v795_v39 = vsub.f32 %v2843_v61, %v2356_v38  ;;  %v2358_v40 = vpop.eup %2357 }
 0x179   : > { %v796_v41 = vmul.f32 %v2358_v40, %v795_v39 }
 0x17b   : > { %v797_v42 = vadd.f32 %v2356_v38, %v796_v41 }
 0x17d   : > { %1277 = vst [vmem:[#allocation2] sm:$0xff] %v797_v42  ;;  %1282 = vst [vmem:[#allocation3] sm:$0xff] (!%p1519_p5), %v797_v42 }
 0x18b   : > { %v1246_v47 = vpop.f32.mrb[4].mxu0 }
 0x18c   : > { %v1175_v48 = vpop.f32.mrb[4].mxu1  ;;  %v1902_v49 = vpop.f32.mrb[5].mxu0  ;;  %v1270_v58 = vadd.f32 %v1671_v56, %v1246_v47 }
 0x18d   : > { %v2327_v51 = vadd.f32 %v1175_v48, %v956_v45  ;;  %v1177_v52 = vpop.f32.mrb[5].mxu1 }
 0x18e   : > { %v2328_v53 = vadd.f32 %v1177_v52, %v960_v46 }
 0x18f   : > { %v1669_v54 = vmul.f32 -1.442695, %v2327_v51 }
 0x190   : > { %v1670_v55 = vmul.f32 -1.442695, %v2328_v53 }
 0x191   : > { %2359 = vpow2.f32 %v1669_v54 }
 0x192   : > { %2361 = vpow2.f32 %v1670_v55 }
 0x19b   : > { %v2360_v61 = vpop.eup %2359 }
 0x19c   : > { %v1254_v28 = vadd.f32 1.0, %v2360_v61  ;;  %v2362_v59 = vpop.eup %2361 }
 0x19d   : > { %v1261_v1 = vadd.f32 1.0, %v2362_v59 }
 0x19e   : > { %2363 = vrcp.f32 %v1254_v28 }
 0x1a8   : > { %v2364_v60 = vpop.eup %2363 }
 0x1a9   : > { %v1271_v0 = vmul.f32 %v2364_v60, %v1270_v58 }
 0x1ab   : > { %v1272_v2 = vadd.f32 %v1271_v0, %v1106_v62 }
 0x1ad   : > { %2365 = vtanh.f32 %v1272_v2 }
 0x1ae   : > { %2367 = vrcp.f32 %v1261_v1 }
 0x1b7   : > { %v2366_v3 = vpop.eup %2365 }
 0x1b8   : > { %v1274_v4 = vsub.f32 %v3358_v6, %v2366_v3  ;;  %v2368_v5 = vpop.eup %2367  ;;  %1281 = sbr.rel (%p1519_p5) target bundleno = 447 (0x1bf), region = 60 }
 0x1ba   : > { %v1275_v7 = vmul.f32 %v2368_v5, %v1274_v4 }
 0x1bc   : > { %v3376_v8 = vadd.f32 %v2366_v3, %v1275_v7 }
 0x1be   : > { %1278 = vst [vmem:[#allocation2 + $0x8] sm:$0xff] %v3376_v8 }
 0x1bf PF: > { %p1673_p6 = scmp.ne.s32.totalorder %s2436_s28, 7 }
 0x1c0   : > { %v1674_v6 = vld [vmem:[%s3513_s6 + $0x80] sm:$0xff] (!%p1673_p6)  ;;  %v1675_v10 = vld [vmem:[%s3513_s6 + $0x88] sm:$0xff] (!%p1673_p6)  ;;  %v2382_v12 = vmov (!%p1673_p6), 0.0|0.0   ;;  %v1676_v50 = vld [vmem:[%s3513_s6 + $0x90] sm:$0xff] (!%p1673_p6)  ;;  %vm2383_vm1 = vmmov (!%p1673_p6), 0   ;;  %v2384_v18 = vmov (!%p1673_p6), 0.0  }
 0x1c1   : > { %1287 = sbr.rel (%p1673_p6) target bundleno = 700 (0x2bc), region = 64  ;;  %v1289_v11 = vld [vmem:[%s3513_s6] sm:$0xff] (!%p1673_p6)  ;;  %2277 = vmatprep.subr.bf16.mxu0 (!%p1673_p6), %v2382_v12  ;;  %2301 = vmatprep.subr.bf16.mxu1 (!%p1673_p6), %v2382_v12  ;;  %v2278_v13 = vpack.c.bf16 (!%p1673_p6), %v1675_v10, %v1674_v6  ;;  %v1290_v43 = vld [vmem:[%s3513_s6 + $0x8] sm:$0xff] (!%p1673_p6)  ;;  %v1677_v14 = vld [vmem:[%s3513_s6 + $0x98] sm:$0xff] (!%p1673_p6) }
 0x1c2   : > { %v2302_v15 = vpack.c.bf16 (!%p1673_p6), %v1290_v43, %v1289_v11  ;;  %v1291_v16 = vld [vmem:[%s3513_s6 + $0x10] sm:$0xff] (!%p1673_p6)  ;;  %v1292_v17 = vld [vmem:[%s3513_s6 + $0x18] sm:$0xff] (!%p1673_p6)  ;;  %1935 = vmatprep.mubr.msk.f32.mxu0 (!%p1673_p6), %vm2383_vm1, %v2384_v18  ;;  %1970 = vmatprep.mubr.msk.f32.mxu1 (!%p1673_p6), %vm2383_vm1, %v2384_v18  ;;  %v2281_v19 = vpack.c.bf16 (!%p1673_p6), %v1677_v14, %v1676_v50  ;;  %v1678_v21 = vld [vmem:[%s3513_s6 + $0xa0] sm:$0xff] (!%p1673_p6) }
 0x1c3   : > { %2279 = vmatpush3.bf16.msra.mxu0 (!%p1673_p6), %v2278_v13  ;;  %v2305_v20 = vpack.c.bf16 (!%p1673_p6), %v1292_v17, %v1291_v16  ;;  %v1679_v22 = vld [vmem:[%s3513_s6 + $0xa8] sm:$0xff] (!%p1673_p6)  ;;  %v1293_v23 = vld [vmem:[%s3513_s6 + $0x20] sm:$0xff] (!%p1673_p6)  ;;  %v1680_v63 = vld [vmem:[%s3513_s6 + $0xb0] sm:$0xff] (!%p1673_p6) }
 0x1c4   : > { %2303 = vmatpush3.bf16.msra.mxu1 (!%p1673_p6), %v2302_v15  ;;  %2280 = vmatprep.subr.bf16.mxu0 (!%p1673_p6), %v2382_v12  ;;  %v1294_v24 = vld [vmem:[%s3513_s6 + $0x28] sm:$0xff] (!%p1673_p6)  ;;  %v2284_v25 = vpack.c.bf16 (!%p1673_p6), %v1679_v22, %v1678_v21  ;;  %v1681_v27 = vld [vmem:[%s3513_s6 + $0xb8] sm:$0xff] (!%p1673_p6)  ;;  %v1295_v29 = vld [vmem:[%s3513_s6 + $0x30] sm:$0xff] (!%p1673_p6) }
 0x1c5   : > { %2304 = vmatprep.subr.bf16.mxu1 (!%p1673_p6), %v2382_v12  ;;  %v2308_v26 = vpack.c.bf16 (!%p1673_p6), %v1294_v24, %v1293_v23  ;;  %v1296_v30 = vld [vmem:[%s3513_s6 + $0x38] sm:$0xff] (!%p1673_p6)  ;;  %v2287_v31 = vpack.c.bf16 (!%p1673_p6), %v1681_v27, %v1680_v63  ;;  %v1682_v33 = vld [vmem:[%s3513_s6 + $0xc0] sm:$0xff] (!%p1673_p6)  ;;  %v1683_v34 = vld [vmem:[%s3513_s6 + $0xc8] sm:$0xff] (!%p1673_p6) }
 0x1c6   : > { %v2311_v32 = vpack.c.bf16 (!%p1673_p6), %v1296_v30, %v1295_v29  ;;  %v1297_v35 = vld [vmem:[%s3513_s6 + $0x40] sm:$0xff] (!%p1673_p6)  ;;  %v1298_v36 = vld [vmem:[%s3513_s6 + $0x48] sm:$0xff] (!%p1673_p6)  ;;  %v2290_v37 = vpack.c.bf16 (!%p1673_p6), %v1683_v34, %v1682_v33  ;;  %v1684_v39 = vld [vmem:[%s3513_s6 + $0xd0] sm:$0xff] (!%p1673_p6) }
 0x1c7   : > { %2282 = vmatpush3.bf16.msra.mxu0 (!%p1673_p6), %v2281_v19  ;;  %v2314_v38 = vpack.c.bf16 (!%p1673_p6), %v1298_v36, %v1297_v35  ;;  %v1685_v40 = vld [vmem:[%s3513_s6 + $0xd8] sm:$0xff] (!%p1673_p6)  ;;  %v1299_v41 = vld [vmem:[%s3513_s6 + $0x50] sm:$0xff] (!%p1673_p6)  ;;  %v1686_v46 = vld [vmem:[%s3513_s6 + $0xe0] sm:$0xff] (!%p1673_p6) }
 0x1c8   : > { %2306 = vmatpush3.bf16.msra.mxu1 %v2305_v20  ;;  %2283 = vmatprep.subr.bf16.mxu0 %v2382_v12  ;;  %v1300_v42 = vld [vmem:[%s3513_s6 + $0x58] sm:$0xff]  ;;  %v2293_v44 = vpack.c.bf16 %v1685_v40, %v1684_v39  ;;  %v1687_v47 = vld [vmem:[%s3513_s6 + $0xe8] sm:$0xff]  ;;  %v1301_v48 = vld [vmem:[%s3513_s6 + $0x60] sm:$0xff] }
 0x1c9   : > { %2307 = vmatprep.subr.bf16.mxu1 %v2382_v12  ;;  %v2317_v45 = vpack.c.bf16 %v1300_v42, %v1299_v41  ;;  %v1302_v49 = vld [vmem:[%s3513_s6 + $0x68] sm:$0xff]  ;;  %v2296_v51 = vpack.c.bf16 %v1687_v47, %v1686_v46  ;;  %v1688_v53 = vld [vmem:[%s3513_s6 + $0xf0] sm:$0xff]  ;;  %v1689_v54 = vld [vmem:[%s3513_s6 + $0xf8] sm:$0xff] }
 0x1ca   : > { %v2320_v52 = vpack.c.bf16 %v1302_v49, %v1301_v48  ;;  %v1303_v55 = vld [vmem:[%s3513_s6 + $0x70] sm:$0xff]  ;;  %v1304_v61 = vld [vmem:[%s3513_s6 + $0x78] sm:$0xff]  ;;  %v2299_v28 = vpack.c.bf16 %v1689_v54, %v1688_v53  ;;  %v1690_v60 = vld [vmem:[%s3514_s7] ss:$0 sm:$0xff] }
 0x1cb   : > { %2285 = vmatpush3.bf16.msra.mxu0 %v2284_v25  ;;  %v2323_v56 = vpack.c.bf16 %v1304_v61, %v1303_v55  ;;  %v1288_v57 = vld [vmem:[#allocation3] sm:$0xff] }
 0x1cc   : > { %2309 = vmatpush3.bf16.msra.mxu1 %v2308_v26  ;;  %2286 = vmatprep.subr.bf16.mxu0 %v2382_v12 }
 0x1cd   : > { %2310 = vmatprep.subr.bf16.mxu1 %v2382_v12 }
 0x1cf   : > { %2288 = vmatpush3.bf16.msra.mxu0 %v2287_v31 }
 0x1d0   : > { %2312 = vmatpush3.bf16.msra.mxu1 %v2311_v32  ;;  %2289 = vmatprep.subr.bf16.mxu0 %v2382_v12 }
 0x1d1   : > { %2313 = vmatprep.subr.bf16.mxu1 %v2382_v12 }
 0x1d3   : > { %2291 = vmatpush3.bf16.msra.mxu0 %v2290_v37 }
 0x1d4   : > { %2315 = vmatpush3.bf16.msra.mxu1 %v2314_v38  ;;  %2292 = vmatprep.subr.bf16.mxu0 %v2382_v12 }
 0x1d5   : > { %2316 = vmatprep.subr.bf16.mxu1 %v2382_v12 }
 0x1d7   : > { %2294 = vmatpush3.bf16.msra.mxu0 %v2293_v44 }
 0x1d8   : > { %2318 = vmatpush3.bf16.msra.mxu1 %v2317_v45  ;;  %2295 = vmatprep.subr.bf16.mxu0 %v2382_v12 }
 0x1d9   : > { %2319 = vmatprep.subr.bf16.mxu1 %v2382_v12 }
 0x1db   : > { %2297 = vmatpush3.bf16.msra.mxu0 %v2296_v51 }
 0x1dc   : > { %2321 = vmatpush3.bf16.msra.mxu1 %v2320_v52  ;;  %2298 = vmatprep.subr.bf16.mxu0 %v2382_v12 }
 0x1dd   : > { %2322 = vmatprep.subr.bf16.mxu1 %v2382_v12 }
 0x1df   : > { %2300 = vmatpush3.bf16.msra.mxu0 %v2299_v28 }
 0x1e0   : > { %2324 = vmatpush3.bf16.msra.mxu1 %v2323_v56 }
 0x1e2   : > { %1936 = vmatmul.mubr.f32.vlgmr.msra.gmra.mrb[0].mxu0 %v3376_v8 }
 0x1e3   : > { %1971 = vmatmul.mubr.f32.vlgmr.msra.gmra.mrb[0].mxu1 %v1288_v57 }
 0x2b5   : > { %v1388_v58 = vpop.f32.mrb[0].mxu0 }
 0x2b6   : > { %v1458_v59 = vpop.f32.mrb[0].mxu1  ;;  %v1937_v62 = vpop.f32.mrb[1].mxu0 }
 0x2b7   : > { %v1459_v0 = vadd.f32 %v1458_v59, %v1388_v58  ;;  %v1972_v1 = vpop.f32.mrb[1].mxu1 }
 0x2b9   : > { %v1469_v2 = vadd.f32 %v1690_v60, %v1459_v0 }
 0x2bb   : > { %1470 = vst [vmem:[%s3515_s8] sm:$0xff] %v1469_v2 }
 0x2bc PF: > { %s18_s27 = sadd.s32 1, %s2375_s27  }
 0x2bd   : > { %p15_p7 = scmp.ge.s32.totalorder %s18_s27, 10  }
 0x2bf   :  { %17 = sbr.rel (!%p15_p7) target bundleno = 1 (0x1), region = 99 }

</bundles_post_ra>
